<compile_context>
chip_gen: v6e
topology: v6e:2x2x1
jax: 0.10.0
libtpu: 0.0.40
codegen_flags: <defaults>
</compile_context>

<pallas_src>
import numpy as np
import jax
import jax.numpy as jnp
from jax import lax
from jax.experimental import pallas as pl
from jax.experimental.pallas import tpu as pltpu

PAD = 0.0          # pad_token used as padding_value in pad_packed_sequence
NUM_LAYERS = 4     # rnn1..rnn4


# ----------------------------------------------------------------------------
# Small helpers
# ----------------------------------------------------------------------------
def _round_up(x, m):
    return (x + m - 1) // m * m


def _pick_tile(dim, target, align):
    """Largest tile <= target that divides dim and is `align`-aligned, else full dim."""
    if dim <= target:
        return dim
    t = (target // align) * align
    while t >= align:
        if dim % t == 0:
            return t
        t -= align
    return dim


def _time_block(T, target=16):
    tt = min(T, target)
    while T % tt != 0:
        tt -= 1
    return tt


def _batch_block(Bp):
    # aim for >= 2 batch tiles when Bp >= 16 so a "parallel" axis feeds both v7x cores
    target = min(64, max(8, Bp // 2))
    tb = min(Bp, target)
    while tb > 0 and (Bp % tb != 0 or tb % 8 != 0):
        tb -= 8
    return tb if tb > 0 else Bp


# ----------------------------------------------------------------------------
# Parameter init (deterministic, mirrors nn.Embedding / nn.LSTM / nn.Linear init)
# ----------------------------------------------------------------------------
def make_params(key, ntoken, ninp, nhid):
    assert ninp == nhid, "residual adds in the reference model require ninp == nhid"
    ks = jax.random.split(key, 2 + NUM_LAYERS)
    initrange = 0.1
    params = {}
    params["emb"] = jax.random.uniform(
        ks[0], (ntoken, ninp), jnp.float32, -initrange, initrange)

    stdv = 1.0 / np.sqrt(nhid)
    w_ih, w_hh, bias = [], [], []
    for l in range(NUM_LAYERS):
        k1, k2, k3, k4 = jax.random.split(ks[1 + l], 4)
        # PyTorch LSTM: weight_ih (4H, ninp), weight_hh (4H, H), gate order i, f, g, o
        W_ih = jax.random.uniform(k1, (4 * nhid, ninp), jnp.float32, -stdv, stdv)
        W_hh = jax.random.uniform(k2, (4 * nhid, nhid), jnp.float32, -stdv, stdv)
        b_ih = jax.random.uniform(k3, (4 * nhid,), jnp.float32, -stdv, stdv)
        b_hh = jax.random.uniform(k4, (4 * nhid,), jnp.float32, -stdv, stdv)
        w_ih.append(W_ih.T)                    # (H, 4H)  pre-transposed for x @ W
        w_hh.append(W_hh.T)                    # (H, 4H)
        bias.append((b_ih + b_hh)[None, :])    # (1, 4H)
    params["w_ih"] = jnp.stack(w_ih)           # (4, H, 4H)
    params["w_hh"] = jnp.stack(w_hh)           # (4, H, 4H)
    params["b"] = jnp.stack(bias)              # (4, 1, 4H)

    params["w_dec"] = jax.random.uniform(
        ks[-1], (ntoken, nhid), jnp.float32, -initrange, initrange).T  # (H, V)
    params["b_dec"] = jnp.zeros((1, ntoken), jnp.float32)              # decoder.bias.zero_()
    return params


def _pad_params_for_tpu(params, H, Hp):
    """Zero-pad hidden/emb dims from H to Hp (lane multiple).  Numerically exact:
    padded hidden units compute sigmoid(0)*0 pieces that stay exactly zero."""
    dH = Hp - H

    def pad_gate_cols(w):                       # (..., 4*H) -> (..., 4*Hp), per gate block
        lead = w.shape[:-1]
        w = w.reshape(lead + (4, H))
        w = jnp.pad(w, [(0, 0)] * len(lead) + [(0, 0), (0, dH)])
        return w.reshape(lead + (4 * Hp,))

    p = {}
    p["emb"] = jnp.pad(params["emb"], ((0, 0), (0, dH)))
    p["w_ih"] = pad_gate_cols(jnp.pad(params["w_ih"], ((0, 0), (0, dH), (0, 0))))
    p["w_hh"] = pad_gate_cols(jnp.pad(params["w_hh"], ((0, 0), (0, dH), (0, 0))))
    p["b"] = pad_gate_cols(params["b"])
    p["w_dec"] = jnp.pad(params["w_dec"], ((0, dH), (0, 0)))
    p["b_dec"] = params["b_dec"]
    return p


# ----------------------------------------------------------------------------
# Pallas kernel 1: tiled matmul + bias (used for input projections and decoder)
# ----------------------------------------------------------------------------
def _matmul_bias_kernel(a_ref, w_ref, b_ref, o_ref):
    o_ref[...] = (jnp.dot(a_ref[...], w_ref[...], preferred_element_type=jnp.float32)
                  + b_ref[...]).astype(o_ref.dtype)


def matmul_bias(a, w, bias, *, tm_target=256, tn_target=512):
    """out = a @ w + bias   (a: (M, K) f32, w: (K, N) f32, bias: (1, N) f32)."""
    M, K = a.shape
    Kw, N = w.shape
    assert K == Kw
    bias2d = bias.reshape(1, N)
    tm = _pick_tile(M, tm_target, 8)
    tn = _pick_tile(N, tn_target, 128)
    grid = (M // tm, N // tn)
    return pl.pallas_call(
        _matmul_bias_kernel,
        out_shape=jax.ShapeDtypeStruct((M, N), jnp.float32),
        grid_spec=pltpu.PrefetchScalarGridSpec(
            num_scalar_prefetch=0,
            grid=grid,
            in_specs=[
                pl.BlockSpec((tm, K), lambda i, j: (i, 0)),
                pl.BlockSpec((K, tn), lambda i, j: (0, j)),
                pl.BlockSpec((1, tn), lambda i, j: (0, j)),
            ],
            out_specs=pl.BlockSpec((tm, tn), lambda i, j: (i, j)),
        ),
        compiler_params=pltpu.CompilerParams(
            dimension_semantics=("parallel", "parallel")),
    )(a, w, bias2d)


# ----------------------------------------------------------------------------
# Pallas kernel 2: one LSTM layer's recurrence (h @ W_hh only) + fused residual add
#   grid = (batch tiles [parallel], time blocks [arbitrary]); TT steps per grid iter
# ----------------------------------------------------------------------------
def _lstm_layer_kernel(lens_ref, xproj_ref, x_ref, w_hh_ref,
                       xres_ref, h_out_ref, c_out_ref,
                       h_sc, c_sc):
    tblk = pl.program_id(1)
    TT = xproj_ref.shape[0]
    H = x_ref.shape[2]

    @pl.when(tblk == 0)
    def _():
        h_sc[...] = jnp.zeros_like(h_sc)
        c_sc[...] = jnp.zeros_like(c_sc)

    lens = lens_ref[...]          # (TB, 1) int32
    w_hh = w_hh_ref[...]          # (H, 4H), loaded once per grid step (hoisted)

    def step(i, carry):
        h, c = carry
        # xproj already holds x @ W_ih + (b_ih + b_hh); only the recurrent matmul here.
        gates = xproj_ref[i] + jnp.dot(h, w_hh, preferred_element_type=jnp.float32)
        i_g = jax.nn.sigmoid(gates[:, 0 * H:1 * H])
        f_g = jax.nn.sigmoid(gates[:, 1 * H:2 * H])
        g_g = jnp.tanh(gates[:, 2 * H:3 * H])
        o_g = jax.nn.sigmoid(gates[:, 3 * H:4 * H])
        c_new = f_g * c + i_g * g_g
        h_new = o_g * jnp.tanh(c_new)
        # packed-sequence semantics: freeze state and pad the output past lengths[b]
        mask = jnp.broadcast_to(lens > (tblk * TT + i), h_new.shape)
        h = jnp.where(mask, h_new, h)
        c = jnp.where(mask, c_new, c)
        # residual add fused; x is already exactly PAD (== 0) at padded positions,
        # so no re-masking of x is needed (PAD == 0.0).
        xres_ref[i] = x_ref[i] + jnp.where(mask, h_new, PAD)
        return h, c

    h, c = lax.fori_loop(0, TT, step, (h_sc[...], c_sc[...]), unroll=True)
    h_sc[...] = h
    c_sc[...] = c

    @pl.when(tblk == pl.num_programs(1) - 1)
    def _():
        h_out_ref[0] = h
        c_out_ref[0] = c


def lstm_layer(xproj, x, lens2d, w_hh, *, tb, tt):
    T, Bp, H4 = xproj.shape
    H = x.shape[2]
    grid = (Bp // tb, T // tt)
    out_shape = (jax.ShapeDtypeStruct((T, Bp, H), jnp.float32),   # residual stream out
                 jax.ShapeDtypeStruct((1, Bp, H), jnp.float32),   # h_n of this layer
                 jax.ShapeDtypeStruct((1, Bp, H), jnp.float32))   # c_n of this layer
    return pl.pallas_call(
        _lstm_layer_kernel,
        out_shape=out_shape,
        grid_spec=pltpu.PrefetchScalarGridSpec(
            num_scalar_prefetch=0,
            grid=grid,
            in_specs=[
                pl.BlockSpec((tb, 1), lambda b, t: (b, 0)),            # lengths (B, 1)
                pl.BlockSpec((tt, tb, H4), lambda b, t: (t, b, 0)),    # x @ W_ih + b
                pl.BlockSpec((tt, tb, H), lambda b, t: (t, b, 0)),     # residual stream in
                pl.BlockSpec((H, H4), lambda b, t: (0, 0)),            # W_hh (constant index)
            ],
            out_specs=[
                pl.BlockSpec((tt, tb, H), lambda b, t: (t, b, 0)),     # residual stream out
                pl.BlockSpec((1, tb, H), lambda b, t: (0, b, 0)),      # h_n (resident)
                pl.BlockSpec((1, tb, H), lambda b, t: (0, b, 0)),      # c_n (resident)
            ],
            scratch_shapes=[
                pltpu.VMEM((tb, H), jnp.float32),                      # h carry
                pltpu.VMEM((tb, H), jnp.float32),                      # c carry
            ],
        ),
        compiler_params=pltpu.CompilerParams(
            dimension_semantics=("parallel", "arbitrary")),
    )(lens2d, xproj, x, w_hh)


# ----------------------------------------------------------------------------
# Full forward
# ----------------------------------------------------------------------------
def rnn_model_forward(tokens, lengths, params):
    """tokens: (B, T) int32, lengths: (B,) int32.

    Returns (decoded (B, T, ntoken), (h_n, c_n) of rnn4, lengths).  The decoded
    tensor covers the full padded length T (positions t >= lengths[b] hold
    decoder(PAD + PAD)); slice to max(lengths) outside if the truncated
    pad_packed view is needed — kept static-shape so the whole forward is jittable.
    """
    B, T = tokens.shape
    V, H = params["emb"].shape
    Hp = _round_up(H, 128)        # lane-align hidden size (per gate block)
    Bp = _round_up(B, 8)          # sublane-align batch

    p = _pad_params_for_tpu(params, H, Hp)
    tokens_p = jnp.pad(tokens, ((0, Bp - B), (0, 0)))                 # pad rows use token 0
    lengths_p = jnp.pad(lengths.astype(jnp.int32), (0, Bp - B))       # pad rows: length 0

    TT = _time_block(T)
    TB = _batch_block(Bp)

    # Embedding lookup gathered directly into time-major (T, Bp, Hp) layout
    # (transpose the tiny token matrix instead of the embedded tensor).
    emb = jnp.take(p["emb"], tokens_p.T, axis=0)
    # Mask padded positions to PAD once; with PAD == 0 the residual stream then stays
    # exactly PAD at padded positions through every layer (matches the pack/pad_packed
    # round trips in the reference).  Dropout == identity.
    valid = (jnp.arange(T, dtype=jnp.int32)[:, None] < lengths_p[None, :])[..., None]
    x = jnp.where(valid, emb, PAD)                       # (T, Bp, Hp)
    lens2d = lengths_p[:, None]                          # (Bp, 1)

    h_n = c_n = None
    for l in range(NUM_LAYERS):
        # Non-recurrent input projection batched over all T*Bp rows (MXU-dense).
        xproj = matmul_bias(x.reshape(T * Bp, Hp), p["w_ih"][l], p["b"][l])
        xproj = xproj.reshape(T, Bp, 4 * Hp)
        # Serial recurrence (only h @ W_hh on the critical path) + fused residual add.
        x, h_n, c_n = lstm_layer(xproj, x, lens2d, p["w_hh"][l], tb=TB, tt=TT)

    # Decoder as one tiled (B*T, Hp) @ (Hp, V) matmul; the transpose is at H width.
    x_bt = jnp.transpose(x, (1, 0, 2)).reshape(Bp * T, Hp)
    decoded = matmul_bias(x_bt, p["w_dec"], p["b_dec"]).reshape(Bp, T, V)

    return decoded[:B], (h_n[:, :B, :H], c_n[:, :B, :H]), lengths


# ----------------------------------------------------------------------------
# Pure-JAX reference (same math) for a sanity check
# ----------------------------------------------------------------------------
def rnn_model_reference(tokens, lengths, params):
    emb = jnp.take(params["emb"], tokens, axis=0)
    B, T, H = emb.shape
    mask = (jnp.arange(T)[None, :] < lengths[:, None])[..., None]   # (B, T, 1)
    x = emb
    h_fin = c_fin = None
    for l in range(NUM_LAYERS):
        h = jnp.zeros((B, H), jnp.float32)
        c = jnp.zeros((B, H), jnp.float32)
        outs = []
        for t in range(T):
            gates = (x[:, t, :] @ params["w_ih"][l]
                     + h @ params["w_hh"][l] + params["b"][l])
            i_g = jax.nn.sigmoid(gates[:, :H])
            f_g = jax.nn.sigmoid(gates[:, H:2 * H])
            g_g = jnp.tanh(gates[:, 2 * H:3 * H])
            o_g = jax.nn.sigmoid(gates[:, 3 * H:])
            c_new = f_g * c + i_g * g_g
            h_new = o_g * jnp.tanh(c_new)
            m = mask[:, t]
            h = jnp.where(m, h_new, h)
            c = jnp.where(m, c_new, c)
            outs.append(jnp.where(m, h_new, PAD))
        out = jnp.stack(outs, axis=1)
        x = jnp.where(mask, x, PAD) + out
        h_fin, c_fin = h, c
    dec = (x.reshape(B * T, H) @ params["w_dec"] + params["b_dec"]).reshape(B, T, -1)
    return dec, (h_fin[None], c_fin[None])


if __name__ == "__main__":
    key = jax.random.PRNGKey(0)
    ntoken, ninp, nhid = 64, 32, 32
    B, T = 2, 8

    kp, kt = jax.random.split(key)
    params = make_params(kp, ntoken, ninp, nhid)
    tokens = jax.random.randint(kt, (B, T), 0, ntoken, dtype=jnp.int32)
    lengths = jnp.array([8, 5], dtype=jnp.int32)

    fwd = jax.jit(rnn_model_forward)
    decoded, (h_n, c_n), lens_out = fwd(tokens, lengths, params)
    jax.block_until_ready(decoded)
    jax.block_until_ready(h_n)
    jax.block_until_ready(c_n)

    dec_ref, (h_ref, c_ref) = rnn_model_reference(tokens, lengths, params)
    np.testing.assert_allclose(np.asarray(decoded), np.asarray(dec_ref), rtol=1e-4, atol=1e-4)
    np.testing.assert_allclose(np.asarray(h_n), np.asarray(h_ref), rtol=1e-4, atol=1e-4)
    np.testing.assert_allclose(np.asarray(c_n), np.asarray(c_ref), rtol=1e-4, atol=1e-4)

    print("KERNEL_OK")
</pallas_src>

<mosaic_0001>
module attributes {stable_mosaic.version = 11 : i64} {
  func.func @_lstm_layer_kernel(%arg0: i32, %arg1: i32, %arg2: memref<8x1xi32, #tpu.memory_space<vmem>>, %arg3: memref<8x8x512xf32, #tpu.memory_space<vmem>>, %arg4: memref<8x8x128xf32, #tpu.memory_space<vmem>>, %arg5: memref<128x512xf32, #tpu.memory_space<vmem>>, %arg6: memref<8x8x128xf32, #tpu.memory_space<vmem>>, %arg7: memref<1x8x128xf32, #tpu.memory_space<vmem>>, %arg8: memref<1x8x128xf32, #tpu.memory_space<vmem>>, %arg9: memref<8x128xf32, #tpu.memory_space<vmem>>, %arg10: memref<8x128xf32, #tpu.memory_space<vmem>>) attributes {dimension_semantics = [#tpu.dimension_semantics<parallel>, #tpu.dimension_semantics<arbitrary>], iteration_bounds = array<i64: 1, 1>, scalar_prefetch = 0 : i64, scratch_operands = 2 : i64, tpu.core_type = #tpu.core_type<tc>, window_params = [{transform_indices = @transform_0, window_bounds = array<i64: 8, 1>}, {transform_indices = @transform_1, window_bounds = array<i64: 8, 8, 512>}, {transform_indices = @transform_2, window_bounds = array<i64: 8, 8, 128>}, {pipeline_mode = #tpu.pipeline_mode<synchronous>, transform_indices = @transform_3, window_bounds = array<i64: 128, 512>}, {transform_indices = @transform_4, window_bounds = array<i64: 8, 8, 128>}, {transform_indices = @transform_5, window_bounds = array<i64: 1, 8, 128>}, {transform_indices = @transform_6, window_bounds = array<i64: 1, 8, 128>}]} {
    %c0_i32 = arith.constant 0 : i32
    %0 = arith.cmpi eq, %arg1, %c0_i32 : i32
    %1 = arith.extui %0 : i1 to i32
    %c0_i32_0 = arith.constant 0 : i32
    %2 = arith.cmpi ne, %1, %c0_i32_0 : i32
    scf.if %2 {
      %cst_110 = arith.constant 0.000000e+00 : f32
      %396 = vector.broadcast %cst_110 : f32 to vector<8x128xf32>
      %c0_111 = arith.constant 0 : index
      %c0_112 = arith.constant 0 : index
      %397 = vector.load %arg9[%c0_111, %c0_112] : memref<8x128xf32, #tpu.memory_space<vmem>>, vector<8x128xf32>
      tpu.vector_store %arg9[%c0_111, %c0_112], %396 {strides = array<i32>} : memref<8x128xf32, #tpu.memory_space<vmem>>, vector<8x128xf32>,
      %cst_113 = arith.constant 0.000000e+00 : f32
      %398 = vector.broadcast %cst_113 : f32 to vector<8x128xf32>
      %c0_114 = arith.constant 0 : index
      %c0_115 = arith.constant 0 : index
      %399 = vector.load %arg10[%c0_114, %c0_115] : memref<8x128xf32, #tpu.memory_space<vmem>>, vector<8x128xf32>
      tpu.vector_store %arg10[%c0_114, %c0_115], %398 {strides = array<i32>} : memref<8x128xf32, #tpu.memory_space<vmem>>, vector<8x128xf32>,
    } else {
    }
    %c0 = arith.constant 0 : index
    %c0_1 = arith.constant 0 : index
    %3 = vector.load %arg2[%c0, %c0_1] : memref<8x1xi32, #tpu.memory_space<vmem>>, vector<8x1xi32>
    %c0_2 = arith.constant 0 : index
    %c0_3 = arith.constant 0 : index
    %4 = vector.load %arg5[%c0_2, %c0_3] : memref<128x512xf32, #tpu.memory_space<vmem>>, vector<128x512xf32>
    %c0_4 = arith.constant 0 : index
    %c0_5 = arith.constant 0 : index
    %5 = vector.load %arg9[%c0_4, %c0_5] : memref<8x128xf32, #tpu.memory_space<vmem>>, vector<8x128xf32>
    %c0_6 = arith.constant 0 : index
    %c0_7 = arith.constant 0 : index
    %6 = vector.load %arg10[%c0_6, %c0_7] : memref<8x128xf32, #tpu.memory_space<vmem>>, vector<8x128xf32>
    %c0_i32_8 = arith.constant 0 : i32
    %7 = arith.index_cast %c0_i32_8 : i32 to index
    %c0_9 = arith.constant 0 : index
    %c0_10 = arith.constant 0 : index
    %8 = vector.load %arg3[%7, %c0_9, %c0_10] : memref<8x8x512xf32, #tpu.memory_space<vmem>>, vector<1x8x512xf32>
    %9 = vector.shape_cast %8 : vector<1x8x512xf32> to vector<8x512xf32>
    %cst = arith.constant dense<0.000000e+00> : vector<8x512xf32>
    %10 = tpu.matmul %5, %4, %cst {dimension_numbers = #tpu.dot_dimension_numbers<[1], [0], [0], [1], [0, 0, 1, 1], [], []>} : vector<8x128xf32>, vector<128x512xf32>, vector<8x512xf32> -> vector<8x512xf32>
    %11 = arith.addf %9, %10 : vector<8x512xf32>
    %12 = vector.extract_strided_slice %11 {offsets = [0, 0], sizes = [8, 128], strides = [1, 1]} : vector<8x512xf32> to vector<8x128xf32>
    %13 = arith.negf %12 : vector<8x128xf32>
    %14 = math.exp %13 : vector<8x128xf32>
    %cst_11 = arith.constant 1.000000e+00 : f32
    %15 = vector.broadcast %cst_11 : f32 to vector<8x128xf32>
    %16 = arith.addf %15, %14 : vector<8x128xf32>
    %17 = arith.divf %15, %16 : vector<8x128xf32>
    %18 = vector.extract_strided_slice %11 {offsets = [0, 128], sizes = [8, 128], strides = [1, 1]} : vector<8x512xf32> to vector<8x128xf32>
    %19 = arith.negf %18 : vector<8x128xf32>
    %20 = math.exp %19 : vector<8x128xf32>
    %cst_12 = arith.constant 1.000000e+00 : f32
    %21 = vector.broadcast %cst_12 : f32 to vector<8x128xf32>
    %22 = arith.addf %21, %20 : vector<8x128xf32>
    %23 = arith.divf %21, %22 : vector<8x128xf32>
    %24 = vector.extract_strided_slice %11 {offsets = [0, 256], sizes = [8, 128], strides = [1, 1]} : vector<8x512xf32> to vector<8x128xf32>
    %25 = math.tanh %24 : vector<8x128xf32>
    %26 = vector.extract_strided_slice %11 {offsets = [0, 384], sizes = [8, 128], strides = [1, 1]} : vector<8x512xf32> to vector<8x128xf32>
    %27 = arith.negf %26 : vector<8x128xf32>
    %28 = math.exp %27 : vector<8x128xf32>
    %cst_13 = arith.constant 1.000000e+00 : f32
    %29 = vector.broadcast %cst_13 : f32 to vector<8x128xf32>
    %30 = arith.addf %29, %28 : vector<8x128xf32>
    %31 = arith.divf %29, %30 : vector<8x128xf32>
    %32 = arith.mulf %23, %6 : vector<8x128xf32>
    %33 = arith.mulf %17, %25 : vector<8x128xf32>
    %34 = arith.addf %32, %33 : vector<8x128xf32>
    %35 = math.tanh %34 : vector<8x128xf32>
    %36 = arith.mulf %31, %35 : vector<8x128xf32>
    %c8_i32 = arith.constant 8 : i32
    %37 = arith.muli %arg1, %c8_i32 : i32
    %38 = arith.addi %37, %c0_i32_8 : i32
    %39 = vector.broadcast %38 : i32 to vector<8x1xi32>
    %40 = arith.cmpi sgt, %3, %39 : vector<8x1xi32>
    %41 = vector.shape_cast %40 : vector<8x1xi1> to vector<8x1xi1>
    %42 = vector.broadcast %41 : vector<8x1xi1> to vector<8x128xi1>
    %43 = arith.select %42, %36, %5 : vector<8x128xi1>, vector<8x128xf32>
    %44 = arith.select %42, %34, %6 : vector<8x128xi1>, vector<8x128xf32>
    %45 = arith.index_cast %c0_i32_8 : i32 to index
    %c0_14 = arith.constant 0 : index
    %c0_15 = arith.constant 0 : index
    %46 = vector.load %arg4[%45, %c0_14, %c0_15] : memref<8x8x128xf32, #tpu.memory_space<vmem>>, vector<1x8x128xf32>
    %47 = vector.shape_cast %46 : vector<1x8x128xf32> to vector<8x128xf32>
    %cst_16 = arith.constant 0.000000e+00 : f32
    %48 = vector.broadcast %cst_16 : f32 to vector<8x128xf32>
    %49 = arith.select %42, %36, %48 : vector<8x128xi1>, vector<8x128xf32>
    %50 = arith.addf %47, %49 : vector<8x128xf32>
    %51 = arith.index_cast %c0_i32_8 : i32 to index
    %c0_17 = arith.constant 0 : index
    %c0_18 = arith.constant 0 : index
    %52 = vector.load %arg6[%51, %c0_17, %c0_18] : memref<8x8x128xf32, #tpu.memory_space<vmem>>, vector<1x8x128xf32>
    %53 = vector.shape_cast %52 : vector<1x8x128xf32> to vector<8x128xf32>
    %54 = vector.shape_cast %50 : vector<8x128xf32> to vector<1x8x128xf32>
    tpu.vector_store %arg6[%51, %c0_17, %c0_18], %54 {strides = array<i32>} : memref<8x8x128xf32, #tpu.memory_space<vmem>>, vector<1x8x128xf32>,
    %c1_i32 = arith.constant 1 : i32
    %55 = arith.index_cast %c1_i32 : i32 to index
    %c0_19 = arith.constant 0 : index
    %c0_20 = arith.constant 0 : index
    %56 = vector.load %arg3[%55, %c0_19, %c0_20] : memref<8x8x512xf32, #tpu.memory_space<vmem>>, vector<1x8x512xf32>
    %57 = vector.shape_cast %56 : vector<1x8x512xf32> to vector<8x512xf32>
    %cst_21 = arith.constant dense<0.000000e+00> : vector<8x512xf32>
    %58 = tpu.matmul %43, %4, %cst_21 {dimension_numbers = #tpu.dot_dimension_numbers<[1], [0], [0], [1], [0, 0, 1, 1], [], []>} : vector<8x128xf32>, vector<128x512xf32>, vector<8x512xf32> -> vector<8x512xf32>
    %59 = arith.addf %57, %58 : vector<8x512xf32>
    %60 = vector.extract_strided_slice %59 {offsets = [0, 0], sizes = [8, 128], strides = [1, 1]} : vector<8x512xf32> to vector<8x128xf32>
    %61 = arith.negf %60 : vector<8x128xf32>
    %62 = math.exp %61 : vector<8x128xf32>
    %cst_22 = arith.constant 1.000000e+00 : f32
    %63 = vector.broadcast %cst_22 : f32 to vector<8x128xf32>
    %64 = arith.addf %63, %62 : vector<8x128xf32>
    %65 = arith.divf %63, %64 : vector<8x128xf32>
    %66 = vector.extract_strided_slice %59 {offsets = [0, 128], sizes = [8, 128], strides = [1, 1]} : vector<8x512xf32> to vector<8x128xf32>
    %67 = arith.negf %66 : vector<8x128xf32>
    %68 = math.exp %67 : vector<8x128xf32>
    %cst_23 = arith.constant 1.000000e+00 : f32
    %69 = vector.broadcast %cst_23 : f32 to vector<8x128xf32>
    %70 = arith.addf %69, %68 : vector<8x128xf32>
    %71 = arith.divf %69, %70 : vector<8x128xf32>
    %72 = vector.extract_strided_slice %59 {offsets = [0, 256], sizes = [8, 128], strides = [1, 1]} : vector<8x512xf32> to vector<8x128xf32>
    %73 = math.tanh %72 : vector<8x128xf32>
    %74 = vector.extract_strided_slice %59 {offsets = [0, 384], sizes = [8, 128], strides = [1, 1]} : vector<8x512xf32> to vector<8x128xf32>
    %75 = arith.negf %74 : vector<8x128xf32>
    %76 = math.exp %75 : vector<8x128xf32>
    %cst_24 = arith.constant 1.000000e+00 : f32
    %77 = vector.broadcast %cst_24 : f32 to vector<8x128xf32>
    %78 = arith.addf %77, %76 : vector<8x128xf32>
    %79 = arith.divf %77, %78 : vector<8x128xf32>
    %80 = arith.mulf %71, %44 : vector<8x128xf32>
    %81 = arith.mulf %65, %73 : vector<8x128xf32>
    %82 = arith.addf %80, %81 : vector<8x128xf32>
    %83 = math.tanh %82 : vector<8x128xf32>
    %84 = arith.mulf %79, %83 : vector<8x128xf32>
    %c8_i32_25 = arith.constant 8 : i32
    %85 = arith.muli %arg1, %c8_i32_25 : i32
    %86 = arith.addi %85, %c1_i32 : i32
    %87 = vector.broadcast %86 : i32 to vector<8x1xi32>
    %88 = arith.cmpi sgt, %3, %87 : vector<8x1xi32>
    %89 = vector.shape_cast %88 : vector<8x1xi1> to vector<8x1xi1>
    %90 = vector.broadcast %89 : vector<8x1xi1> to vector<8x128xi1>
    %91 = arith.select %90, %84, %43 : vector<8x128xi1>, vector<8x128xf32>
    %92 = arith.select %90, %82, %44 : vector<8x128xi1>, vector<8x128xf32>
    %93 = arith.index_cast %c1_i32 : i32 to index
    %c0_26 = arith.constant 0 : index
    %c0_27 = arith.constant 0 : index
    %94 = vector.load %arg4[%93, %c0_26, %c0_27] : memref<8x8x128xf32, #tpu.memory_space<vmem>>, vector<1x8x128xf32>
    %95 = vector.shape_cast %94 : vector<1x8x128xf32> to vector<8x128xf32>
    %cst_28 = arith.constant 0.000000e+00 : f32
    %96 = vector.broadcast %cst_28 : f32 to vector<8x128xf32>
    %97 = arith.select %90, %84, %96 : vector<8x128xi1>, vector<8x128xf32>
    %98 = arith.addf %95, %97 : vector<8x128xf32>
    %99 = arith.index_cast %c1_i32 : i32 to index
    %c0_29 = arith.constant 0 : index
    %c0_30 = arith.constant 0 : index
    %100 = vector.load %arg6[%99, %c0_29, %c0_30] : memref<8x8x128xf32, #tpu.memory_space<vmem>>, vector<1x8x128xf32>
    %101 = vector.shape_cast %100 : vector<1x8x128xf32> to vector<8x128xf32>
    %102 = vector.shape_cast %98 : vector<8x128xf32> to vector<1x8x128xf32>
    tpu.vector_store %arg6[%99, %c0_29, %c0_30], %102 {strides = array<i32>} : memref<8x8x128xf32, #tpu.memory_space<vmem>>, vector<1x8x128xf32>,
    %c2_i32 = arith.constant 2 : i32
    %103 = arith.index_cast %c2_i32 : i32 to index
    %c0_31 = arith.constant 0 : index
    %c0_32 = arith.constant 0 : index
    %104 = vector.load %arg3[%103, %c0_31, %c0_32] : memref<8x8x512xf32, #tpu.memory_space<vmem>>, vector<1x8x512xf32>
    %105 = vector.shape_cast %104 : vector<1x8x512xf32> to vector<8x512xf32>
    %cst_33 = arith.constant dense<0.000000e+00> : vector<8x512xf32>
    %106 = tpu.matmul %91, %4, %cst_33 {dimension_numbers = #tpu.dot_dimension_numbers<[1], [0], [0], [1], [0, 0, 1, 1], [], []>} : vector<8x128xf32>, vector<128x512xf32>, vector<8x512xf32> -> vector<8x512xf32>
    %107 = arith.addf %105, %106 : vector<8x512xf32>
    %108 = vector.extract_strided_slice %107 {offsets = [0, 0], sizes = [8, 128], strides = [1, 1]} : vector<8x512xf32> to vector<8x128xf32>
    %109 = arith.negf %108 : vector<8x128xf32>
    %110 = math.exp %109 : vector<8x128xf32>
    %cst_34 = arith.constant 1.000000e+00 : f32
    %111 = vector.broadcast %cst_34 : f32 to vector<8x128xf32>
    %112 = arith.addf %111, %110 : vector<8x128xf32>
    %113 = arith.divf %111, %112 : vector<8x128xf32>
    %114 = vector.extract_strided_slice %107 {offsets = [0, 128], sizes = [8, 128], strides = [1, 1]} : vector<8x512xf32> to vector<8x128xf32>
    %115 = arith.negf %114 : vector<8x128xf32>
    %116 = math.exp %115 : vector<8x128xf32>
    %cst_35 = arith.constant 1.000000e+00 : f32
    %117 = vector.broadcast %cst_35 : f32 to vector<8x128xf32>
    %118 = arith.addf %117, %116 : vector<8x128xf32>
    %119 = arith.divf %117, %118 : vector<8x128xf32>
    %120 = vector.extract_strided_slice %107 {offsets = [0, 256], sizes = [8, 128], strides = [1, 1]} : vector<8x512xf32> to vector<8x128xf32>
    %121 = math.tanh %120 : vector<8x128xf32>
    %122 = vector.extract_strided_slice %107 {offsets = [0, 384], sizes = [8, 128], strides = [1, 1]} : vector<8x512xf32> to vector<8x128xf32>
    %123 = arith.negf %122 : vector<8x128xf32>
    %124 = math.exp %123 : vector<8x128xf32>
    %cst_36 = arith.constant 1.000000e+00 : f32
    %125 = vector.broadcast %cst_36 : f32 to vector<8x128xf32>
    %126 = arith.addf %125, %124 : vector<8x128xf32>
    %127 = arith.divf %125, %126 : vector<8x128xf32>
    %128 = arith.mulf %119, %92 : vector<8x128xf32>
    %129 = arith.mulf %113, %121 : vector<8x128xf32>
    %130 = arith.addf %128, %129 : vector<8x128xf32>
    %131 = math.tanh %130 : vector<8x128xf32>
    %132 = arith.mulf %127, %131 : vector<8x128xf32>
    %c8_i32_37 = arith.constant 8 : i32
    %133 = arith.muli %arg1, %c8_i32_37 : i32
    %134 = arith.addi %133, %c2_i32 : i32
    %135 = vector.broadcast %134 : i32 to vector<8x1xi32>
    %136 = arith.cmpi sgt, %3, %135 : vector<8x1xi32>
    %137 = vector.shape_cast %136 : vector<8x1xi1> to vector<8x1xi1>
    %138 = vector.broadcast %137 : vector<8x1xi1> to vector<8x128xi1>
    %139 = arith.select %138, %132, %91 : vector<8x128xi1>, vector<8x128xf32>
    %140 = arith.select %138, %130, %92 : vector<8x128xi1>, vector<8x128xf32>
    %141 = arith.index_cast %c2_i32 : i32 to index
    %c0_38 = arith.constant 0 : index
    %c0_39 = arith.constant 0 : index
    %142 = vector.load %arg4[%141, %c0_38, %c0_39] : memref<8x8x128xf32, #tpu.memory_space<vmem>>, vector<1x8x128xf32>
    %143 = vector.shape_cast %142 : vector<1x8x128xf32> to vector<8x128xf32>
    %cst_40 = arith.constant 0.000000e+00 : f32
    %144 = vector.broadcast %cst_40 : f32 to vector<8x128xf32>
    %145 = arith.select %138, %132, %144 : vector<8x128xi1>, vector<8x128xf32>
    %146 = arith.addf %143, %145 : vector<8x128xf32>
    %147 = arith.index_cast %c2_i32 : i32 to index
    %c0_41 = arith.constant 0 : index
    %c0_42 = arith.constant 0 : index
    %148 = vector.load %arg6[%147, %c0_41, %c0_42] : memref<8x8x128xf32, #tpu.memory_space<vmem>>, vector<1x8x128xf32>
    %149 = vector.shape_cast %148 : vector<1x8x128xf32> to vector<8x128xf32>
    %150 = vector.shape_cast %146 : vector<8x128xf32> to vector<1x8x128xf32>
    tpu.vector_store %arg6[%147, %c0_41, %c0_42], %150 {strides = array<i32>} : memref<8x8x128xf32, #tpu.memory_space<vmem>>, vector<1x8x128xf32>,
    %c3_i32 = arith.constant 3 : i32
    %151 = arith.index_cast %c3_i32 : i32 to index
    %c0_43 = arith.constant 0 : index
    %c0_44 = arith.constant 0 : index
    %152 = vector.load %arg3[%151, %c0_43, %c0_44] : memref<8x8x512xf32, #tpu.memory_space<vmem>>, vector<1x8x512xf32>
    %153 = vector.shape_cast %152 : vector<1x8x512xf32> to vector<8x512xf32>
    %cst_45 = arith.constant dense<0.000000e+00> : vector<8x512xf32>
    %154 = tpu.matmul %139, %4, %cst_45 {dimension_numbers = #tpu.dot_dimension_numbers<[1], [0], [0], [1], [0, 0, 1, 1], [], []>} : vector<8x128xf32>, vector<128x512xf32>, vector<8x512xf32> -> vector<8x512xf32>
    %155 = arith.addf %153, %154 : vector<8x512xf32>
    %156 = vector.extract_strided_slice %155 {offsets = [0, 0], sizes = [8, 128], strides = [1, 1]} : vector<8x512xf32> to vector<8x128xf32>
    %157 = arith.negf %156 : vector<8x128xf32>
    %158 = math.exp %157 : vector<8x128xf32>
    %cst_46 = arith.constant 1.000000e+00 : f32
    %159 = vector.broadcast %cst_46 : f32 to vector<8x128xf32>
    %160 = arith.addf %159, %158 : vector<8x128xf32>
    %161 = arith.divf %159, %160 : vector<8x128xf32>
    %162 = vector.extract_strided_slice %155 {offsets = [0, 128], sizes = [8, 128], strides = [1, 1]} : vector<8x512xf32> to vector<8x128xf32>
    %163 = arith.negf %162 : vector<8x128xf32>
    %164 = math.exp %163 : vector<8x128xf32>
    %cst_47 = arith.constant 1.000000e+00 : f32
    %165 = vector.broadcast %cst_47 : f32 to vector<8x128xf32>
    %166 = arith.addf %165, %164 : vector<8x128xf32>
    %167 = arith.divf %165, %166 : vector<8x128xf32>
    %168 = vector.extract_strided_slice %155 {offsets = [0, 256], sizes = [8, 128], strides = [1, 1]} : vector<8x512xf32> to vector<8x128xf32>
    %169 = math.tanh %168 : vector<8x128xf32>
    %170 = vector.extract_strided_slice %155 {offsets = [0, 384], sizes = [8, 128], strides = [1, 1]} : vector<8x512xf32> to vector<8x128xf32>
    %171 = arith.negf %170 : vector<8x128xf32>
    %172 = math.exp %171 : vector<8x128xf32>
    %cst_48 = arith.constant 1.000000e+00 : f32
    %173 = vector.broadcast %cst_48 : f32 to vector<8x128xf32>
    %174 = arith.addf %173, %172 : vector<8x128xf32>
    %175 = arith.divf %173, %174 : vector<8x128xf32>
    %176 = arith.mulf %167, %140 : vector<8x128xf32>
    %177 = arith.mulf %161, %169 : vector<8x128xf32>
    %178 = arith.addf %176, %177 : vector<8x128xf32>
    %179 = math.tanh %178 : vector<8x128xf32>
    %180 = arith.mulf %175, %179 : vector<8x128xf32>
    %c8_i32_49 = arith.constant 8 : i32
    %181 = arith.muli %arg1, %c8_i32_49 : i32
    %182 = arith.addi %181, %c3_i32 : i32
    %183 = vector.broadcast %182 : i32 to vector<8x1xi32>
    %184 = arith.cmpi sgt, %3, %183 : vector<8x1xi32>
    %185 = vector.shape_cast %184 : vector<8x1xi1> to vector<8x1xi1>
    %186 = vector.broadcast %185 : vector<8x1xi1> to vector<8x128xi1>
    %187 = arith.select %186, %180, %139 : vector<8x128xi1>, vector<8x128xf32>
    %188 = arith.select %186, %178, %140 : vector<8x128xi1>, vector<8x128xf32>
    %189 = arith.index_cast %c3_i32 : i32 to index
    %c0_50 = arith.constant 0 : index
    %c0_51 = arith.constant 0 : index
    %190 = vector.load %arg4[%189, %c0_50, %c0_51] : memref<8x8x128xf32, #tpu.memory_space<vmem>>, vector<1x8x128xf32>
    %191 = vector.shape_cast %190 : vector<1x8x128xf32> to vector<8x128xf32>
    %cst_52 = arith.constant 0.000000e+00 : f32
    %192 = vector.broadcast %cst_52 : f32 to vector<8x128xf32>
    %193 = arith.select %186, %180, %192 : vector<8x128xi1>, vector<8x128xf32>
    %194 = arith.addf %191, %193 : vector<8x128xf32>
    %195 = arith.index_cast %c3_i32 : i32 to index
    %c0_53 = arith.constant 0 : index
    %c0_54 = arith.constant 0 : index
    %196 = vector.load %arg6[%195, %c0_53, %c0_54] : memref<8x8x128xf32, #tpu.memory_space<vmem>>, vector<1x8x128xf32>
    %197 = vector.shape_cast %196 : vector<1x8x128xf32> to vector<8x128xf32>
    %198 = vector.shape_cast %194 : vector<8x128xf32> to vector<1x8x128xf32>
    tpu.vector_store %arg6[%195, %c0_53, %c0_54], %198 {strides = array<i32>} : memref<8x8x128xf32, #tpu.memory_space<vmem>>, vector<1x8x128xf32>,
    %c4_i32 = arith.constant 4 : i32
    %199 = arith.index_cast %c4_i32 : i32 to index
    %c0_55 = arith.constant 0 : index
    %c0_56 = arith.constant 0 : index
    %200 = vector.load %arg3[%199, %c0_55, %c0_56] : memref<8x8x512xf32, #tpu.memory_space<vmem>>, vector<1x8x512xf32>
    %201 = vector.shape_cast %200 : vector<1x8x512xf32> to vector<8x512xf32>
    %cst_57 = arith.constant dense<0.000000e+00> : vector<8x512xf32>
    %202 = tpu.matmul %187, %4, %cst_57 {dimension_numbers = #tpu.dot_dimension_numbers<[1], [0], [0], [1], [0, 0, 1, 1], [], []>} : vector<8x128xf32>, vector<128x512xf32>, vector<8x512xf32> -> vector<8x512xf32>
    %203 = arith.addf %201, %202 : vector<8x512xf32>
    %204 = vector.extract_strided_slice %203 {offsets = [0, 0], sizes = [8, 128], strides = [1, 1]} : vector<8x512xf32> to vector<8x128xf32>
    %205 = arith.negf %204 : vector<8x128xf32>
    %206 = math.exp %205 : vector<8x128xf32>
    %cst_58 = arith.constant 1.000000e+00 : f32
    %207 = vector.broadcast %cst_58 : f32 to vector<8x128xf32>
    %208 = arith.addf %207, %206 : vector<8x128xf32>
    %209 = arith.divf %207, %208 : vector<8x128xf32>
    %210 = vector.extract_strided_slice %203 {offsets = [0, 128], sizes = [8, 128], strides = [1, 1]} : vector<8x512xf32> to vector<8x128xf32>
    %211 = arith.negf %210 : vector<8x128xf32>
    %212 = math.exp %211 : vector<8x128xf32>
    %cst_59 = arith.constant 1.000000e+00 : f32
    %213 = vector.broadcast %cst_59 : f32 to vector<8x128xf32>
    %214 = arith.addf %213, %212 : vector<8x128xf32>
    %215 = arith.divf %213, %214 : vector<8x128xf32>
    %216 = vector.extract_strided_slice %203 {offsets = [0, 256], sizes = [8, 128], strides = [1, 1]} : vector<8x512xf32> to vector<8x128xf32>
    %217 = math.tanh %216 : vector<8x128xf32>
    %218 = vector.extract_strided_slice %203 {offsets = [0, 384], sizes = [8, 128], strides = [1, 1]} : vector<8x512xf32> to vector<8x128xf32>
    %219 = arith.negf %218 : vector<8x128xf32>
    %220 = math.exp %219 : vector<8x128xf32>
    %cst_60 = arith.constant 1.000000e+00 : f32
    %221 = vector.broadcast %cst_60 : f32 to vector<8x128xf32>
    %222 = arith.addf %221, %220 : vector<8x128xf32>
    %223 = arith.divf %221, %222 : vector<8x128xf32>
    %224 = arith.mulf %215, %188 : vector<8x128xf32>
    %225 = arith.mulf %209, %217 : vector<8x128xf32>
    %226 = arith.addf %224, %225 : vector<8x128xf32>
    %227 = math.tanh %226 : vector<8x128xf32>
    %228 = arith.mulf %223, %227 : vector<8x128xf32>
    %c8_i32_61 = arith.constant 8 : i32
    %229 = arith.muli %arg1, %c8_i32_61 : i32
    %230 = arith.addi %229, %c4_i32 : i32
    %231 = vector.broadcast %230 : i32 to vector<8x1xi32>
    %232 = arith.cmpi sgt, %3, %231 : vector<8x1xi32>
    %233 = vector.shape_cast %232 : vector<8x1xi1> to vector<8x1xi1>
    %234 = vector.broadcast %233 : vector<8x1xi1> to vector<8x128xi1>
    %235 = arith.select %234, %228, %187 : vector<8x128xi1>, vector<8x128xf32>
    %236 = arith.select %234, %226, %188 : vector<8x128xi1>, vector<8x128xf32>
    %237 = arith.index_cast %c4_i32 : i32 to index
    %c0_62 = arith.constant 0 : index
    %c0_63 = arith.constant 0 : index
    %238 = vector.load %arg4[%237, %c0_62, %c0_63] : memref<8x8x128xf32, #tpu.memory_space<vmem>>, vector<1x8x128xf32>
    %239 = vector.shape_cast %238 : vector<1x8x128xf32> to vector<8x128xf32>
    %cst_64 = arith.constant 0.000000e+00 : f32
    %240 = vector.broadcast %cst_64 : f32 to vector<8x128xf32>
    %241 = arith.select %234, %228, %240 : vector<8x128xi1>, vector<8x128xf32>
    %242 = arith.addf %239, %241 : vector<8x128xf32>
    %243 = arith.index_cast %c4_i32 : i32 to index
    %c0_65 = arith.constant 0 : index
    %c0_66 = arith.constant 0 : index
    %244 = vector.load %arg6[%243, %c0_65, %c0_66] : memref<8x8x128xf32, #tpu.memory_space<vmem>>, vector<1x8x128xf32>
    %245 = vector.shape_cast %244 : vector<1x8x128xf32> to vector<8x128xf32>
    %246 = vector.shape_cast %242 : vector<8x128xf32> to vector<1x8x128xf32>
    tpu.vector_store %arg6[%243, %c0_65, %c0_66], %246 {strides = array<i32>} : memref<8x8x128xf32, #tpu.memory_space<vmem>>, vector<1x8x128xf32>,
    %c5_i32 = arith.constant 5 : i32
    %247 = arith.index_cast %c5_i32 : i32 to index
    %c0_67 = arith.constant 0 : index
    %c0_68 = arith.constant 0 : index
    %248 = vector.load %arg3[%247, %c0_67, %c0_68] : memref<8x8x512xf32, #tpu.memory_space<vmem>>, vector<1x8x512xf32>
    %249 = vector.shape_cast %248 : vector<1x8x512xf32> to vector<8x512xf32>
    %cst_69 = arith.constant dense<0.000000e+00> : vector<8x512xf32>
    %250 = tpu.matmul %235, %4, %cst_69 {dimension_numbers = #tpu.dot_dimension_numbers<[1], [0], [0], [1], [0, 0, 1, 1], [], []>} : vector<8x128xf32>, vector<128x512xf32>, vector<8x512xf32> -> vector<8x512xf32>
    %251 = arith.addf %249, %250 : vector<8x512xf32>
    %252 = vector.extract_strided_slice %251 {offsets = [0, 0], sizes = [8, 128], strides = [1, 1]} : vector<8x512xf32> to vector<8x128xf32>
    %253 = arith.negf %252 : vector<8x128xf32>
    %254 = math.exp %253 : vector<8x128xf32>
    %cst_70 = arith.constant 1.000000e+00 : f32
    %255 = vector.broadcast %cst_70 : f32 to vector<8x128xf32>
    %256 = arith.addf %255, %254 : vector<8x128xf32>
    %257 = arith.divf %255, %256 : vector<8x128xf32>
    %258 = vector.extract_strided_slice %251 {offsets = [0, 128], sizes = [8, 128], strides = [1, 1]} : vector<8x512xf32> to vector<8x128xf32>
    %259 = arith.negf %258 : vector<8x128xf32>
    %260 = math.exp %259 : vector<8x128xf32>
    %cst_71 = arith.constant 1.000000e+00 : f32
    %261 = vector.broadcast %cst_71 : f32 to vector<8x128xf32>
    %262 = arith.addf %261, %260 : vector<8x128xf32>
    %263 = arith.divf %261, %262 : vector<8x128xf32>
    %264 = vector.extract_strided_slice %251 {offsets = [0, 256], sizes = [8, 128], strides = [1, 1]} : vector<8x512xf32> to vector<8x128xf32>
    %265 = math.tanh %264 : vector<8x128xf32>
    %266 = vector.extract_strided_slice %251 {offsets = [0, 384], sizes = [8, 128], strides = [1, 1]} : vector<8x512xf32> to vector<8x128xf32>
    %267 = arith.negf %266 : vector<8x128xf32>
    %268 = math.exp %267 : vector<8x128xf32>
    %cst_72 = arith.constant 1.000000e+00 : f32
    %269 = vector.broadcast %cst_72 : f32 to vector<8x128xf32>
    %270 = arith.addf %269, %268 : vector<8x128xf32>
    %271 = arith.divf %269, %270 : vector<8x128xf32>
    %272 = arith.mulf %263, %236 : vector<8x128xf32>
    %273 = arith.mulf %257, %265 : vector<8x128xf32>
    %274 = arith.addf %272, %273 : vector<8x128xf32>
    %275 = math.tanh %274 : vector<8x128xf32>
    %276 = arith.mulf %271, %275 : vector<8x128xf32>
    %c8_i32_73 = arith.constant 8 : i32
    %277 = arith.muli %arg1, %c8_i32_73 : i32
    %278 = arith.addi %277, %c5_i32 : i32
    %279 = vector.broadcast %278 : i32 to vector<8x1xi32>
    %280 = arith.cmpi sgt, %3, %279 : vector<8x1xi32>
    %281 = vector.shape_cast %280 : vector<8x1xi1> to vector<8x1xi1>
    %282 = vector.broadcast %281 : vector<8x1xi1> to vector<8x128xi1>
    %283 = arith.select %282, %276, %235 : vector<8x128xi1>, vector<8x128xf32>
    %284 = arith.select %282, %274, %236 : vector<8x128xi1>, vector<8x128xf32>
    %285 = arith.index_cast %c5_i32 : i32 to index
    %c0_74 = arith.constant 0 : index
    %c0_75 = arith.constant 0 : index
    %286 = vector.load %arg4[%285, %c0_74, %c0_75] : memref<8x8x128xf32, #tpu.memory_space<vmem>>, vector<1x8x128xf32>
    %287 = vector.shape_cast %286 : vector<1x8x128xf32> to vector<8x128xf32>
    %cst_76 = arith.constant 0.000000e+00 : f32
    %288 = vector.broadcast %cst_76 : f32 to vector<8x128xf32>
    %289 = arith.select %282, %276, %288 : vector<8x128xi1>, vector<8x128xf32>
    %290 = arith.addf %287, %289 : vector<8x128xf32>
    %291 = arith.index_cast %c5_i32 : i32 to index
    %c0_77 = arith.constant 0 : index
    %c0_78 = arith.constant 0 : index
    %292 = vector.load %arg6[%291, %c0_77, %c0_78] : memref<8x8x128xf32, #tpu.memory_space<vmem>>, vector<1x8x128xf32>
    %293 = vector.shape_cast %292 : vector<1x8x128xf32> to vector<8x128xf32>
    %294 = vector.shape_cast %290 : vector<8x128xf32> to vector<1x8x128xf32>
    tpu.vector_store %arg6[%291, %c0_77, %c0_78], %294 {strides = array<i32>} : memref<8x8x128xf32, #tpu.memory_space<vmem>>, vector<1x8x128xf32>,
    %c6_i32 = arith.constant 6 : i32
    %295 = arith.index_cast %c6_i32 : i32 to index
    %c0_79 = arith.constant 0 : index
    %c0_80 = arith.constant 0 : index
    %296 = vector.load %arg3[%295, %c0_79, %c0_80] : memref<8x8x512xf32, #tpu.memory_space<vmem>>, vector<1x8x512xf32>
    %297 = vector.shape_cast %296 : vector<1x8x512xf32> to vector<8x512xf32>
    %cst_81 = arith.constant dense<0.000000e+00> : vector<8x512xf32>
    %298 = tpu.matmul %283, %4, %cst_81 {dimension_numbers = #tpu.dot_dimension_numbers<[1], [0], [0], [1], [0, 0, 1, 1], [], []>} : vector<8x128xf32>, vector<128x512xf32>, vector<8x512xf32> -> vector<8x512xf32>
    %299 = arith.addf %297, %298 : vector<8x512xf32>
    %300 = vector.extract_strided_slice %299 {offsets = [0, 0], sizes = [8, 128], strides = [1, 1]} : vector<8x512xf32> to vector<8x128xf32>
    %301 = arith.negf %300 : vector<8x128xf32>
    %302 = math.exp %301 : vector<8x128xf32>
    %cst_82 = arith.constant 1.000000e+00 : f32
    %303 = vector.broadcast %cst_82 : f32 to vector<8x128xf32>
    %304 = arith.addf %303, %302 : vector<8x128xf32>
    %305 = arith.divf %303, %304 : vector<8x128xf32>
    %306 = vector.extract_strided_slice %299 {offsets = [0, 128], sizes = [8, 128], strides = [1, 1]} : vector<8x512xf32> to vector<8x128xf32>
    %307 = arith.negf %306 : vector<8x128xf32>
    %308 = math.exp %307 : vector<8x128xf32>
    %cst_83 = arith.constant 1.000000e+00 : f32
    %309 = vector.broadcast %cst_83 : f32 to vector<8x128xf32>
    %310 = arith.addf %309, %308 : vector<8x128xf32>
    %311 = arith.divf %309, %310 : vector<8x128xf32>
    %312 = vector.extract_strided_slice %299 {offsets = [0, 256], sizes = [8, 128], strides = [1, 1]} : vector<8x512xf32> to vector<8x128xf32>
    %313 = math.tanh %312 : vector<8x128xf32>
    %314 = vector.extract_strided_slice %299 {offsets = [0, 384], sizes = [8, 128], strides = [1, 1]} : vector<8x512xf32> to vector<8x128xf32>
    %315 = arith.negf %314 : vector<8x128xf32>
    %316 = math.exp %315 : vector<8x128xf32>
    %cst_84 = arith.constant 1.000000e+00 : f32
    %317 = vector.broadcast %cst_84 : f32 to vector<8x128xf32>
    %318 = arith.addf %317, %316 : vector<8x128xf32>
    %319 = arith.divf %317, %318 : vector<8x128xf32>
    %320 = arith.mulf %311, %284 : vector<8x128xf32>
    %321 = arith.mulf %305, %313 : vector<8x128xf32>
    %322 = arith.addf %320, %321 : vector<8x128xf32>
    %323 = math.tanh %322 : vector<8x128xf32>
    %324 = arith.mulf %319, %323 : vector<8x128xf32>
    %c8_i32_85 = arith.constant 8 : i32
    %325 = arith.muli %arg1, %c8_i32_85 : i32
    %326 = arith.addi %325, %c6_i32 : i32
    %327 = vector.broadcast %326 : i32 to vector<8x1xi32>
    %328 = arith.cmpi sgt, %3, %327 : vector<8x1xi32>
    %329 = vector.shape_cast %328 : vector<8x1xi1> to vector<8x1xi1>
    %330 = vector.broadcast %329 : vector<8x1xi1> to vector<8x128xi1>
    %331 = arith.select %330, %324, %283 : vector<8x128xi1>, vector<8x128xf32>
    %332 = arith.select %330, %322, %284 : vector<8x128xi1>, vector<8x128xf32>
    %333 = arith.index_cast %c6_i32 : i32 to index
    %c0_86 = arith.constant 0 : index
    %c0_87 = arith.constant 0 : index
    %334 = vector.load %arg4[%333, %c0_86, %c0_87] : memref<8x8x128xf32, #tpu.memory_space<vmem>>, vector<1x8x128xf32>
    %335 = vector.shape_cast %334 : vector<1x8x128xf32> to vector<8x128xf32>
    %cst_88 = arith.constant 0.000000e+00 : f32
    %336 = vector.broadcast %cst_88 : f32 to vector<8x128xf32>
    %337 = arith.select %330, %324, %336 : vector<8x128xi1>, vector<8x128xf32>
    %338 = arith.addf %335, %337 : vector<8x128xf32>
    %339 = arith.index_cast %c6_i32 : i32 to index
    %c0_89 = arith.constant 0 : index
    %c0_90 = arith.constant 0 : index
    %340 = vector.load %arg6[%339, %c0_89, %c0_90] : memref<8x8x128xf32, #tpu.memory_space<vmem>>, vector<1x8x128xf32>
    %341 = vector.shape_cast %340 : vector<1x8x128xf32> to vector<8x128xf32>
    %342 = vector.shape_cast %338 : vector<8x128xf32> to vector<1x8x128xf32>
    tpu.vector_store %arg6[%339, %c0_89, %c0_90], %342 {strides = array<i32>} : memref<8x8x128xf32, #tpu.memory_space<vmem>>, vector<1x8x128xf32>,
    %c7_i32 = arith.constant 7 : i32
    %343 = arith.index_cast %c7_i32 : i32 to index
    %c0_91 = arith.constant 0 : index
    %c0_92 = arith.constant 0 : index
    %344 = vector.load %arg3[%343, %c0_91, %c0_92] : memref<8x8x512xf32, #tpu.memory_space<vmem>>, vector<1x8x512xf32>
    %345 = vector.shape_cast %344 : vector<1x8x512xf32> to vector<8x512xf32>
    %cst_93 = arith.constant dense<0.000000e+00> : vector<8x512xf32>
    %346 = tpu.matmul %331, %4, %cst_93 {dimension_numbers = #tpu.dot_dimension_numbers<[1], [0], [0], [1], [0, 0, 1, 1], [], []>} : vector<8x128xf32>, vector<128x512xf32>, vector<8x512xf32> -> vector<8x512xf32>
    %347 = arith.addf %345, %346 : vector<8x512xf32>
    %348 = vector.extract_strided_slice %347 {offsets = [0, 0], sizes = [8, 128], strides = [1, 1]} : vector<8x512xf32> to vector<8x128xf32>
    %349 = arith.negf %348 : vector<8x128xf32>
    %350 = math.exp %349 : vector<8x128xf32>
    %cst_94 = arith.constant 1.000000e+00 : f32
    %351 = vector.broadcast %cst_94 : f32 to vector<8x128xf32>
    %352 = arith.addf %351, %350 : vector<8x128xf32>
    %353 = arith.divf %351, %352 : vector<8x128xf32>
    %354 = vector.extract_strided_slice %347 {offsets = [0, 128], sizes = [8, 128], strides = [1, 1]} : vector<8x512xf32> to vector<8x128xf32>
    %355 = arith.negf %354 : vector<8x128xf32>
    %356 = math.exp %355 : vector<8x128xf32>
    %cst_95 = arith.constant 1.000000e+00 : f32
    %357 = vector.broadcast %cst_95 : f32 to vector<8x128xf32>
    %358 = arith.addf %357, %356 : vector<8x128xf32>
    %359 = arith.divf %357, %358 : vector<8x128xf32>
    %360 = vector.extract_strided_slice %347 {offsets = [0, 256], sizes = [8, 128], strides = [1, 1]} : vector<8x512xf32> to vector<8x128xf32>
    %361 = math.tanh %360 : vector<8x128xf32>
    %362 = vector.extract_strided_slice %347 {offsets = [0, 384], sizes = [8, 128], strides = [1, 1]} : vector<8x512xf32> to vector<8x128xf32>
    %363 = arith.negf %362 : vector<8x128xf32>
    %364 = math.exp %363 : vector<8x128xf32>
    %cst_96 = arith.constant 1.000000e+00 : f32
    %365 = vector.broadcast %cst_96 : f32 to vector<8x128xf32>
    %366 = arith.addf %365, %364 : vector<8x128xf32>
    %367 = arith.divf %365, %366 : vector<8x128xf32>
    %368 = arith.mulf %359, %332 : vector<8x128xf32>
    %369 = arith.mulf %353, %361 : vector<8x128xf32>
    %370 = arith.addf %368, %369 : vector<8x128xf32>
    %371 = math.tanh %370 : vector<8x128xf32>
    %372 = arith.mulf %367, %371 : vector<8x128xf32>
    %c8_i32_97 = arith.constant 8 : i32
    %373 = arith.muli %arg1, %c8_i32_97 : i32
    %374 = arith.addi %373, %c7_i32 : i32
    %375 = vector.broadcast %374 : i32 to vector<8x1xi32>
    %376 = arith.cmpi sgt, %3, %375 : vector<8x1xi32>
    %377 = vector.shape_cast %376 : vector<8x1xi1> to vector<8x1xi1>
    %378 = vector.broadcast %377 : vector<8x1xi1> to vector<8x128xi1>
    %379 = arith.select %378, %372, %331 : vector<8x128xi1>, vector<8x128xf32>
    %380 = arith.select %378, %370, %332 : vector<8x128xi1>, vector<8x128xf32>
    %381 = arith.index_cast %c7_i32 : i32 to index
    %c0_98 = arith.constant 0 : index
    %c0_99 = arith.constant 0 : index
    %382 = vector.load %arg4[%381, %c0_98, %c0_99] : memref<8x8x128xf32, #tpu.memory_space<vmem>>, vector<1x8x128xf32>
    %383 = vector.shape_cast %382 : vector<1x8x128xf32> to vector<8x128xf32>
    %cst_100 = arith.constant 0.000000e+00 : f32
    %384 = vector.broadcast %cst_100 : f32 to vector<8x128xf32>
    %385 = arith.select %378, %372, %384 : vector<8x128xi1>, vector<8x128xf32>
    %386 = arith.addf %383, %385 : vector<8x128xf32>
    %387 = arith.index_cast %c7_i32 : i32 to index
    %c0_101 = arith.constant 0 : index
    %c0_102 = arith.constant 0 : index
    %388 = vector.load %arg6[%387, %c0_101, %c0_102] : memref<8x8x128xf32, #tpu.memory_space<vmem>>, vector<1x8x128xf32>
    %389 = vector.shape_cast %388 : vector<1x8x128xf32> to vector<8x128xf32>
    %390 = vector.shape_cast %386 : vector<8x128xf32> to vector<1x8x128xf32>
    tpu.vector_store %arg6[%387, %c0_101, %c0_102], %390 {strides = array<i32>} : memref<8x8x128xf32, #tpu.memory_space<vmem>>, vector<1x8x128xf32>,
    %c8_i32_103 = arith.constant 8 : i32
    %c0_104 = arith.constant 0 : index
    %c0_105 = arith.constant 0 : index
    %391 = vector.load %arg9[%c0_104, %c0_105] : memref<8x128xf32, #tpu.memory_space<vmem>>, vector<8x128xf32>
    tpu.vector_store %arg9[%c0_104, %c0_105], %379 {strides = array<i32>} : memref<8x128xf32, #tpu.memory_space<vmem>>, vector<8x128xf32>,
    %c0_106 = arith.constant 0 : index
    %c0_107 = arith.constant 0 : index
    %392 = vector.load %arg10[%c0_106, %c0_107] : memref<8x128xf32, #tpu.memory_space<vmem>>, vector<8x128xf32>
    tpu.vector_store %arg10[%c0_106, %c0_107], %380 {strides = array<i32>} : memref<8x128xf32, #tpu.memory_space<vmem>>, vector<8x128xf32>,
    %c0_i32_108 = arith.constant 0 : i32
    %393 = arith.cmpi eq, %arg1, %c0_i32_108 : i32
    %394 = arith.extui %393 : i1 to i32
    %c0_i32_109 = arith.constant 0 : i32
    %395 = arith.cmpi ne, %394, %c0_i32_109 : i32
    scf.if %395 {
      %c0_110 = arith.constant 0 : index
      %c0_111 = arith.constant 0 : index
      %c0_112 = arith.constant 0 : index
      %396 = vector.load %arg7[%c0_110, %c0_111, %c0_112] : memref<1x8x128xf32, #tpu.memory_space<vmem>>, vector<1x8x128xf32>
      %397 = vector.shape_cast %396 : vector<1x8x128xf32> to vector<8x128xf32>
      %398 = vector.shape_cast %379 : vector<8x128xf32> to vector<1x8x128xf32>
      tpu.vector_store %arg7[%c0_110, %c0_111, %c0_112], %398 {strides = array<i32>} : memref<1x8x128xf32, #tpu.memory_space<vmem>>, vector<1x8x128xf32>,
      %c0_113 = arith.constant 0 : index
      %c0_114 = arith.constant 0 : index
      %c0_115 = arith.constant 0 : index
      %399 = vector.load %arg8[%c0_113, %c0_114, %c0_115] : memref<1x8x128xf32, #tpu.memory_space<vmem>>, vector<1x8x128xf32>
      %400 = vector.shape_cast %399 : vector<1x8x128xf32> to vector<8x128xf32>
      %401 = vector.shape_cast %380 : vector<8x128xf32> to vector<1x8x128xf32>
      tpu.vector_store %arg8[%c0_113, %c0_114, %c0_115], %401 {strides = array<i32>} : memref<1x8x128xf32, #tpu.memory_space<vmem>>, vector<1x8x128xf32>,
    } else {
    }
    return
  }
  func.func @transform_0(%arg0: i32, %arg1: i32) -> (i32, i32) {
    %c0_i32 = arith.constant 0 : i32
    %c0_i32_0 = arith.constant 0 : i32
    return %arg0, %c0_i32 : i32, i32
  }
  func.func @transform_1(%arg0: i32, %arg1: i32) -> (i32, i32, i32) {
    %c0_i32 = arith.constant 0 : i32
    %c0_i32_0 = arith.constant 0 : i32
    return %arg1, %arg0, %c0_i32 : i32, i32, i32
  }
  func.func @transform_2(%arg0: i32, %arg1: i32) -> (i32, i32, i32) {
    %c0_i32 = arith.constant 0 : i32
    %c0_i32_0 = arith.constant 0 : i32
    return %arg1, %arg0, %c0_i32 : i32, i32, i32
  }
  func.func @transform_3(%arg0: i32, %arg1: i32) -> (i32, i32) {
    %c0_i32 = arith.constant 0 : i32
    %c0_i32_0 = arith.constant 0 : i32
    %c0_i32_1 = arith.constant 0 : i32
    return %c0_i32, %c0_i32_0 : i32, i32
  }
  func.func @transform_4(%arg0: i32, %arg1: i32) -> (i32, i32, i32) {
    %c0_i32 = arith.constant 0 : i32
    %c0_i32_0 = arith.constant 0 : i32
    return %arg1, %arg0, %c0_i32 : i32, i32, i32
  }
  func.func @transform_5(%arg0: i32, %arg1: i32) -> (i32, i32, i32) {
    %c0_i32 = arith.constant 0 : i32
    %c0_i32_0 = arith.constant 0 : i32
    %c0_i32_1 = arith.constant 0 : i32
    return %c0_i32, %arg0, %c0_i32_0 : i32, i32, i32
  }
  func.func @transform_6(%arg0: i32, %arg1: i32) -> (i32, i32, i32) {
    %c0_i32 = arith.constant 0 : i32
    %c0_i32_0 = arith.constant 0 : i32
    %c0_i32_1 = arith.constant 0 : i32
    return %c0_i32, %arg0, %c0_i32_0 : i32, i32, i32
  }
}

module attributes {stable_mosaic.version = 11 : i64} {
  func.func @_matmul_bias_kernel(%arg0: i32, %arg1: i32, %arg2: memref<64x128xf32, #tpu.memory_space<vmem>>, %arg3: memref<128x512xf32, #tpu.memory_space<vmem>>, %arg4: memref<1x512xf32, #tpu.memory_space<vmem>>, %arg5: memref<64x512xf32, #tpu.memory_space<vmem>>) attributes {dimension_semantics = [#tpu.dimension_semantics<parallel>, #tpu.dimension_semantics<parallel>], iteration_bounds = array<i64: 1, 1>, scalar_prefetch = 0 : i64, scratch_operands = 0 : i64, tpu.core_type = #tpu.core_type<tc>, window_params = [{transform_indices = @transform_0, window_bounds = array<i64: 64, 128>}, {transform_indices = @transform_1, window_bounds = array<i64: 128, 512>}, {transform_indices = @transform_2, window_bounds = array<i64: 1, 512>}, {transform_indices = @transform_3, window_bounds = array<i64: 64, 512>}]} {
    %c0 = arith.constant 0 : index
    %c0_0 = arith.constant 0 : index
    %0 = vector.load %arg2[%c0, %c0_0] : memref<64x128xf32, #tpu.memory_space<vmem>>, vector<64x128xf32>
    %c0_1 = arith.constant 0 : index
    %c0_2 = arith.constant 0 : index
    %1 = vector.load %arg3[%c0_1, %c0_2] : memref<128x512xf32, #tpu.memory_space<vmem>>, vector<128x512xf32>
    %cst = arith.constant dense<0.000000e+00> : vector<64x512xf32>
    %2 = tpu.matmul %0, %1, %cst {dimension_numbers = #tpu.dot_dimension_numbers<[1], [0], [0], [1], [0, 0, 1, 1], [], []>} : vector<64x128xf32>, vector<128x512xf32>, vector<64x512xf32> -> vector<64x512xf32>
    %c0_3 = arith.constant 0 : index
    %c0_4 = arith.constant 0 : index
    %3 = vector.load %arg4[%c0_3, %c0_4] : memref<1x512xf32, #tpu.memory_space<vmem>>, vector<1x512xf32>
    %4 = vector.broadcast %3 : vector<1x512xf32> to vector<64x512xf32>
    %5 = arith.addf %2, %4 : vector<64x512xf32>
    %c0_5 = arith.constant 0 : index
    %c0_6 = arith.constant 0 : index
    %6 = vector.load %arg5[%c0_5, %c0_6] : memref<64x512xf32, #tpu.memory_space<vmem>>, vector<64x512xf32>
    tpu.vector_store %arg5[%c0_5, %c0_6], %5 {strides = array<i32>} : memref<64x512xf32, #tpu.memory_space<vmem>>, vector<64x512xf32>,
    return
  }
  func.func @transform_0(%arg0: i32, %arg1: i32) -> (i32, i32) {
    %c0_i32 = arith.constant 0 : i32
    %c0_i32_0 = arith.constant 0 : i32
    return %arg0, %c0_i32 : i32, i32
  }
  func.func @transform_1(%arg0: i32, %arg1: i32) -> (i32, i32) {
    %c0_i32 = arith.constant 0 : i32
    %c0_i32_0 = arith.constant 0 : i32
    return %c0_i32, %arg1 : i32, i32
  }
  func.func @transform_2(%arg0: i32, %arg1: i32) -> (i32, i32) {
    %c0_i32 = arith.constant 0 : i32
    %c0_i32_0 = arith.constant 0 : i32
    return %c0_i32, %arg1 : i32, i32
  }
  func.func @transform_3(%arg0: i32, %arg1: i32) -> (i32, i32) {
    %c0_i32 = arith.constant 0 : i32
    return %arg0, %arg1 : i32, i32
  }
}

module attributes {stable_mosaic.version = 11 : i64} {
  func.func @_matmul_bias_kernel(%arg0: i32, %arg1: i32, %arg2: memref<64x128xf32, #tpu.memory_space<vmem>>, %arg3: memref<128x64xf32, #tpu.memory_space<vmem>>, %arg4: memref<1x64xf32, #tpu.memory_space<vmem>>, %arg5: memref<64x64xf32, #tpu.memory_space<vmem>>) attributes {dimension_semantics = [#tpu.dimension_semantics<parallel>, #tpu.dimension_semantics<parallel>], iteration_bounds = array<i64: 1, 1>, scalar_prefetch = 0 : i64, scratch_operands = 0 : i64, tpu.core_type = #tpu.core_type<tc>, window_params = [{transform_indices = @transform_0, window_bounds = array<i64: 64, 128>}, {transform_indices = @transform_1, window_bounds = array<i64: 128, 64>}, {transform_indices = @transform_2, window_bounds = array<i64: 1, 64>}, {transform_indices = @transform_3, window_bounds = array<i64: 64, 64>}]} {
    %c0 = arith.constant 0 : index
    %c0_0 = arith.constant 0 : index
    %0 = vector.load %arg2[%c0, %c0_0] : memref<64x128xf32, #tpu.memory_space<vmem>>, vector<64x128xf32>
    %c0_1 = arith.constant 0 : index
    %c0_2 = arith.constant 0 : index
    %1 = vector.load %arg3[%c0_1, %c0_2] : memref<128x64xf32, #tpu.memory_space<vmem>>, vector<128x64xf32>
    %cst = arith.constant dense<0.000000e+00> : vector<64x64xf32>
    %2 = tpu.matmul %0, %1, %cst {dimension_numbers = #tpu.dot_dimension_numbers<[1], [0], [0], [1], [0, 0, 1, 1], [], []>} : vector<64x128xf32>, vector<128x64xf32>, vector<64x64xf32> -> vector<64x64xf32>
    %c0_3 = arith.constant 0 : index
    %c0_4 = arith.constant 0 : index
    %3 = vector.load %arg4[%c0_3, %c0_4] : memref<1x64xf32, #tpu.memory_space<vmem>>, vector<1x64xf32>
    %4 = vector.broadcast %3 : vector<1x64xf32> to vector<64x64xf32>
    %5 = arith.addf %2, %4 : vector<64x64xf32>
    %c0_5 = arith.constant 0 : index
    %c0_6 = arith.constant 0 : index
    %6 = vector.load %arg5[%c0_5, %c0_6] : memref<64x64xf32, #tpu.memory_space<vmem>>, vector<64x64xf32>
    tpu.vector_store %arg5[%c0_5, %c0_6], %5 {strides = array<i32>} : memref<64x64xf32, #tpu.memory_space<vmem>>, vector<64x64xf32>,
    return
  }
  func.func @transform_0(%arg0: i32, %arg1: i32) -> (i32, i32) {
    %c0_i32 = arith.constant 0 : i32
    %c0_i32_0 = arith.constant 0 : i32
    return %arg0, %c0_i32 : i32, i32
  }
  func.func @transform_1(%arg0: i32, %arg1: i32) -> (i32, i32) {
    %c0_i32 = arith.constant 0 : i32
    %c0_i32_0 = arith.constant 0 : i32
    return %c0_i32, %arg1 : i32, i32
  }
  func.func @transform_2(%arg0: i32, %arg1: i32) -> (i32, i32) {
    %c0_i32 = arith.constant 0 : i32
    %c0_i32_0 = arith.constant 0 : i32
    return %c0_i32, %arg1 : i32, i32
  }
  func.func @transform_3(%arg0: i32, %arg1: i32) -> (i32, i32) {
    %c0_i32 = arith.constant 0 : i32
    return %arg0, %arg1 : i32, i32
  }
}

module attributes {stable_mosaic.version = 11 : i64} {
  func.func @_lstm_layer_kernel(%arg0: i32, %arg1: i32, %arg2: memref<8x1xi32, #tpu.memory_space<vmem>>, %arg3: memref<8x8x512xf32, #tpu.memory_space<vmem>>, %arg4: memref<8x8x128xf32, #tpu.memory_space<vmem>>, %arg5: memref<128x512xf32, #tpu.memory_space<vmem>>, %arg6: memref<8x8x128xf32, #tpu.memory_space<vmem>>, %arg7: memref<1x8x128xf32, #tpu.memory_space<vmem>>, %arg8: memref<1x8x128xf32, #tpu.memory_space<vmem>>, %arg9: memref<8x128xf32, #tpu.memory_space<vmem>>, %arg10: memref<8x128xf32, #tpu.memory_space<vmem>>) attributes {dimension_semantics = [#tpu.dimension_semantics<parallel>, #tpu.dimension_semantics<arbitrary>], iteration_bounds = array<i64: 1, 1>, scalar_prefetch = 0 : i64, scratch_operands = 2 : i64, tpu.core_type = #tpu.core_type<tc>, window_params = [{transform_indices = @transform_0, window_bounds = array<i64: 8, 1>}, {transform_indices = @transform_1, window_bounds = array<i64: 8, 8, 512>}, {transform_indices = @transform_2, window_bounds = array<i64: 8, 8, 128>}, {pipeline_mode = #tpu.pipeline_mode<synchronous>, transform_indices = @transform_3, window_bounds = array<i64: 128, 512>}, {transform_indices = @transform_4, window_bounds = array<i64: 8, 8, 128>}, {transform_indices = @transform_5, window_bounds = array<i64: 1, 8, 128>}, {transform_indices = @transform_6, window_bounds = array<i64: 1, 8, 128>}]} {
    %c0_i32 = arith.constant 0 : i32
    %0 = arith.cmpi eq, %arg1, %c0_i32 : i32
    %1 = arith.extui %0 : i1 to i32
    %c0_i32_0 = arith.constant 0 : i32
    %2 = arith.cmpi ne, %1, %c0_i32_0 : i32
    scf.if %2 {
      %cst_110 = arith.constant 0.000000e+00 : f32
      %396 = vector.broadcast %cst_110 : f32 to vector<8x128xf32>
      %c0_111 = arith.constant 0 : index
      %c0_112 = arith.constant 0 : index
      %397 = vector.load %arg9[%c0_111, %c0_112] : memref<8x128xf32, #tpu.memory_space<vmem>>, vector<8x128xf32>
      tpu.vector_store %arg9[%c0_111, %c0_112], %396 {strides = array<i32>} : memref<8x128xf32, #tpu.memory_space<vmem>>, vector<8x128xf32>,
      %cst_113 = arith.constant 0.000000e+00 : f32
      %398 = vector.broadcast %cst_113 : f32 to vector<8x128xf32>
      %c0_114 = arith.constant 0 : index
      %c0_115 = arith.constant 0 : index
      %399 = vector.load %arg10[%c0_114, %c0_115] : memref<8x128xf32, #tpu.memory_space<vmem>>, vector<8x128xf32>
      tpu.vector_store %arg10[%c0_114, %c0_115], %398 {strides = array<i32>} : memref<8x128xf32, #tpu.memory_space<vmem>>, vector<8x128xf32>,
    } else {
    }
    %c0 = arith.constant 0 : index
    %c0_1 = arith.constant 0 : index
    %3 = vector.load %arg2[%c0, %c0_1] : memref<8x1xi32, #tpu.memory_space<vmem>>, vector<8x1xi32>
    %c0_2 = arith.constant 0 : index
    %c0_3 = arith.constant 0 : index
    %4 = vector.load %arg5[%c0_2, %c0_3] : memref<128x512xf32, #tpu.memory_space<vmem>>, vector<128x512xf32>
    %c0_4 = arith.constant 0 : index
    %c0_5 = arith.constant 0 : index
    %5 = vector.load %arg9[%c0_4, %c0_5] : memref<8x128xf32, #tpu.memory_space<vmem>>, vector<8x128xf32>
    %c0_6 = arith.constant 0 : index
    %c0_7 = arith.constant 0 : index
    %6 = vector.load %arg10[%c0_6, %c0_7] : memref<8x128xf32, #tpu.memory_space<vmem>>, vector<8x128xf32>
    %c0_i32_8 = arith.constant 0 : i32
    %7 = arith.index_cast %c0_i32_8 : i32 to index
    %c0_9 = arith.constant 0 : index
    %c0_10 = arith.constant 0 : index
    %8 = vector.load %arg3[%7, %c0_9, %c0_10] : memref<8x8x512xf32, #tpu.memory_space<vmem>>, vector<1x8x512xf32>
    %9 = vector.shape_cast %8 : vector<1x8x512xf32> to vector<8x512xf32>
    %cst = arith.constant dense<0.000000e+00> : vector<8x512xf32>
    %10 = tpu.matmul %5, %4, %cst {dimension_numbers = #tpu.dot_dimension_numbers<[1], [0], [0], [1], [0, 0, 1, 1], [], []>} : vector<8x128xf32>, vector<128x512xf32>, vector<8x512xf32> -> vector<8x512xf32>
    %11 = arith.addf %9, %10 : vector<8x512xf32>
    %12 = vector.extract_strided_slice %11 {offsets = [0, 0], sizes = [8, 128], strides = [1, 1]} : vector<8x512xf32> to vector<8x128xf32>
    %13 = arith.negf %12 : vector<8x128xf32>
    %14 = math.exp %13 : vector<8x128xf32>
    %cst_11 = arith.constant 1.000000e+00 : f32
    %15 = vector.broadcast %cst_11 : f32 to vector<8x128xf32>
    %16 = arith.addf %15, %14 : vector<8x128xf32>
    %17 = arith.divf %15, %16 : vector<8x128xf32>
    %18 = vector.extract_strided_slice %11 {offsets = [0, 128], sizes = [8, 128], strides = [1, 1]} : vector<8x512xf32> to vector<8x128xf32>
    %19 = arith.negf %18 : vector<8x128xf32>
    %20 = math.exp %19 : vector<8x128xf32>
    %cst_12 = arith.constant 1.000000e+00 : f32
    %21 = vector.broadcast %cst_12 : f32 to vector<8x128xf32>
    %22 = arith.addf %21, %20 : vector<8x128xf32>
    %23 = arith.divf %21, %22 : vector<8x128xf32>
    %24 = vector.extract_strided_slice %11 {offsets = [0, 256], sizes = [8, 128], strides = [1, 1]} : vector<8x512xf32> to vector<8x128xf32>
    %25 = math.tanh %24 : vector<8x128xf32>
    %26 = vector.extract_strided_slice %11 {offsets = [0, 384], sizes = [8, 128], strides = [1, 1]} : vector<8x512xf32> to vector<8x128xf32>
    %27 = arith.negf %26 : vector<8x128xf32>
    %28 = math.exp %27 : vector<8x128xf32>
    %cst_13 = arith.constant 1.000000e+00 : f32
    %29 = vector.broadcast %cst_13 : f32 to vector<8x128xf32>
    %30 = arith.addf %29, %28 : vector<8x128xf32>
    %31 = arith.divf %29, %30 : vector<8x128xf32>
    %32 = arith.mulf %23, %6 : vector<8x128xf32>
    %33 = arith.mulf %17, %25 : vector<8x128xf32>
    %34 = arith.addf %32, %33 : vector<8x128xf32>
    %35 = math.tanh %34 : vector<8x128xf32>
    %36 = arith.mulf %31, %35 : vector<8x128xf32>
    %c8_i32 = arith.constant 8 : i32
    %37 = arith.muli %arg1, %c8_i32 : i32
    %38 = arith.addi %37, %c0_i32_8 : i32
    %39 = vector.broadcast %38 : i32 to vector<8x1xi32>
    %40 = arith.cmpi sgt, %3, %39 : vector<8x1xi32>
    %41 = vector.shape_cast %40 : vector<8x1xi1> to vector<8x1xi1>
    %42 = vector.broadcast %41 : vector<8x1xi1> to vector<8x128xi1>
    %43 = arith.select %42, %36, %5 : vector<8x128xi1>, vector<8x128xf32>
    %44 = arith.select %42, %34, %6 : vector<8x128xi1>, vector<8x128xf32>
    %45 = arith.index_cast %c0_i32_8 : i32 to index
    %c0_14 = arith.constant 0 : index
    %c0_15 = arith.constant 0 : index
    %46 = vector.load %arg4[%45, %c0_14, %c0_15] : memref<8x8x128xf32, #tpu.memory_space<vmem>>, vector<1x8x128xf32>
    %47 = vector.shape_cast %46 : vector<1x8x128xf32> to vector<8x128xf32>
    %cst_16 = arith.constant 0.000000e+00 : f32
    %48 = vector.broadcast %cst_16 : f32 to vector<8x128xf32>
    %49 = arith.select %42, %36, %48 : vector<8x128xi1>, vector<8x128xf32>
    %50 = arith.addf %47, %49 : vector<8x128xf32>
    %51 = arith.index_cast %c0_i32_8 : i32 to index
    %c0_17 = arith.constant 0 : index
    %c0_18 = arith.constant 0 : index
    %52 = vector.load %arg6[%51, %c0_17, %c0_18] : memref<8x8x128xf32, #tpu.memory_space<vmem>>, vector<1x8x128xf32>
    %53 = vector.shape_cast %52 : vector<1x8x128xf32> to vector<8x128xf32>
    %54 = vector.shape_cast %50 : vector<8x128xf32> to vector<1x8x128xf32>
    tpu.vector_store %arg6[%51, %c0_17, %c0_18], %54 {strides = array<i32>} : memref<8x8x128xf32, #tpu.memory_space<vmem>>, vector<1x8x128xf32>,
    %c1_i32 = arith.constant 1 : i32
    %55 = arith.index_cast %c1_i32 : i32 to index
    %c0_19 = arith.constant 0 : index
    %c0_20 = arith.constant 0 : index
    %56 = vector.load %arg3[%55, %c0_19, %c0_20] : memref<8x8x512xf32, #tpu.memory_space<vmem>>, vector<1x8x512xf32>
    %57 = vector.shape_cast %56 : vector<1x8x512xf32> to vector<8x512xf32>
    %cst_21 = arith.constant dense<0.000000e+00> : vector<8x512xf32>
    %58 = tpu.matmul %43, %4, %cst_21 {dimension_numbers = #tpu.dot_dimension_numbers<[1], [0], [0], [1], [0, 0, 1, 1], [], []>} : vector<8x128xf32>, vector<128x512xf32>, vector<8x512xf32> -> vector<8x512xf32>
    %59 = arith.addf %57, %58 : vector<8x512xf32>
    %60 = vector.extract_strided_slice %59 {offsets = [0, 0], sizes = [8, 128], strides = [1, 1]} : vector<8x512xf32> to vector<8x128xf32>
    %61 = arith.negf %60 : vector<8x128xf32>
    %62 = math.exp %61 : vector<8x128xf32>
    %cst_22 = arith.constant 1.000000e+00 : f32
    %63 = vector.broadcast %cst_22 : f32 to vector<8x128xf32>
    %64 = arith.addf %63, %62 : vector<8x128xf32>
    %65 = arith.divf %63, %64 : vector<8x128xf32>
    %66 = vector.extract_strided_slice %59 {offsets = [0, 128], sizes = [8, 128], strides = [1, 1]} : vector<8x512xf32> to vector<8x128xf32>
    %67 = arith.negf %66 : vector<8x128xf32>
    %68 = math.exp %67 : vector<8x128xf32>
    %cst_23 = arith.constant 1.000000e+00 : f32
    %69 = vector.broadcast %cst_23 : f32 to vector<8x128xf32>
    %70 = arith.addf %69, %68 : vector<8x128xf32>
    %71 = arith.divf %69, %70 : vector<8x128xf32>
    %72 = vector.extract_strided_slice %59 {offsets = [0, 256], sizes = [8, 128], strides = [1, 1]} : vector<8x512xf32> to vector<8x128xf32>
    %73 = math.tanh %72 : vector<8x128xf32>
    %74 = vector.extract_strided_slice %59 {offsets = [0, 384], sizes = [8, 128], strides = [1, 1]} : vector<8x512xf32> to vector<8x128xf32>
    %75 = arith.negf %74 : vector<8x128xf32>
    %76 = math.exp %75 : vector<8x128xf32>
    %cst_24 = arith.constant 1.000000e+00 : f32
    %77 = vector.broadcast %cst_24 : f32 to vector<8x128xf32>
    %78 = arith.addf %77, %76 : vector<8x128xf32>
    %79 = arith.divf %77, %78 : vector<8x128xf32>
    %80 = arith.mulf %71, %44 : vector<8x128xf32>
    %81 = arith.mulf %65, %73 : vector<8x128xf32>
    %82 = arith.addf %80, %81 : vector<8x128xf32>
    %83 = math.tanh %82 : vector<8x128xf32>
    %84 = arith.mulf %79, %83 : vector<8x128xf32>
    %c8_i32_25 = arith.constant 8 : i32
    %85 = arith.muli %arg1, %c8_i32_25 : i32
    %86 = arith.addi %85, %c1_i32 : i32
    %87 = vector.broadcast %86 : i32 to vector<8x1xi32>
    %88 = arith.cmpi sgt, %3, %87 : vector<8x1xi32>
    %89 = vector.shape_cast %88 : vector<8x1xi1> to vector<8x1xi1>
    %90 = vector.broadcast %89 : vector<8x1xi1> to vector<8x128xi1>
    %91 = arith.select %90, %84, %43 : vector<8x128xi1>, vector<8x128xf32>
    %92 = arith.select %90, %82, %44 : vector<8x128xi1>, vector<8x128xf32>
    %93 = arith.index_cast %c1_i32 : i32 to index
    %c0_26 = arith.constant 0 : index
    %c0_27 = arith.constant 0 : index
    %94 = vector.load %arg4[%93, %c0_26, %c0_27] : memref<8x8x128xf32, #tpu.memory_space<vmem>>, vector<1x8x128xf32>
    %95 = vector.shape_cast %94 : vector<1x8x128xf32> to vector<8x128xf32>
    %cst_28 = arith.constant 0.000000e+00 : f32
    %96 = vector.broadcast %cst_28 : f32 to vector<8x128xf32>
    %97 = arith.select %90, %84, %96 : vector<8x128xi1>, vector<8x128xf32>
    %98 = arith.addf %95, %97 : vector<8x128xf32>
    %99 = arith.index_cast %c1_i32 : i32 to index
    %c0_29 = arith.constant 0 : index
    %c0_30 = arith.constant 0 : index
    %100 = vector.load %arg6[%99, %c0_29, %c0_30] : memref<8x8x128xf32, #tpu.memory_space<vmem>>, vector<1x8x128xf32>
    %101 = vector.shape_cast %100 : vector<1x8x128xf32> to vector<8x128xf32>
    %102 = vector.shape_cast %98 : vector<8x128xf32> to vector<1x8x128xf32>
    tpu.vector_store %arg6[%99, %c0_29, %c0_30], %102 {strides = array<i32>} : memref<8x8x128xf32, #tpu.memory_space<vmem>>, vector<1x8x128xf32>,
    %c2_i32 = arith.constant 2 : i32
    %103 = arith.index_cast %c2_i32 : i32 to index
    %c0_31 = arith.constant 0 : index
    %c0_32 = arith.constant 0 : index
    %104 = vector.load %arg3[%103, %c0_31, %c0_32] : memref<8x8x512xf32, #tpu.memory_space<vmem>>, vector<1x8x512xf32>
    %105 = vector.shape_cast %104 : vector<1x8x512xf32> to vector<8x512xf32>
    %cst_33 = arith.constant dense<0.000000e+00> : vector<8x512xf32>
    %106 = tpu.matmul %91, %4, %cst_33 {dimension_numbers = #tpu.dot_dimension_numbers<[1], [0], [0], [1], [0, 0, 1, 1], [], []>} : vector<8x128xf32>, vector<128x512xf32>, vector<8x512xf32> -> vector<8x512xf32>
    %107 = arith.addf %105, %106 : vector<8x512xf32>
    %108 = vector.extract_strided_slice %107 {offsets = [0, 0], sizes = [8, 128], strides = [1, 1]} : vector<8x512xf32> to vector<8x128xf32>
    %109 = arith.negf %108 : vector<8x128xf32>
    %110 = math.exp %109 : vector<8x128xf32>
    %cst_34 = arith.constant 1.000000e+00 : f32
    %111 = vector.broadcast %cst_34 : f32 to vector<8x128xf32>
    %112 = arith.addf %111, %110 : vector<8x128xf32>
    %113 = arith.divf %111, %112 : vector<8x128xf32>
    %114 = vector.extract_strided_slice %107 {offsets = [0, 128], sizes = [8, 128], strides = [1, 1]} : vector<8x512xf32> to vector<8x128xf32>
    %115 = arith.negf %114 : vector<8x128xf32>
    %116 = math.exp %115 : vector<8x128xf32>
    %cst_35 = arith.constant 1.000000e+00 : f32
    %117 = vector.broadcast %cst_35 : f32 to vector<8x128xf32>
    %118 = arith.addf %117, %116 : vector<8x128xf32>
    %119 = arith.divf %117, %118 : vector<8x128xf32>
    %120 = vector.extract_strided_slice %107 {offsets = [0, 256], sizes = [8, 128], strides = [1, 1]} : vector<8x512xf32> to vector<8x128xf32>
    %121 = math.tanh %120 : vector<8x128xf32>
    %122 = vector.extract_strided_slice %107 {offsets = [0, 384], sizes = [8, 128], strides = [1, 1]} : vector<8x512xf32> to vector<8x128xf32>
    %123 = arith.negf %122 : vector<8x128xf32>
    %124 = math.exp %123 : vector<8x128xf32>
    %cst_36 = arith.constant 1.000000e+00 : f32
    %125 = vector.broadcast %cst_36 : f32 to vector<8x128xf32>
    %126 = arith.addf %125, %124 : vector<8x128xf32>
    %127 = arith.divf %125, %126 : vector<8x128xf32>
    %128 = arith.mulf %119, %92 : vector<8x128xf32>
    %129 = arith.mulf %113, %121 : vector<8x128xf32>
    %130 = arith.addf %128, %129 : vector<8x128xf32>
    %131 = math.tanh %130 : vector<8x128xf32>
    %132 = arith.mulf %127, %131 : vector<8x128xf32>
    %c8_i32_37 = arith.constant 8 : i32
    %133 = arith.muli %arg1, %c8_i32_37 : i32
    %134 = arith.addi %133, %c2_i32 : i32
    %135 = vector.broadcast %134 : i32 to vector<8x1xi32>
    %136 = arith.cmpi sgt, %3, %135 : vector<8x1xi32>
    %137 = vector.shape_cast %136 : vector<8x1xi1> to vector<8x1xi1>
    %138 = vector.broadcast %137 : vector<8x1xi1> to vector<8x128xi1>
    %139 = arith.select %138, %132, %91 : vector<8x128xi1>, vector<8x128xf32>
    %140 = arith.select %138, %130, %92 : vector<8x128xi1>, vector<8x128xf32>
    %141 = arith.index_cast %c2_i32 : i32 to index
    %c0_38 = arith.constant 0 : index
    %c0_39 = arith.constant 0 : index
    %142 = vector.load %arg4[%141, %c0_38, %c0_39] : memref<8x8x128xf32, #tpu.memory_space<vmem>>, vector<1x8x128xf32>
    %143 = vector.shape_cast %142 : vector<1x8x128xf32> to vector<8x128xf32>
    %cst_40 = arith.constant 0.000000e+00 : f32
    %144 = vector.broadcast %cst_40 : f32 to vector<8x128xf32>
    %145 = arith.select %138, %132, %144 : vector<8x128xi1>, vector<8x128xf32>
    %146 = arith.addf %143, %145 : vector<8x128xf32>
    %147 = arith.index_cast %c2_i32 : i32 to index
    %c0_41 = arith.constant 0 : index
    %c0_42 = arith.constant 0 : index
    %148 = vector.load %arg6[%147, %c0_41, %c0_42] : memref<8x8x128xf32, #tpu.memory_space<vmem>>, vector<1x8x128xf32>
    %149 = vector.shape_cast %148 : vector<1x8x128xf32> to vector<8x128xf32>
    %150 = vector.shape_cast %146 : vector<8x128xf32> to vector<1x8x128xf32>
    tpu.vector_store %arg6[%147, %c0_41, %c0_42], %150 {strides = array<i32>} : memref<8x8x128xf32, #tpu.memory_space<vmem>>, vector<1x8x128xf32>,
    %c3_i32 = arith.constant 3 : i32
    %151 = arith.index_cast %c3_i32 : i32 to index
    %c0_43 = arith.constant 0 : index
    %c0_44 = arith.constant 0 : index
    %152 = vector.load %arg3[%151, %c0_43, %c0_44] : memref<8x8x512xf32, #tpu.memory_space<vmem>>, vector<1x8x512xf32>
    %153 = vector.shape_cast %152 : vector<1x8x512xf32> to vector<8x512xf32>
    %cst_45 = arith.constant dense<0.000000e+00> : vector<8x512xf32>
    %154 = tpu.matmul %139, %4, %cst_45 {dimension_numbers = #tpu.dot_dimension_numbers<[1], [0], [0], [1], [0, 0, 1, 1], [], []>} : vector<8x128xf32>, vector<128x512xf32>, vector<8x512xf32> -> vector<8x512xf32>
    %155 = arith.addf %153, %154 : vector<8x512xf32>
    %156 = vector.extract_strided_slice %155 {offsets = [0, 0], sizes = [8, 128], strides = [1, 1]} : vector<8x512xf32> to vector<8x128xf32>
    %157 = arith.negf %156 : vector<8x128xf32>
    %158 = math.exp %157 : vector<8x128xf32>
    %cst_46 = arith.constant 1.000000e+00 : f32
    %159 = vector.broadcast %cst_46 : f32 to vector<8x128xf32>
    %160 = arith.addf %159, %158 : vector<8x128xf32>
    %161 = arith.divf %159, %160 : vector<8x128xf32>
    %162 = vector.extract_strided_slice %155 {offsets = [0, 128], sizes = [8, 128], strides = [1, 1]} : vector<8x512xf32> to vector<8x128xf32>
    %163 = arith.negf %162 : vector<8x128xf32>
    %164 = math.exp %163 : vector<8x128xf32>
    %cst_47 = arith.constant 1.000000e+00 : f32
    %165 = vector.broadcast %cst_47 : f32 to vector<8x128xf32>
    %166 = arith.addf %165, %164 : vector<8x128xf32>
    %167 = arith.divf %165, %166 : vector<8x128xf32>
    %168 = vector.extract_strided_slice %155 {offsets = [0, 256], sizes = [8, 128], strides = [1, 1]} : vector<8x512xf32> to vector<8x128xf32>
    %169 = math.tanh %168 : vector<8x128xf32>
    %170 = vector.extract_strided_slice %155 {offsets = [0, 384], sizes = [8, 128], strides = [1, 1]} : vector<8x512xf32> to vector<8x128xf32>
    %171 = arith.negf %170 : vector<8x128xf32>
    %172 = math.exp %171 : vector<8x128xf32>
    %cst_48 = arith.constant 1.000000e+00 : f32
    %173 = vector.broadcast %cst_48 : f32 to vector<8x128xf32>
    %174 = arith.addf %173, %172 : vector<8x128xf32>
    %175 = arith.divf %173, %174 : vector<8x128xf32>
    %176 = arith.mulf %167, %140 : vector<8x128xf32>
    %177 = arith.mulf %161, %169 : vector<8x128xf32>
    %178 = arith.addf %176, %177 : vector<8x128xf32>
    %179 = math.tanh %178 : vector<8x128xf32>
    %180 = arith.mulf %175, %179 : vector<8x128xf32>
    %c8_i32_49 = arith.constant 8 : i32
    %181 = arith.muli %arg1, %c8_i32_49 : i32
    %182 = arith.addi %181, %c3_i32 : i32
    %183 = vector.broadcast %182 : i32 to vector<8x1xi32>
    %184 = arith.cmpi sgt, %3, %183 : vector<8x1xi32>
    %185 = vector.shape_cast %184 : vector<8x1xi1> to vector<8x1xi1>
    %186 = vector.broadcast %185 : vector<8x1xi1> to vector<8x128xi1>
    %187 = arith.select %186, %180, %139 : vector<8x128xi1>, vector<8x128xf32>
    %188 = arith.select %186, %178, %140 : vector<8x128xi1>, vector<8x128xf32>
    %189 = arith.index_cast %c3_i32 : i32 to index
    %c0_50 = arith.constant 0 : index
    %c0_51 = arith.constant 0 : index
    %190 = vector.load %arg4[%189, %c0_50, %c0_51] : memref<8x8x128xf32, #tpu.memory_space<vmem>>, vector<1x8x128xf32>
    %191 = vector.shape_cast %190 : vector<1x8x128xf32> to vector<8x128xf32>
    %cst_52 = arith.constant 0.000000e+00 : f32
    %192 = vector.broadcast %cst_52 : f32 to vector<8x128xf32>
    %193 = arith.select %186, %180, %192 : vector<8x128xi1>, vector<8x128xf32>
    %194 = arith.addf %191, %193 : vector<8x128xf32>
    %195 = arith.index_cast %c3_i32 : i32 to index
    %c0_53 = arith.constant 0 : index
    %c0_54 = arith.constant 0 : index
    %196 = vector.load %arg6[%195, %c0_53, %c0_54] : memref<8x8x128xf32, #tpu.memory_space<vmem>>, vector<1x8x128xf32>
    %197 = vector.shape_cast %196 : vector<1x8x128xf32> to vector<8x128xf32>
    %198 = vector.shape_cast %194 : vector<8x128xf32> to vector<1x8x128xf32>
    tpu.vector_store %arg6[%195, %c0_53, %c0_54], %198 {strides = array<i32>} : memref<8x8x128xf32, #tpu.memory_space<vmem>>, vector<1x8x128xf32>,
    %c4_i32 = arith.constant 4 : i32
    %199 = arith.index_cast %c4_i32 : i32 to index
    %c0_55 = arith.constant 0 : index
    %c0_56 = arith.constant 0 : index
    %200 = vector.load %arg3[%199, %c0_55, %c0_56] : memref<8x8x512xf32, #tpu.memory_space<vmem>>, vector<1x8x512xf32>
    %201 = vector.shape_cast %200 : vector<1x8x512xf32> to vector<8x512xf32>
    %cst_57 = arith.constant dense<0.000000e+00> : vector<8x512xf32>
    %202 = tpu.matmul %187, %4, %cst_57 {dimension_numbers = #tpu.dot_dimension_numbers<[1], [0], [0], [1], [0, 0, 1, 1], [], []>} : vector<8x128xf32>, vector<128x512xf32>, vector<8x512xf32> -> vector<8x512xf32>
    %203 = arith.addf %201, %202 : vector<8x512xf32>
    %204 = vector.extract_strided_slice %203 {offsets = [0, 0], sizes = [8, 128], strides = [1, 1]} : vector<8x512xf32> to vector<8x128xf32>
    %205 = arith.negf %204 : vector<8x128xf32>
    %206 = math.exp %205 : vector<8x128xf32>
    %cst_58 = arith.constant 1.000000e+00 : f32
    %207 = vector.broadcast %cst_58 : f32 to vector<8x128xf32>
    %208 = arith.addf %207, %206 : vector<8x128xf32>
    %209 = arith.divf %207, %208 : vector<8x128xf32>
    %210 = vector.extract_strided_slice %203 {offsets = [0, 128], sizes = [8, 128], strides = [1, 1]} : vector<8x512xf32> to vector<8x128xf32>
    %211 = arith.negf %210 : vector<8x128xf32>
    %212 = math.exp %211 : vector<8x128xf32>
    %cst_59 = arith.constant 1.000000e+00 : f32
    %213 = vector.broadcast %cst_59 : f32 to vector<8x128xf32>
    %214 = arith.addf %213, %212 : vector<8x128xf32>
    %215 = arith.divf %213, %214 : vector<8x128xf32>
    %216 = vector.extract_strided_slice %203 {offsets = [0, 256], sizes = [8, 128], strides = [1, 1]} : vector<8x512xf32> to vector<8x128xf32>
    %217 = math.tanh %216 : vector<8x128xf32>
    %218 = vector.extract_strided_slice %203 {offsets = [0, 384], sizes = [8, 128], strides = [1, 1]} : vector<8x512xf32> to vector<8x128xf32>
    %219 = arith.negf %218 : vector<8x128xf32>
    %220 = math.exp %219 : vector<8x128xf32>
    %cst_60 = arith.constant 1.000000e+00 : f32
    %221 = vector.broadcast %cst_60 : f32 to vector<8x128xf32>
    %222 = arith.addf %221, %220 : vector<8x128xf32>
    %223 = arith.divf %221, %222 : vector<8x128xf32>
    %224 = arith.mulf %215, %188 : vector<8x128xf32>
    %225 = arith.mulf %209, %217 : vector<8x128xf32>
    %226 = arith.addf %224, %225 : vector<8x128xf32>
    %227 = math.tanh %226 : vector<8x128xf32>
    %228 = arith.mulf %223, %227 : vector<8x128xf32>
    %c8_i32_61 = arith.constant 8 : i32
    %229 = arith.muli %arg1, %c8_i32_61 : i32
    %230 = arith.addi %229, %c4_i32 : i32
    %231 = vector.broadcast %230 : i32 to vector<8x1xi32>
    %232 = arith.cmpi sgt, %3, %231 : vector<8x1xi32>
    %233 = vector.shape_cast %232 : vector<8x1xi1> to vector<8x1xi1>
    %234 = vector.broadcast %233 : vector<8x1xi1> to vector<8x128xi1>
    %235 = arith.select %234, %228, %187 : vector<8x128xi1>, vector<8x128xf32>
    %236 = arith.select %234, %226, %188 : vector<8x128xi1>, vector<8x128xf32>
    %237 = arith.index_cast %c4_i32 : i32 to index
    %c0_62 = arith.constant 0 : index
    %c0_63 = arith.constant 0 : index
    %238 = vector.load %arg4[%237, %c0_62, %c0_63] : memref<8x8x128xf32, #tpu.memory_space<vmem>>, vector<1x8x128xf32>
    %239 = vector.shape_cast %238 : vector<1x8x128xf32> to vector<8x128xf32>
    %cst_64 = arith.constant 0.000000e+00 : f32
    %240 = vector.broadcast %cst_64 : f32 to vector<8x128xf32>
    %241 = arith.select %234, %228, %240 : vector<8x128xi1>, vector<8x128xf32>
    %242 = arith.addf %239, %241 : vector<8x128xf32>
    %243 = arith.index_cast %c4_i32 : i32 to index
    %c0_65 = arith.constant 0 : index
    %c0_66 = arith.constant 0 : index
    %244 = vector.load %arg6[%243, %c0_65, %c0_66] : memref<8x8x128xf32, #tpu.memory_space<vmem>>, vector<1x8x128xf32>
    %245 = vector.shape_cast %244 : vector<1x8x128xf32> to vector<8x128xf32>
    %246 = vector.shape_cast %242 : vector<8x128xf32> to vector<1x8x128xf32>
    tpu.vector_store %arg6[%243, %c0_65, %c0_66], %246 {strides = array<i32>} : memref<8x8x128xf32, #tpu.memory_space<vmem>>, vector<1x8x128xf32>,
    %c5_i32 = arith.constant 5 : i32
    %247 = arith.index_cast %c5_i32 : i32 to index
    %c0_67 = arith.constant 0 : index
    %c0_68 = arith.constant 0 : index
    %248 = vector.load %arg3[%247, %c0_67, %c0_68] : memref<8x8x512xf32, #tpu.memory_space<vmem>>, vector<1x8x512xf32>
    %249 = vector.shape_cast %248 : vector<1x8x512xf32> to vector<8x512xf32>
    %cst_69 = arith.constant dense<0.000000e+00> : vector<8x512xf32>
    %250 = tpu.matmul %235, %4, %cst_69 {dimension_numbers = #tpu.dot_dimension_numbers<[1], [0], [0], [1], [0, 0, 1, 1], [], []>} : vector<8x128xf32>, vector<128x512xf32>, vector<8x512xf32> -> vector<8x512xf32>
    %251 = arith.addf %249, %250 : vector<8x512xf32>
    %252 = vector.extract_strided_slice %251 {offsets = [0, 0], sizes = [8, 128], strides = [1, 1]} : vector<8x512xf32> to vector<8x128xf32>
    %253 = arith.negf %252 : vector<8x128xf32>
    %254 = math.exp %253 : vector<8x128xf32>
    %cst_70 = arith.constant 1.000000e+00 : f32
    %255 = vector.broadcast %cst_70 : f32 to vector<8x128xf32>
    %256 = arith.addf %255, %254 : vector<8x128xf32>
    %257 = arith.divf %255, %256 : vector<8x128xf32>
    %258 = vector.extract_strided_slice %251 {offsets = [0, 128], sizes = [8, 128], strides = [1, 1]} : vector<8x512xf32> to vector<8x128xf32>
    %259 = arith.negf %258 : vector<8x128xf32>
    %260 = math.exp %259 : vector<8x128xf32>
    %cst_71 = arith.constant 1.000000e+00 : f32
    %261 = vector.broadcast %cst_71 : f32 to vector<8x128xf32>
    %262 = arith.addf %261, %260 : vector<8x128xf32>
    %263 = arith.divf %261, %262 : vector<8x128xf32>
    %264 = vector.extract_strided_slice %251 {offsets = [0, 256], sizes = [8, 128], strides = [1, 1]} : vector<8x512xf32> to vector<8x128xf32>
    %265 = math.tanh %264 : vector<8x128xf32>
    %266 = vector.extract_strided_slice %251 {offsets = [0, 384], sizes = [8, 128], strides = [1, 1]} : vector<8x512xf32> to vector<8x128xf32>
    %267 = arith.negf %266 : vector<8x128xf32>
    %268 = math.exp %267 : vector<8x128xf32>
    %cst_72 = arith.constant 1.000000e+00 : f32
    %269 = vector.broadcast %cst_72 : f32 to vector<8x128xf32>
    %270 = arith.addf %269, %268 : vector<8x128xf32>
    %271 = arith.divf %269, %270 : vector<8x128xf32>
    %272 = arith.mulf %263, %236 : vector<8x128xf32>
    %273 = arith.mulf %257, %265 : vector<8x128xf32>
    %274 = arith.addf %272, %273 : vector<8x128xf32>
    %275 = math.tanh %274 : vector<8x128xf32>
    %276 = arith.mulf %271, %275 : vector<8x128xf32>
    %c8_i32_73 = arith.constant 8 : i32
    %277 = arith.muli %arg1, %c8_i32_73 : i32
    %278 = arith.addi %277, %c5_i32 : i32
    %279 = vector.broadcast %278 : i32 to vector<8x1xi32>
    %280 = arith.cmpi sgt, %3, %279 : vector<8x1xi32>
    %281 = vector.shape_cast %280 : vector<8x1xi1> to vector<8x1xi1>
    %282 = vector.broadcast %281 : vector<8x1xi1> to vector<8x128xi1>
    %283 = arith.select %282, %276, %235 : vector<8x128xi1>, vector<8x128xf32>
    %284 = arith.select %282, %274, %236 : vector<8x128xi1>, vector<8x128xf32>
    %285 = arith.index_cast %c5_i32 : i32 to index
    %c0_74 = arith.constant 0 : index
    %c0_75 = arith.constant 0 : index
    %286 = vector.load %arg4[%285, %c0_74, %c0_75] : memref<8x8x128xf32, #tpu.memory_space<vmem>>, vector<1x8x128xf32>
    %287 = vector.shape_cast %286 : vector<1x8x128xf32> to vector<8x128xf32>
    %cst_76 = arith.constant 0.000000e+00 : f32
    %288 = vector.broadcast %cst_76 : f32 to vector<8x128xf32>
    %289 = arith.select %282, %276, %288 : vector<8x128xi1>, vector<8x128xf32>
    %290 = arith.addf %287, %289 : vector<8x128xf32>
    %291 = arith.index_cast %c5_i32 : i32 to index
    %c0_77 = arith.constant 0 : index
    %c0_78 = arith.constant 0 : index
    %292 = vector.load %arg6[%291, %c0_77, %c0_78] : memref<8x8x128xf32, #tpu.memory_space<vmem>>, vector<1x8x128xf32>
    %293 = vector.shape_cast %292 : vector<1x8x128xf32> to vector<8x128xf32>
    %294 = vector.shape_cast %290 : vector<8x128xf32> to vector<1x8x128xf32>
    tpu.vector_store %arg6[%291, %c0_77, %c0_78], %294 {strides = array<i32>} : memref<8x8x128xf32, #tpu.memory_space<vmem>>, vector<1x8x128xf32>,
    %c6_i32 = arith.constant 6 : i32
    %295 = arith.index_cast %c6_i32 : i32 to index
    %c0_79 = arith.constant 0 : index
    %c0_80 = arith.constant 0 : index
    %296 = vector.load %arg3[%295, %c0_79, %c0_80] : memref<8x8x512xf32, #tpu.memory_space<vmem>>, vector<1x8x512xf32>
    %297 = vector.shape_cast %296 : vector<1x8x512xf32> to vector<8x512xf32>
    %cst_81 = arith.constant dense<0.000000e+00> : vector<8x512xf32>
    %298 = tpu.matmul %283, %4, %cst_81 {dimension_numbers = #tpu.dot_dimension_numbers<[1], [0], [0], [1], [0, 0, 1, 1], [], []>} : vector<8x128xf32>, vector<128x512xf32>, vector<8x512xf32> -> vector<8x512xf32>
    %299 = arith.addf %297, %298 : vector<8x512xf32>
    %300 = vector.extract_strided_slice %299 {offsets = [0, 0], sizes = [8, 128], strides = [1, 1]} : vector<8x512xf32> to vector<8x128xf32>
    %301 = arith.negf %300 : vector<8x128xf32>
    %302 = math.exp %301 : vector<8x128xf32>
    %cst_82 = arith.constant 1.000000e+00 : f32
    %303 = vector.broadcast %cst_82 : f32 to vector<8x128xf32>
    %304 = arith.addf %303, %302 : vector<8x128xf32>
    %305 = arith.divf %303, %304 : vector<8x128xf32>
    %306 = vector.extract_strided_slice %299 {offsets = [0, 128], sizes = [8, 128], strides = [1, 1]} : vector<8x512xf32> to vector<8x128xf32>
    %307 = arith.negf %306 : vector<8x128xf32>
    %308 = math.exp %307 : vector<8x128xf32>
    %cst_83 = arith.constant 1.000000e+00 : f32
    %309 = vector.broadcast %cst_83 : f32 to vector<8x128xf32>
    %310 = arith.addf %309, %308 : vector<8x128xf32>
    %311 = arith.divf %309, %310 : vector<8x128xf32>
    %312 = vector.extract_strided_slice %299 {offsets = [0, 256], sizes = [8, 128], strides = [1, 1]} : vector<8x512xf32> to vector<8x128xf32>
    %313 = math.tanh %312 : vector<8x128xf32>
    %314 = vector.extract_strided_slice %299 {offsets = [0, 384], sizes = [8, 128], strides = [1, 1]} : vector<8x512xf32> to vector<8x128xf32>
    %315 = arith.negf %314 : vector<8x128xf32>
    %316 = math.exp %315 : vector<8x128xf32>
    %cst_84 = arith.constant 1.000000e+00 : f32
    %317 = vector.broadcast %cst_84 : f32 to vector<8x128xf32>
    %318 = arith.addf %317, %316 : vector<8x128xf32>
    %319 = arith.divf %317, %318 : vector<8x128xf32>
    %320 = arith.mulf %311, %284 : vector<8x128xf32>
    %321 = arith.mulf %305, %313 : vector<8x128xf32>
    %322 = arith.addf %320, %321 : vector<8x128xf32>
    %323 = math.tanh %322 : vector<8x128xf32>
    %324 = arith.mulf %319, %323 : vector<8x128xf32>
    %c8_i32_85 = arith.constant 8 : i32
    %325 = arith.muli %arg1, %c8_i32_85 : i32
    %326 = arith.addi %325, %c6_i32 : i32
    %327 = vector.broadcast %326 : i32 to vector<8x1xi32>
    %328 = arith.cmpi sgt, %3, %327 : vector<8x1xi32>
    %329 = vector.shape_cast %328 : vector<8x1xi1> to vector<8x1xi1>
    %330 = vector.broadcast %329 : vector<8x1xi1> to vector<8x128xi1>
    %331 = arith.select %330, %324, %283 : vector<8x128xi1>, vector<8x128xf32>
    %332 = arith.select %330, %322, %284 : vector<8x128xi1>, vector<8x128xf32>
    %333 = arith.index_cast %c6_i32 : i32 to index
    %c0_86 = arith.constant 0 : index
    %c0_87 = arith.constant 0 : index
    %334 = vector.load %arg4[%333, %c0_86, %c0_87] : memref<8x8x128xf32, #tpu.memory_space<vmem>>, vector<1x8x128xf32>
    %335 = vector.shape_cast %334 : vector<1x8x128xf32> to vector<8x128xf32>
    %cst_88 = arith.constant 0.000000e+00 : f32
    %336 = vector.broadcast %cst_88 : f32 to vector<8x128xf32>
    %337 = arith.select %330, %324, %336 : vector<8x128xi1>, vector<8x128xf32>
    %338 = arith.addf %335, %337 : vector<8x128xf32>
    %339 = arith.index_cast %c6_i32 : i32 to index
    %c0_89 = arith.constant 0 : index
    %c0_90 = arith.constant 0 : index
    %340 = vector.load %arg6[%339, %c0_89, %c0_90] : memref<8x8x128xf32, #tpu.memory_space<vmem>>, vector<1x8x128xf32>
    %341 = vector.shape_cast %340 : vector<1x8x128xf32> to vector<8x128xf32>
    %342 = vector.shape_cast %338 : vector<8x128xf32> to vector<1x8x128xf32>
    tpu.vector_store %arg6[%339, %c0_89, %c0_90], %342 {strides = array<i32>} : memref<8x8x128xf32, #tpu.memory_space<vmem>>, vector<1x8x128xf32>,
    %c7_i32 = arith.constant 7 : i32
    %343 = arith.index_cast %c7_i32 : i32 to index
    %c0_91 = arith.constant 0 : index
    %c0_92 = arith.constant 0 : index
    %344 = vector.load %arg3[%343, %c0_91, %c0_92] : memref<8x8x512xf32, #tpu.memory_space<vmem>>, vector<1x8x512xf32>
    %345 = vector.shape_cast %344 : vector<1x8x512xf32> to vector<8x512xf32>
    %cst_93 = arith.constant dense<0.000000e+00> : vector<8x512xf32>
    %346 = tpu.matmul %331, %4, %cst_93 {dimension_numbers = #tpu.dot_dimension_numbers<[1], [0], [0], [1], [0, 0, 1, 1], [], []>} : vector<8x128xf32>, vector<128x512xf32>, vector<8x512xf32> -> vector<8x512xf32>
    %347 = arith.addf %345, %346 : vector<8x512xf32>
    %348 = vector.extract_strided_slice %347 {offsets = [0, 0], sizes = [8, 128], strides = [1, 1]} : vector<8x512xf32> to vector<8x128xf32>
    %349 = arith.negf %348 : vector<8x128xf32>
    %350 = math.exp %349 : vector<8x128xf32>
    %cst_94 = arith.constant 1.000000e+00 : f32
    %351 = vector.broadcast %cst_94 : f32 to vector<8x128xf32>
    %352 = arith.addf %351, %350 : vector<8x128xf32>
    %353 = arith.divf %351, %352 : vector<8x128xf32>
    %354 = vector.extract_strided_slice %347 {offsets = [0, 128], sizes = [8, 128], strides = [1, 1]} : vector<8x512xf32> to vector<8x128xf32>
    %355 = arith.negf %354 : vector<8x128xf32>
    %356 = math.exp %355 : vector<8x128xf32>
    %cst_95 = arith.constant 1.000000e+00 : f32
    %357 = vector.broadcast %cst_95 : f32 to vector<8x128xf32>
    %358 = arith.addf %357, %356 : vector<8x128xf32>
    %359 = arith.divf %357, %358 : vector<8x128xf32>
    %360 = vector.extract_strided_slice %347 {offsets = [0, 256], sizes = [8, 128], strides = [1, 1]} : vector<8x512xf32> to vector<8x128xf32>
    %361 = math.tanh %360 : vector<8x128xf32>
    %362 = vector.extract_strided_slice %347 {offsets = [0, 384], sizes = [8, 128], strides = [1, 1]} : vector<8x512xf32> to vector<8x128xf32>
    %363 = arith.negf %362 : vector<8x128xf32>
    %364 = math.exp %363 : vector<8x128xf32>
    %cst_96 = arith.constant 1.000000e+00 : f32
    %365 = vector.broadcast %cst_96 : f32 to vector<8x128xf32>
    %366 = arith.addf %365, %364 : vector<8x128xf32>
    %367 = arith.divf %365, %366 : vector<8x128xf32>
    %368 = arith.mulf %359, %332 : vector<8x128xf32>
    %369 = arith.mulf %353, %361 : vector<8x128xf32>
    %370 = arith.addf %368, %369 : vector<8x128xf32>
    %371 = math.tanh %370 : vector<8x128xf32>
    %372 = arith.mulf %367, %371 : vector<8x128xf32>
    %c8_i32_97 = arith.constant 8 : i32
    %373 = arith.muli %arg1, %c8_i32_97 : i32
    %374 = arith.addi %373, %c7_i32 : i32
    %375 = vector.broadcast %374 : i32 to vector<8x1xi32>
    %376 = arith.cmpi sgt, %3, %375 : vector<8x1xi32>
    %377 = vector.shape_cast %376 : vector<8x1xi1> to vector<8x1xi1>
    %378 = vector.broadcast %377 : vector<8x1xi1> to vector<8x128xi1>
    %379 = arith.select %378, %372, %331 : vector<8x128xi1>, vector<8x128xf32>
    %380 = arith.select %378, %370, %332 : vector<8x128xi1>, vector<8x128xf32>
    %381 = arith.index_cast %c7_i32 : i32 to index
    %c0_98 = arith.constant 0 : index
    %c0_99 = arith.constant 0 : index
    %382 = vector.load %arg4[%381, %c0_98, %c0_99] : memref<8x8x128xf32, #tpu.memory_space<vmem>>, vector<1x8x128xf32>
    %383 = vector.shape_cast %382 : vector<1x8x128xf32> to vector<8x128xf32>
    %cst_100 = arith.constant 0.000000e+00 : f32
    %384 = vector.broadcast %cst_100 : f32 to vector<8x128xf32>
    %385 = arith.select %378, %372, %384 : vector<8x128xi1>, vector<8x128xf32>
    %386 = arith.addf %383, %385 : vector<8x128xf32>
    %387 = arith.index_cast %c7_i32 : i32 to index
    %c0_101 = arith.constant 0 : index
    %c0_102 = arith.constant 0 : index
    %388 = vector.load %arg6[%387, %c0_101, %c0_102] : memref<8x8x128xf32, #tpu.memory_space<vmem>>, vector<1x8x128xf32>
    %389 = vector.shape_cast %388 : vector<1x8x128xf32> to vector<8x128xf32>
    %390 = vector.shape_cast %386 : vector<8x128xf32> to vector<1x8x128xf32>
    tpu.vector_store %arg6[%387, %c0_101, %c0_102], %390 {strides = array<i32>} : memref<8x8x128xf32, #tpu.memory_space<vmem>>, vector<1x8x128xf32>,
    %c8_i32_103 = arith.constant 8 : i32
    %c0_104 = arith.constant 0 : index
    %c0_105 = arith.constant 0 : index
    %391 = vector.load %arg9[%c0_104, %c0_105] : memref<8x128xf32, #tpu.memory_space<vmem>>, vector<8x128xf32>
    tpu.vector_store %arg9[%c0_104, %c0_105], %379 {strides = array<i32>} : memref<8x128xf32, #tpu.memory_space<vmem>>, vector<8x128xf32>,
    %c0_106 = arith.constant 0 : index
    %c0_107 = arith.constant 0 : index
    %392 = vector.load %arg10[%c0_106, %c0_107] : memref<8x128xf32, #tpu.memory_space<vmem>>, vector<8x128xf32>
    tpu.vector_store %arg10[%c0_106, %c0_107], %380 {strides = array<i32>} : memref<8x128xf32, #tpu.memory_space<vmem>>, vector<8x128xf32>,
    %c0_i32_108 = arith.constant 0 : i32
    %393 = arith.cmpi eq, %arg1, %c0_i32_108 : i32
    %394 = arith.extui %393 : i1 to i32
    %c0_i32_109 = arith.constant 0 : i32
    %395 = arith.cmpi ne, %394, %c0_i32_109 : i32
    scf.if %395 {
      %c0_110 = arith.constant 0 : index
      %c0_111 = arith.constant 0 : index
      %c0_112 = arith.constant 0 : index
      %396 = vector.load %arg7[%c0_110, %c0_111, %c0_112] : memref<1x8x128xf32, #tpu.memory_space<vmem>>, vector<1x8x128xf32>
      %397 = vector.shape_cast %396 : vector<1x8x128xf32> to vector<8x128xf32>
      %398 = vector.shape_cast %379 : vector<8x128xf32> to vector<1x8x128xf32>
      tpu.vector_store %arg7[%c0_110, %c0_111, %c0_112], %398 {strides = array<i32>} : memref<1x8x128xf32, #tpu.memory_space<vmem>>, vector<1x8x128xf32>,
      %c0_113 = arith.constant 0 : index
      %c0_114 = arith.constant 0 : index
      %c0_115 = arith.constant 0 : index
      %399 = vector.load %arg8[%c0_113, %c0_114, %c0_115] : memref<1x8x128xf32, #tpu.memory_space<vmem>>, vector<1x8x128xf32>
      %400 = vector.shape_cast %399 : vector<1x8x128xf32> to vector<8x128xf32>
      %401 = vector.shape_cast %380 : vector<8x128xf32> to vector<1x8x128xf32>
      tpu.vector_store %arg8[%c0_113, %c0_114, %c0_115], %401 {strides = array<i32>} : memref<1x8x128xf32, #tpu.memory_space<vmem>>, vector<1x8x128xf32>,
    } else {
    }
    return
  }
  func.func @transform_0(%arg0: i32, %arg1: i32) -> (i32, i32) {
    %c0_i32 = arith.constant 0 : i32
    %c0_i32_0 = arith.constant 0 : i32
    return %arg0, %c0_i32 : i32, i32
  }
  func.func @transform_1(%arg0: i32, %arg1: i32) -> (i32, i32, i32) {
    %c0_i32 = arith.constant 0 : i32
    %c0_i32_0 = arith.constant 0 : i32
    return %arg1, %arg0, %c0_i32 : i32, i32, i32
  }
  func.func @transform_2(%arg0: i32, %arg1: i32) -> (i32, i32, i32) {
    %c0_i32 = arith.constant 0 : i32
    %c0_i32_0 = arith.constant 0 : i32
    return %arg1, %arg0, %c0_i32 : i32, i32, i32
  }
  func.func @transform_3(%arg0: i32, %arg1: i32) -> (i32, i32) {
    %c0_i32 = arith.constant 0 : i32
    %c0_i32_0 = arith.constant 0 : i32
    %c0_i32_1 = arith.constant 0 : i32
    return %c0_i32, %c0_i32_0 : i32, i32
  }
  func.func @transform_4(%arg0: i32, %arg1: i32) -> (i32, i32, i32) {
    %c0_i32 = arith.constant 0 : i32
    %c0_i32_0 = arith.constant 0 : i32
    return %arg1, %arg0, %c0_i32 : i32, i32, i32
  }
  func.func @transform_5(%arg0: i32, %arg1: i32) -> (i32, i32, i32) {
    %c0_i32 = arith.constant 0 : i32
    %c0_i32_0 = arith.constant 0 : i32
    %c0_i32_1 = arith.constant 0 : i32
    return %c0_i32, %arg0, %c0_i32_0 : i32, i32, i32
  }
  func.func @transform_6(%arg0: i32, %arg1: i32) -> (i32, i32, i32) {
    %c0_i32 = arith.constant 0 : i32
    %c0_i32_0 = arith.constant 0 : i32
    %c0_i32_1 = arith.constant 0 : i32
    return %c0_i32, %arg0, %c0_i32_0 : i32, i32, i32
  }
}

</mosaic_0001>

<bundles_post_ra>
// kernel: rnn_model_forward.9
= control target key start
LH: loop header
LB: loop body
LE: loop exit
PB: predicated region body
PF: predicated region fallthrough
CT: control target
= control target key end

     0   :  { %v371_v3 = vmov 0.0   ;;  %s763_s1 = inlined_call_operand.vmem [shape: f32[128,512], index: 1, kind: input, shape index: {}]   ;;  %s764_s0 = inlined_call_operand.vmem [shape: f32[64,128], index: 0, kind: input, shape index: {}]   ;;  %s765_s2 = inlined_call_operand.vmem [shape: f32[1,512], index: 2, kind: input, shape index: {}]   ;;  %s766_s3 = inlined_call_operand.vmem [shape: f32[64,512], index: 3, kind: output, shape index: {}]  }
   0x1   :  { %v83_v0 = vld [vmem:[%s763_s1 + $0x1e8] sm:$0xff]  ;;  %v85_v1 = vld [vmem:[%s763_s1 + $0x1f8] sm:$0xff]  ;;  %v82_v2 = vld [vmem:[%s763_s1 + $0x1e0] sm:$0xff]  ;;  %172 = vmatprep.mubr.f32.mxu0 %v371_v3  ;;  %285 = vmatprep.mubr.f32.mxu1 %v371_v3 }
   0x2   :  { %108 = vmatprep.subr.mxu0 %v83_v0  ;;  %221 = vmatprep.subr.mxu1 %v85_v1  ;;  %v84_v4 = vld [vmem:[%s763_s1 + $0x1f0] sm:$0xff]  ;;  %v79_v5 = vld [vmem:[%s763_s1 + $0x1c8] sm:$0xff]  ;;  %v81_v6 = vld [vmem:[%s763_s1 + $0x1d8] sm:$0xff] }
   0x3   :  { %109 = vmatpush1.msra.mxu0 %v82_v2  ;;  %222 = vmatpush1.msra.mxu1 %v84_v4  ;;  %v78_v7 = vld [vmem:[%s763_s1 + $0x1c0] sm:$0xff]  ;;  %v80_v8 = vld [vmem:[%s763_s1 + $0x1d0] sm:$0xff]  ;;  %v75_v9 = vld [vmem:[%s763_s1 + $0x1a8] sm:$0xff] }
   0x4   :  { %110 = vmatprep.subr.mxu0 %v79_v5  ;;  %223 = vmatprep.subr.mxu1 %v81_v6  ;;  %v77_v10 = vld [vmem:[%s763_s1 + $0x1b8] sm:$0xff]  ;;  %v74_v11 = vld [vmem:[%s763_s1 + $0x1a0] sm:$0xff]  ;;  %v76_v12 = vld [vmem:[%s763_s1 + $0x1b0] sm:$0xff] }
   0x5   :  { %111 = vmatpush1.msra.mxu0 %v78_v7  ;;  %224 = vmatpush1.msra.mxu1 %v80_v8  ;;  %v71_v13 = vld [vmem:[%s763_s1 + $0x188] sm:$0xff]  ;;  %v73_v14 = vld [vmem:[%s763_s1 + $0x198] sm:$0xff]  ;;  %v70_v15 = vld [vmem:[%s763_s1 + $0x180] sm:$0xff] }
   0x6   :  { %112 = vmatprep.subr.mxu0 %v75_v9  ;;  %225 = vmatprep.subr.mxu1 %v77_v10  ;;  %v72_v16 = vld [vmem:[%s763_s1 + $0x190] sm:$0xff]  ;;  %v67_v17 = vld [vmem:[%s763_s1 + $0x168] sm:$0xff]  ;;  %v69_v18 = vld [vmem:[%s763_s1 + $0x178] sm:$0xff]  ;;  %v88_v10 = vlaneseq }
   0x7   :  { %113 = vmatpush1.msra.mxu0 %v74_v11  ;;  %226 = vmatpush1.msra.mxu1 %v76_v12  ;;  %v66_v19 = vld [vmem:[%s763_s1 + $0x160] sm:$0xff]  ;;  %v68_v20 = vld [vmem:[%s763_s1 + $0x170] sm:$0xff]  ;;  %v63_v21 = vld [vmem:[%s763_s1 + $0x148] sm:$0xff] }
   0x8   :  { %114 = vmatprep.subr.mxu0 %v71_v13  ;;  %227 = vmatprep.subr.mxu1 %v73_v14  ;;  %v65_v22 = vld [vmem:[%s763_s1 + $0x158] sm:$0xff]  ;;  %v62_v23 = vld [vmem:[%s763_s1 + $0x140] sm:$0xff]  ;;  %v64_v24 = vld [vmem:[%s763_s1 + $0x150] sm:$0xff]  ;;  %v89_v11 = vshrl.u32 %v88_v10, 7 }
   0x9   :  { %115 = vmatpush1.msra.mxu0 %v70_v15  ;;  %228 = vmatpush1.msra.mxu1 %v72_v16  ;;  %v59_v25 = vld [vmem:[%s763_s1 + $0x128] sm:$0xff]  ;;  %v61_v26 = vld [vmem:[%s763_s1 + $0x138] sm:$0xff]  ;;  %v58_v27 = vld [vmem:[%s763_s1 + $0x120] sm:$0xff] }
   0xa   :  { %116 = vmatprep.subr.mxu0 %v67_v17  ;;  %229 = vmatprep.subr.mxu1 %v69_v18  ;;  %v60_v28 = vld [vmem:[%s763_s1 + $0x130] sm:$0xff]  ;;  %v55_v29 = vld [vmem:[%s763_s1 + $0x108] sm:$0xff]  ;;  %v57_v30 = vld [vmem:[%s763_s1 + $0x118] sm:$0xff]  ;;  %v90_v12 = vsub.s32 0, %v89_v11  ;;  %v98_v13 = vsub.s32 2, %v89_v11  ;;  %v94_v15 = vsub.s32 1, %v89_v11 }
   0xb   :  { %117 = vmatpush1.msra.mxu0 %v66_v19  ;;  %230 = vmatpush1.msra.mxu1 %v68_v20  ;;  %v54_v31 = vld [vmem:[%s763_s1 + $0x100] sm:$0xff]  ;;  %v56_v32 = vld [vmem:[%s763_s1 + $0x110] sm:$0xff]  ;;  %v51_v33 = vld [vmem:[%s763_s1 + $0xe8] sm:$0xff]  ;;  %v102_v16 = vsub.s32 3, %v89_v11 }
   0xc   :  { %118 = vmatprep.subr.mxu0 %v63_v21  ;;  %231 = vmatprep.subr.mxu1 %v65_v22  ;;  %v53_v34 = vld [vmem:[%s763_s1 + $0xf8] sm:$0xff]  ;;  %v50_v35 = vld [vmem:[%s763_s1 + $0xe0] sm:$0xff]  ;;  %v52_v36 = vld [vmem:[%s763_s1 + $0xf0] sm:$0xff] }
   0xd   :  { %119 = vmatpush1.msra.mxu0 %v62_v23  ;;  %232 = vmatpush1.msra.mxu1 %v64_v24  ;;  %v47_v37 = vld [vmem:[%s763_s1 + $0xc8] sm:$0xff]  ;;  %v49_v38 = vld [vmem:[%s763_s1 + $0xd8] sm:$0xff]  ;;  %v46_v39 = vld [vmem:[%s763_s1 + $0xc0] sm:$0xff] }
   0xe   :  { %120 = vmatprep.subr.mxu0 %v59_v25  ;;  %233 = vmatprep.subr.mxu1 %v61_v26  ;;  %v48_v40 = vld [vmem:[%s763_s1 + $0xd0] sm:$0xff]  ;;  %v43_v41 = vld [vmem:[%s763_s1 + $0xa8] sm:$0xff]  ;;  %v45_v42 = vld [vmem:[%s763_s1 + $0xb8] sm:$0xff] }
   0xf   :  { %121 = vmatpush1.msra.mxu0 %v58_v27  ;;  %234 = vmatpush1.msra.mxu1 %v60_v28  ;;  %v42_v43 = vld [vmem:[%s763_s1 + $0xa0] sm:$0xff]  ;;  %v44_v44 = vld [vmem:[%s763_s1 + $0xb0] sm:$0xff]  ;;  %v39_v45 = vld [vmem:[%s763_s1 + $0x88] sm:$0xff] }
  0x10   :  { %122 = vmatprep.subr.mxu0 %v55_v29  ;;  %235 = vmatprep.subr.mxu1 %v57_v30  ;;  %v41_v46 = vld [vmem:[%s763_s1 + $0x98] sm:$0xff]  ;;  %v38_v47 = vld [vmem:[%s763_s1 + $0x80] sm:$0xff]  ;;  %v40_v48 = vld [vmem:[%s763_s1 + $0x90] sm:$0xff] }
  0x11   :  { %123 = vmatpush1.msra.mxu0 %v54_v31  ;;  %236 = vmatpush1.msra.mxu1 %v56_v32  ;;  %v35_v49 = vld [vmem:[%s763_s1 + $0x68] sm:$0xff]  ;;  %v37_v50 = vld [vmem:[%s763_s1 + $0x78] sm:$0xff]  ;;  %v34_v51 = vld [vmem:[%s763_s1 + $0x60] sm:$0xff] }
  0x12   :  { %124 = vmatprep.subr.mxu0 %v51_v33  ;;  %237 = vmatprep.subr.mxu1 %v53_v34  ;;  %v36_v52 = vld [vmem:[%s763_s1 + $0x70] sm:$0xff]  ;;  %v31_v53 = vld [vmem:[%s763_s1 + $0x48] sm:$0xff]  ;;  %v33_v54 = vld [vmem:[%s763_s1 + $0x58] sm:$0xff] }
  0x13   :  { %125 = vmatpush1.msra.mxu0 %v50_v35  ;;  %238 = vmatpush1.msra.mxu1 %v52_v36  ;;  %v30_v55 = vld [vmem:[%s763_s1 + $0x40] sm:$0xff]  ;;  %v32_v56 = vld [vmem:[%s763_s1 + $0x50] sm:$0xff]  ;;  %v27_v57 = vld [vmem:[%s763_s1 + $0x28] sm:$0xff] }
  0x14   :  { %126 = vmatprep.subr.mxu0 %v47_v37  ;;  %239 = vmatprep.subr.mxu1 %v49_v38  ;;  %v29_v58 = vld [vmem:[%s763_s1 + $0x38] sm:$0xff]  ;;  %v26_v59 = vld [vmem:[%s763_s1 + $0x20] sm:$0xff]  ;;  %v28_v60 = vld [vmem:[%s763_s1 + $0x30] sm:$0xff] }
  0x15   :  { %127 = vmatpush1.msra.mxu0 %v46_v39  ;;  %240 = vmatpush1.msra.mxu1 %v48_v40  ;;  %v23_v61 = vld [vmem:[%s763_s1 + $0x8] sm:$0xff]  ;;  %v25_v62 = vld [vmem:[%s763_s1 + $0x18] sm:$0xff]  ;;  %v22_v63 = vld [vmem:[%s763_s1] sm:$0xff] }
  0x16   :  { %128 = vmatprep.subr.mxu0 %v43_v41  ;;  %241 = vmatprep.subr.mxu1 %v45_v42  ;;  %v24_v0 = vld [vmem:[%s763_s1 + $0x10] sm:$0xff]  ;;  %v14_v1 = vld [vmem:[%s764_s0] sm:$0xff]  ;;  %v15_v2 = vld [vmem:[%s764_s0 + $0x8] sm:$0xff] }
  0x17   :  { %129 = vmatpush1.msra.mxu0 %v42_v43  ;;  %242 = vmatpush1.msra.mxu1 %v44_v44  ;;  %v16_v4 = vld [vmem:[%s764_s0 + $0x10] sm:$0xff]  ;;  %v17_v5 = vld [vmem:[%s764_s0 + $0x18] sm:$0xff]  ;;  %v18_v6 = vld [vmem:[%s764_s0 + $0x20] sm:$0xff] }
  0x18   :  { %130 = vmatprep.subr.mxu0 %v39_v45  ;;  %243 = vmatprep.subr.mxu1 %v41_v46  ;;  %v19_v7 = vld [vmem:[%s764_s0 + $0x28] sm:$0xff]  ;;  %v20_v8 = vld [vmem:[%s764_s0 + $0x30] sm:$0xff]  ;;  %v21_v9 = vld [vmem:[%s764_s0 + $0x38] sm:$0xff] }
  0x19   :  { %131 = vmatpush1.msra.mxu0 %v38_v47  ;;  %244 = vmatpush1.msra.mxu1 %v40_v48  ;;  %v86_v14 = vld [vmem:[%s765_s2] sm:$0xf] }
  0x1a   :  { %132 = vmatprep.subr.mxu0 %v35_v49  ;;  %245 = vmatprep.subr.mxu1 %v37_v50  ;;  %v627_v17 = vrot.slane %v86_v14, %v90_v12  ;;  %v629_v18 = vrot.slane %v86_v14, %v98_v13  ;;  %v633_v19 = vrot.slane %v86_v14, %v102_v16 }
  0x1b   :  { %133 = vmatpush1.msra.mxu0 %v34_v51  ;;  %246 = vmatpush1.msra.mxu1 %v36_v52 }
  0x1c   :  { %134 = vmatprep.subr.mxu0 %v31_v53  ;;  %247 = vmatprep.subr.mxu1 %v33_v54 }
  0x1d   :  { %135 = vmatpush1.msra.mxu0 %v30_v55  ;;  %248 = vmatpush1.msra.mxu1 %v32_v56 }
  0x1e   :  { %136 = vmatprep.subr.mxu0 %v27_v57  ;;  %249 = vmatprep.subr.mxu1 %v29_v58 }
  0x1f   :  { %137 = vmatpush1.msra.mxu0 %v26_v59  ;;  %250 = vmatpush1.msra.mxu1 %v28_v60 }
  0x20   :  { %138 = vmatprep.subr.mxu0 %v23_v61  ;;  %251 = vmatprep.subr.mxu1 %v25_v62 }
  0x21   :  { %139 = vmatpush1.msra.mxu0 %v22_v63  ;;  %252 = vmatpush1.msra.mxu1 %v24_v0 }
  0x22   :  { %173 = vmatmul.mubr.f32.vlgmr.msra.gmra.mxu0 %v14_v1  ;;  %286 = vmatmul.mubr.f32.vlgmr.msra.gmra.mxu1 %v14_v1 }
  0x23   :  { %178 = vmatprep.mubr.f32.mxu0 %v371_v3  ;;  %291 = vmatprep.mubr.f32.mxu1 %v371_v3 }
  0x26   :  { %179 = vmatmul.mubr.f32.gmra.mxu0 %v15_v2  ;;  %292 = vmatmul.mubr.f32.gmra.mxu1 %v15_v2 }
  0x27   :  { %184 = vmatprep.mubr.f32.mxu0 %v371_v3  ;;  %297 = vmatprep.mubr.f32.mxu1 %v371_v3 }
  0x2a   :  { %185 = vmatmul.mubr.f32.gmra.mxu0 %v16_v4  ;;  %298 = vmatmul.mubr.f32.gmra.mxu1 %v16_v4 }
  0x2b   :  { %190 = vmatprep.mubr.f32.mxu0 %v371_v3  ;;  %303 = vmatprep.mubr.f32.mxu1 %v371_v3 }
  0x2e   :  { %191 = vmatmul.mubr.f32.gmra.mxu0 %v17_v5  ;;  %304 = vmatmul.mubr.f32.gmra.mxu1 %v17_v5 }
  0x2f   :  { %196 = vmatprep.mubr.f32.mxu0 %v371_v3  ;;  %309 = vmatprep.mubr.f32.mxu1 %v371_v3 }
  0x32   :  { %197 = vmatmul.mubr.f32.gmra.mxu0 %v18_v6  ;;  %310 = vmatmul.mubr.f32.gmra.mxu1 %v18_v6 }
  0x33   :  { %202 = vmatprep.mubr.f32.mxu0 %v371_v3  ;;  %315 = vmatprep.mubr.f32.mxu1 %v371_v3 }
  0x36   :  { %203 = vmatmul.mubr.f32.gmra.mxu0 %v19_v7  ;;  %316 = vmatmul.mubr.f32.gmra.mxu1 %v19_v7 }
  0x37   :  { %208 = vmatprep.mubr.f32.mxu0 %v371_v3  ;;  %321 = vmatprep.mubr.f32.mxu1 %v371_v3 }
  0x3a   :  { %209 = vmatmul.mubr.f32.gmra.mxu0 %v20_v8  ;;  %322 = vmatmul.mubr.f32.gmra.mxu1 %v20_v8 }
  0x3b   :  { %214 = vmatprep.mubr.f32.mxu0 %v371_v3  ;;  %327 = vmatprep.mubr.f32.mxu1 %v371_v3  ;;  %v631_v3 = vrot.slane %v86_v14, %v94_v15 }
  0x3e   :  { %215 = vmatmul.mubr.f32.gmra.mxu0 %v21_v9  ;;  %328 = vmatmul.mubr.f32.gmra.mxu1 %v21_v9 }
  0xe2   :  { %v174_v20 = vpop.f32.mrf.mxu0  ;;  %v287_v21 = vpop.f32.mrf.mxu1 }
  0xe3   :  { %v175_v22 = vadd.f32 %v174_v20, %v627_v17  ;;  %v288_v23 = vadd.f32 %v287_v21, %v629_v18 }
  0xe4   :  { %v176_v24 = vpop.f32.mrf.mxu0  ;;  %v289_v25 = vpop.f32.mrf.mxu1 }
  0xe5   :  { %334 = vst [vmem:[%s766_s3] sm:$0xff] %v175_v22  ;;  %336 = vst [vmem:[%s766_s3 + $0x10] sm:$0xff] %v288_v23  ;;  %v177_v26 = vadd.f32 %v176_v24, %v631_v3  ;;  %v290_v27 = vadd.f32 %v289_v25, %v633_v19 }
  0xe6   :  { %v180_v28 = vpop.f32.mrf.mxu0  ;;  %v293_v29 = vpop.f32.mrf.mxu1 }
  0xe7   :  { %335 = vst [vmem:[%s766_s3 + $0x8] sm:$0xff] %v177_v26  ;;  %337 = vst [vmem:[%s766_s3 + $0x18] sm:$0xff] %v290_v27  ;;  %v181_v30 = vadd.f32 %v180_v28, %v627_v17  ;;  %v294_v31 = vadd.f32 %v293_v29, %v629_v18 }
  0xe8   :  { %v182_v32 = vpop.f32.mrf.mxu0  ;;  %v295_v33 = vpop.f32.mrf.mxu1 }
  0xe9   :  { %338 = vst [vmem:[%s766_s3 + $0x20] sm:$0xff] %v181_v30  ;;  %340 = vst [vmem:[%s766_s3 + $0x30] sm:$0xff] %v294_v31  ;;  %v183_v34 = vadd.f32 %v182_v32, %v631_v3  ;;  %v296_v35 = vadd.f32 %v295_v33, %v633_v19 }
  0xea   :  { %v186_v36 = vpop.f32.mrf.mxu0  ;;  %v299_v37 = vpop.f32.mrf.mxu1 }
  0xeb   :  { %339 = vst [vmem:[%s766_s3 + $0x28] sm:$0xff] %v183_v34  ;;  %341 = vst [vmem:[%s766_s3 + $0x38] sm:$0xff] %v296_v35  ;;  %v187_v38 = vadd.f32 %v186_v36, %v627_v17  ;;  %v300_v39 = vadd.f32 %v299_v37, %v629_v18 }
  0xec   :  { %v188_v40 = vpop.f32.mrf.mxu0  ;;  %v301_v41 = vpop.f32.mrf.mxu1 }
  0xed   :  { %342 = vst [vmem:[%s766_s3 + $0x40] sm:$0xff] %v187_v38  ;;  %344 = vst [vmem:[%s766_s3 + $0x50] sm:$0xff] %v300_v39  ;;  %v189_v42 = vadd.f32 %v188_v40, %v631_v3  ;;  %v302_v43 = vadd.f32 %v301_v41, %v633_v19 }
  0xee   :  { %v192_v44 = vpop.f32.mrf.mxu0  ;;  %v305_v45 = vpop.f32.mrf.mxu1 }
  0xef   :  { %343 = vst [vmem:[%s766_s3 + $0x48] sm:$0xff] %v189_v42  ;;  %345 = vst [vmem:[%s766_s3 + $0x58] sm:$0xff] %v302_v43  ;;  %v193_v46 = vadd.f32 %v192_v44, %v627_v17  ;;  %v306_v47 = vadd.f32 %v305_v45, %v629_v18 }
  0xf0   :  { %v194_v48 = vpop.f32.mrf.mxu0  ;;  %v307_v49 = vpop.f32.mrf.mxu1 }
  0xf1   :  { %346 = vst [vmem:[%s766_s3 + $0x60] sm:$0xff] %v193_v46  ;;  %348 = vst [vmem:[%s766_s3 + $0x70] sm:$0xff] %v306_v47  ;;  %v195_v50 = vadd.f32 %v194_v48, %v631_v3  ;;  %v308_v51 = vadd.f32 %v307_v49, %v633_v19 }
  0xf2   :  { %v198_v52 = vpop.f32.mrf.mxu0  ;;  %v311_v53 = vpop.f32.mrf.mxu1 }
  0xf3   :  { %347 = vst [vmem:[%s766_s3 + $0x68] sm:$0xff] %v195_v50  ;;  %349 = vst [vmem:[%s766_s3 + $0x78] sm:$0xff] %v308_v51  ;;  %v199_v54 = vadd.f32 %v198_v52, %v627_v17  ;;  %v312_v55 = vadd.f32 %v311_v53, %v629_v18 }
  0xf4   :  { %v200_v56 = vpop.f32.mrf.mxu0  ;;  %v313_v57 = vpop.f32.mrf.mxu1 }
  0xf5   :  { %350 = vst [vmem:[%s766_s3 + $0x80] sm:$0xff] %v199_v54  ;;  %352 = vst [vmem:[%s766_s3 + $0x90] sm:$0xff] %v312_v55  ;;  %v201_v58 = vadd.f32 %v200_v56, %v631_v3  ;;  %v314_v59 = vadd.f32 %v313_v57, %v633_v19 }
  0xf6   :  { %v204_v60 = vpop.f32.mrf.mxu0  ;;  %v317_v61 = vpop.f32.mrf.mxu1 }
  0xf7   :  { %351 = vst [vmem:[%s766_s3 + $0x88] sm:$0xff] %v201_v58  ;;  %353 = vst [vmem:[%s766_s3 + $0x98] sm:$0xff] %v314_v59  ;;  %v205_v62 = vadd.f32 %v204_v60, %v627_v17  ;;  %v318_v63 = vadd.f32 %v317_v61, %v629_v18 }
  0xf8   :  { %v206_v0 = vpop.f32.mrf.mxu0  ;;  %v319_v1 = vpop.f32.mrf.mxu1 }
  0xf9   :  { %354 = vst [vmem:[%s766_s3 + $0xa0] sm:$0xff] %v205_v62  ;;  %356 = vst [vmem:[%s766_s3 + $0xb0] sm:$0xff] %v318_v63  ;;  %v207_v2 = vadd.f32 %v206_v0, %v631_v3  ;;  %v320_v4 = vadd.f32 %v319_v1, %v633_v19 }
  0xfa   :  { %v210_v5 = vpop.f32.mrf.mxu0  ;;  %v323_v6 = vpop.f32.mrf.mxu1 }
  0xfb   :  { %355 = vst [vmem:[%s766_s3 + $0xa8] sm:$0xff] %v207_v2  ;;  %357 = vst [vmem:[%s766_s3 + $0xb8] sm:$0xff] %v320_v4  ;;  %v211_v7 = vadd.f32 %v210_v5, %v627_v17  ;;  %v324_v8 = vadd.f32 %v323_v6, %v629_v18 }
  0xfc   :  { %v212_v9 = vpop.f32.mrf.mxu0  ;;  %v325_v10 = vpop.f32.mrf.mxu1 }
  0xfd   :  { %358 = vst [vmem:[%s766_s3 + $0xc0] sm:$0xff] %v211_v7  ;;  %360 = vst [vmem:[%s766_s3 + $0xd0] sm:$0xff] %v324_v8  ;;  %v213_v11 = vadd.f32 %v212_v9, %v631_v3  ;;  %v326_v12 = vadd.f32 %v325_v10, %v633_v19 }
  0xfe   :  { %v216_v13 = vpop.f32.mrf.mxu0  ;;  %v329_v14 = vpop.f32.mrf.mxu1 }
  0xff   :  { %359 = vst [vmem:[%s766_s3 + $0xc8] sm:$0xff] %v213_v11  ;;  %361 = vst [vmem:[%s766_s3 + $0xd8] sm:$0xff] %v326_v12  ;;  %v217_v15 = vadd.f32 %v216_v13, %v627_v17  ;;  %v330_v16 = vadd.f32 %v329_v14, %v629_v18 }
 0x100   :  { %v218_v20 = vpop.f32.mrf.mxu0  ;;  %v331_v21 = vpop.f32.mrf.mxu1 }
 0x101   :  { %362 = vst [vmem:[%s766_s3 + $0xe0] sm:$0xff] %v217_v15  ;;  %364 = vst [vmem:[%s766_s3 + $0xf0] sm:$0xff] %v330_v16  ;;  %v219_v22 = vadd.f32 %v218_v20, %v631_v3  ;;  %v332_v23 = vadd.f32 %v331_v21, %v633_v19 }
 0x103   :  { %363 = vst [vmem:[%s766_s3 + $0xe8] sm:$0xff] %v219_v22  ;;  %365 = vst [vmem:[%s766_s3 + $0xf8] sm:$0xff] %v332_v23 }

// kernel: rnn_model_forward.17
= control target key start
LH: loop header
LB: loop body
LE: loop exit
PB: predicated region body
PF: predicated region fallthrough
CT: control target
= control target key end

     0   :  { %vm150_vm0 = vcmask 523264   ;;  %s391_s1 = inlined_call_operand.vmem [shape: f32[128,64], index: 1, kind: input, shape index: {}]   ;;  %s392_s0 = inlined_call_operand.vmem [shape: f32[64,128], index: 0, kind: input, shape index: {}]   ;;  %s393_s2 = inlined_call_operand.vmem [shape: f32[1,64], index: 2, kind: input, shape index: {}]   ;;  %s394_s3 = inlined_call_operand.vmem [shape: f32[64,64], index: 3, kind: output, shape index: {}]  }
   0x1   :  { %v37_v0 = vld [vmem:[%s391_s1 + $0x78] sm:$0xff]  ;;  %v36_v1 = vld [vmem:[%s391_s1 + $0x70] sm:$0xff]  ;;  %v35_v2 = vld [vmem:[%s391_s1 + $0x68] sm:$0xff] }
   0x2   :  { %188 = vmatprep.subr.mxu0 %v37_v0  ;;  %232 = vmatprep.subr.mxu1 %v37_v0  ;;  %v34_v3 = vld [vmem:[%s391_s1 + $0x60] sm:$0xff]  ;;  %v33_v4 = vld [vmem:[%s391_s1 + $0x58] sm:$0xff]  ;;  %v32_v5 = vld [vmem:[%s391_s1 + $0x50] sm:$0xff] }
   0x3   :  { %189 = vmatpush3.msra.mxu0 %v37_v0  ;;  %248 = vmatpush3.msra.mxu1 %v37_v0  ;;  %v31_v6 = vld [vmem:[%s391_s1 + $0x48] sm:$0xff]  ;;  %v30_v7 = vld [vmem:[%s391_s1 + $0x40] sm:$0xff]  ;;  %v29_v8 = vld [vmem:[%s391_s1 + $0x38] sm:$0xff] }
   0x4   :  { %190 = vmatprep.subr.mxu0 %v36_v1  ;;  %233 = vmatprep.subr.mxu1 %v36_v1  ;;  %v28_v9 = vld [vmem:[%s391_s1 + $0x30] sm:$0xff]  ;;  %v27_v10 = vld [vmem:[%s391_s1 + $0x28] sm:$0xff]  ;;  %v26_v11 = vld [vmem:[%s391_s1 + $0x20] sm:$0xff] }
   0x5   :  { %191 = vmatpush3.msra.mxu0 %v36_v1  ;;  %249 = vmatpush3.msra.mxu1 %v36_v1  ;;  %v25_v12 = vld [vmem:[%s391_s1 + $0x18] sm:$0xff]  ;;  %v24_v13 = vld [vmem:[%s391_s1 + $0x10] sm:$0xff]  ;;  %v23_v14 = vld [vmem:[%s391_s1 + $0x8] sm:$0xff] }
   0x6   :  { %192 = vmatprep.subr.mxu0 %v35_v2  ;;  %234 = vmatprep.subr.mxu1 %v35_v2  ;;  %v22_v15 = vld [vmem:[%s391_s1] sm:$0xff]  ;;  %v15_v18 = vld [vmem:[%s392_s0 + $0x8] sm:$0xff]  ;;  %v16_v20 = vld [vmem:[%s392_s0 + $0x10] sm:$0xff] }
   0x7   :  { %193 = vmatpush3.msra.mxu0 %v35_v2  ;;  %250 = vmatpush3.msra.mxu1 %v35_v2  ;;  %v14_v16 = vld [vmem:[%s392_s0] sm:$0xff]  ;;  %v19_v19 = vld [vmem:[%s392_s0 + $0x28] sm:$0xff]  ;;  %v20_v21 = vld [vmem:[%s392_s0 + $0x30] sm:$0xff] }
   0x8   :  { %194 = vmatprep.subr.mxu0 %v34_v3  ;;  %235 = vmatprep.subr.mxu1 %v34_v3  ;;  %v18_v17 = vld [vmem:[%s392_s0 + $0x20] sm:$0xff]  ;;  %v17_v22 = vld [vmem:[%s392_s0 + $0x18] sm:$0xff] }
   0x9   :  { %195 = vmatpush3.msra.mxu0 %v34_v3  ;;  %251 = vmatpush3.msra.mxu1 %v34_v3  ;;  %v21_v23 = vld [vmem:[%s392_s0 + $0x38] sm:$0xff]  ;;  %v163_v24 = vld [vmem:[%s393_s2] ss:$0 sm:$0xff] }
   0xa   :  { %196 = vmatprep.subr.mxu0 %v33_v4  ;;  %236 = vmatprep.subr.mxu1 %v33_v4 }
   0xb   :  { %197 = vmatpush3.msra.mxu0 %v33_v4  ;;  %252 = vmatpush3.msra.mxu1 %v33_v4 }
   0xc   :  { %198 = vmatprep.subr.mxu0 %v32_v5  ;;  %237 = vmatprep.subr.mxu1 %v32_v5 }
   0xd   :  { %199 = vmatpush3.msra.mxu0 %v32_v5  ;;  %253 = vmatpush3.msra.mxu1 %v32_v5 }
   0xe   :  { %200 = vmatprep.subr.mxu0 %v31_v6  ;;  %238 = vmatprep.subr.mxu1 %v31_v6 }
   0xf   :  { %201 = vmatpush3.msra.mxu0 %v31_v6  ;;  %254 = vmatpush3.msra.mxu1 %v31_v6 }
  0x10   :  { %202 = vmatprep.subr.mxu0 %v30_v7  ;;  %239 = vmatprep.subr.mxu1 %v30_v7 }
  0x11   :  { %203 = vmatpush3.msra.mxu0 %v30_v7  ;;  %255 = vmatpush3.msra.mxu1 %v30_v7 }
  0x12   :  { %204 = vmatprep.subr.mxu0 %v29_v8  ;;  %240 = vmatprep.subr.mxu1 %v29_v8 }
  0x13   :  { %205 = vmatpush3.msra.mxu0 %v29_v8  ;;  %256 = vmatpush3.msra.mxu1 %v29_v8 }
  0x14   :  { %206 = vmatprep.subr.mxu0 %v28_v9  ;;  %241 = vmatprep.subr.mxu1 %v28_v9 }
  0x15   :  { %207 = vmatpush3.msra.mxu0 %v28_v9  ;;  %257 = vmatpush3.msra.mxu1 %v28_v9 }
  0x16   :  { %208 = vmatprep.subr.mxu0 %v27_v10  ;;  %242 = vmatprep.subr.mxu1 %v27_v10 }
  0x17   :  { %209 = vmatpush3.msra.mxu0 %v27_v10  ;;  %258 = vmatpush3.msra.mxu1 %v27_v10 }
  0x18   :  { %210 = vmatprep.subr.mxu0 %v26_v11  ;;  %243 = vmatprep.subr.mxu1 %v26_v11 }
  0x19   :  { %211 = vmatpush3.msra.mxu0 %v26_v11  ;;  %259 = vmatpush3.msra.mxu1 %v26_v11 }
  0x1a   :  { %212 = vmatprep.subr.mxu0 %v25_v12  ;;  %244 = vmatprep.subr.mxu1 %v25_v12 }
  0x1b   :  { %213 = vmatpush3.msra.mxu0 %v25_v12  ;;  %260 = vmatpush3.msra.mxu1 %v25_v12 }
  0x1c   :  { %214 = vmatprep.subr.mxu0 %v24_v13  ;;  %245 = vmatprep.subr.mxu1 %v24_v13 }
  0x1d   :  { %215 = vmatpush3.msra.mxu0 %v24_v13  ;;  %261 = vmatpush3.msra.mxu1 %v24_v13 }
  0x1e   :  { %216 = vmatprep.subr.mxu0 %v23_v14  ;;  %246 = vmatprep.subr.mxu1 %v23_v14 }
  0x1f   :  { %217 = vmatpush3.msra.mxu0 %v23_v14  ;;  %262 = vmatpush3.msra.mxu1 %v23_v14 }
  0x20   :  { %218 = vmatprep.subr.mxu0 %v22_v15  ;;  %247 = vmatprep.subr.mxu1 %v22_v15 }
  0x21   :  { %219 = vmatpush3.msra.mxu0 %v22_v15  ;;  %263 = vmatpush3.msra.mxu1 %v22_v15 }
  0x22   :  { %220 = vmatprep.mubr.f32.mxu0 %v14_v16  ;;  %226 = vmatprep.mubr.f32.mxu1 %v18_v17 }
  0x23   :  { %221 = vmatmul.mubr.f32.vlgmr.msra.gmra.mxu0 %v15_v18  ;;  %227 = vmatmul.mubr.f32.vlgmr.msra.gmra.mxu1 %v19_v19 }
  0x24   :  { %223 = vmatprep.mubr.f32.mxu0 %v16_v20  ;;  %229 = vmatprep.mubr.f32.mxu1 %v20_v21 }
  0x27   :  { %224 = vmatmul.mubr.f32.gmra.mxu0 %v17_v22  ;;  %230 = vmatmul.mubr.f32.gmra.mxu1 %v21_v23 }
  0xe3   :  { %v222_v25 = vpop.f32.mrf.mxu0  ;;  %v228_v26 = vpop.f32.mrf.mxu1 }
  0xe4   :  { %v117_v27 = vadd.f32 %v222_v25, %v163_v24  ;;  %v137_v28 = vadd.f32 %v228_v26, %v163_v24 }
  0xe5   :  { %v111_v29 = vpop.f32.mrf.mxu0  ;;  %v131_v30 = vpop.f32.mrf.mxu1 }
  0xe6   :  { %152 = vst.msk [vmem:[%s394_s3 + $0x8] sm:$0xff] %vm150_vm0, %v117_v27  ;;  %156 = vst.msk [vmem:[%s394_s3 + $0x28] sm:$0xff] %vm150_vm0, %v137_v28  ;;  %v112_v31 = vadd.f32 %v163_v24, %v111_v29  ;;  %v132_v32 = vadd.f32 %v163_v24, %v131_v30 }
  0xe7   :  { %v225_v33 = vpop.f32.mrf.mxu0  ;;  %v231_v34 = vpop.f32.mrf.mxu1 }
  0xe8   :  { %151 = vst.msk [vmem:[%s394_s3] sm:$0xff] %vm150_vm0, %v112_v31  ;;  %155 = vst.msk [vmem:[%s394_s3 + $0x20] sm:$0xff] %vm150_vm0, %v132_v32  ;;  %v127_v35 = vadd.f32 %v225_v33, %v163_v24  ;;  %v147_v36 = vadd.f32 %v231_v34, %v163_v24 }
  0xe9   :  { %v121_v37 = vpop.f32.mrf.mxu0  ;;  %v141_v38 = vpop.f32.mrf.mxu1 }
  0xea   :  { %154 = vst.msk [vmem:[%s394_s3 + $0x18] sm:$0xff] %vm150_vm0, %v127_v35  ;;  %158 = vst.msk [vmem:[%s394_s3 + $0x38] sm:$0xff] %vm150_vm0, %v147_v36  ;;  %v122_v39 = vadd.f32 %v163_v24, %v121_v37  ;;  %v142_v40 = vadd.f32 %v163_v24, %v141_v38 }
  0xec   :  { %153 = vst.msk [vmem:[%s394_s3 + $0x10] sm:$0xff] %vm150_vm0, %v122_v39  ;;  %157 = vst.msk [vmem:[%s394_s3 + $0x30] sm:$0xff] %vm150_vm0, %v142_v40 }

// kernel: rnn_model_forward.10
= control target key start
LH: loop header
LB: loop body
LE: loop exit
PB: predicated region body
PF: predicated region fallthrough
CT: control target
= control target key end

     0   :  { %12 = vsyncpa [#allocation5], 0  ;;  %v3419_v4 = vmov 0.0   ;;  %v3427_v7 = vmov 0   ;;  %s3412_s0 = inlined_call_operand.vmem [shape: s32[8,1], index: 0, kind: input, shape index: {}]   ;;  %s3413_s1 = inlined_call_operand.vmem [shape: f32[8,8,512], index: 1, kind: input, shape index: {}]   ;;  %s3414_s2 = inlined_call_operand.vmem [shape: f32[8,8,128], index: 2, kind: input, shape index: {}]   ;;  %s3415_s3 = inlined_call_operand.vmem [shape: f32[128,512], index: 3, kind: input, shape index: {}]   ;;  %s3416_s4 = inlined_call_operand.vmem [shape: f32[8,8,128], index: 4, kind: output, shape index: {0}]   ;;  %s3417_s5 = inlined_call_operand.hbm [shape: f32[1,8,128], index: 5, kind: output, shape index: {1}]   ;;  %s3418_s6 = inlined_call_operand.hbm [shape: f32[1,8,128], index: 6, kind: output, shape index: {2}]  }
   0x1   :  { %v2011_v0 = vld [vmem:[%s3415_s3 + $0x1e8] sm:$0xff]  ;;  %v2016_v1 = vld [vmem:[%s3415_s3 + $0x1e0] sm:$0xff]  ;;  %163 = vmatprep.mubr.f32.mxu0 %v3419_v4  ;;  %234 = vmatprep.mubr.f32.mxu1 %v3419_v4  ;;  %v2060_v10 = vld [vmem:[%s3415_s3 + $0x1f8] sm:$0xff] }
   0x2   :  { %3509 = vst [vmem:[#allocation10_spill] sm:$0xff] %v2011_v0  ;;  %v2021_v2 = vld [vmem:[%s3415_s3 + $0x1c8] sm:$0xff]  ;;  %99 = vmatprep.subr.mxu0 %v2011_v0  ;;  %v2027_v3 = vld [vmem:[%s3415_s3 + $0x1c0] sm:$0xff]  ;;  %1731 = vset.pattern.permute.xlu0 %v3427_v7  ;;  %3510 = vst [vmem:[#allocation11_spill] sm:$0xff] %v2060_v10 }
   0x3   :  { %100 = vmatpush1.msra.mxu0 %v2016_v1  ;;  %v2034_v5 = vld [vmem:[%s3415_s3 + $0x1a8] sm:$0xff]  ;;  %v2041_v6 = vld [vmem:[%s3415_s3 + $0x1a0] sm:$0xff]  ;;  %1732 = vset.pattern.permute.xlu1 %v3427_v7  ;;  %v2072_v12 = vld [vmem:[%s3415_s3 + $0x1f0] sm:$0xff] }
   0x4   :  { %101 = vmatprep.subr.mxu0 %v2021_v2  ;;  %v2048_v8 = vld [vmem:[%s3415_s3 + $0x188] sm:$0xff]  ;;  %v2055_v9 = vld [vmem:[%s3415_s3 + $0x180] sm:$0xff]  ;;  %170 = vmatprep.subr.mxu1 %v2060_v10  ;;  %v2084_v14 = vld [vmem:[%s3415_s3 + $0x1d8] sm:$0xff] }
   0x5   :  { %102 = vmatpush1.msra.mxu0 %v2027_v3  ;;  %v2066_v11 = vld [vmem:[%s3415_s3 + $0x168] sm:$0xff]  ;;  %v2078_v13 = vld [vmem:[%s3415_s3 + $0x160] sm:$0xff]  ;;  %171 = vmatpush1.msra.mxu1 %v2072_v12  ;;  %v2089_v15 = vld [vmem:[%s3415_s3 + $0x1d0] sm:$0xff] }
   0x6   :  { %103 = vmatprep.subr.mxu0 %v2034_v5  ;;  %v2095_v16 = vld [vmem:[%s3415_s3 + $0x148] sm:$0xff]  ;;  %172 = vmatprep.subr.mxu1 %v2084_v14  ;;  %v2101_v17 = vld [vmem:[%s3415_s3 + $0x1b8] sm:$0xff]  ;;  %v2107_v18 = vld [vmem:[%s3415_s3 + $0x140] sm:$0xff] }
   0x7   :  { %104 = vmatpush1.msra.mxu0 %v2041_v6  ;;  %173 = vmatpush1.msra.mxu1 %v2089_v15  ;;  %v2113_v19 = vld [vmem:[%s3415_s3 + $0x1b0] sm:$0xff]  ;;  %v2118_v20 = vld [vmem:[%s3415_s3 + $0x198] sm:$0xff]  ;;  %v2124_v21 = vld [vmem:[%s3415_s3 + $0x128] sm:$0xff] }
   0x8   :  { %105 = vmatprep.subr.mxu0 %v2048_v8  ;;  %174 = vmatprep.subr.mxu1 %v2101_v17  ;;  %v2130_v22 = vld [vmem:[%s3415_s3 + $0x190] sm:$0xff]  ;;  %v2136_v23 = vld [vmem:[%s3415_s3 + $0x120] sm:$0xff]  ;;  %v2142_v24 = vld [vmem:[%s3415_s3 + $0x178] sm:$0xff] }
   0x9   :  { %106 = vmatpush1.msra.mxu0 %v2055_v9  ;;  %175 = vmatpush1.msra.mxu1 %v2113_v19  ;;  %v2148_v25 = vld [vmem:[%s3415_s3 + $0x108] sm:$0xff]  ;;  %v2154_v26 = vld [vmem:[%s3415_s3 + $0x170] sm:$0xff]  ;;  %v2160_v27 = vld [vmem:[%s3415_s3 + $0x100] sm:$0xff] }
   0xa   :  { %107 = vmatprep.subr.mxu0 %v2066_v11  ;;  %176 = vmatprep.subr.mxu1 %v2118_v20  ;;  %v2166_v28 = vld [vmem:[%s3415_s3 + $0x158] sm:$0xff]  ;;  %v2172_v29 = vld [vmem:[%s3415_s3 + $0xe8] sm:$0xff]  ;;  %v2178_v30 = vld [vmem:[%s3415_s3 + $0x150] sm:$0xff] }
   0xb   :  { %108 = vmatpush1.msra.mxu0 %v2078_v13  ;;  %177 = vmatpush1.msra.mxu1 %v2130_v22  ;;  %v2184_v31 = vld [vmem:[%s3415_s3 + $0xe0] sm:$0xff]  ;;  %v2190_v32 = vld [vmem:[%s3415_s3 + $0x138] sm:$0xff]  ;;  %v2196_v33 = vld [vmem:[%s3415_s3 + $0xc8] sm:$0xff] }
   0xc   :  { %109 = vmatprep.subr.mxu0 %v2095_v16  ;;  %178 = vmatprep.subr.mxu1 %v2142_v24  ;;  %v2202_v34 = vld [vmem:[%s3415_s3 + $0x130] sm:$0xff]  ;;  %v2208_v35 = vld [vmem:[%s3415_s3 + $0xc0] sm:$0xff]  ;;  %v2214_v36 = vld [vmem:[%s3415_s3 + $0x118] sm:$0xff] }
   0xd   :  { %110 = vmatpush1.msra.mxu0 %v2107_v18  ;;  %179 = vmatpush1.msra.mxu1 %v2154_v26  ;;  %v2220_v37 = vld [vmem:[%s3415_s3 + $0xa8] sm:$0xff]  ;;  %v2226_v38 = vld [vmem:[%s3415_s3 + $0x110] sm:$0xff]  ;;  %v2232_v39 = vld [vmem:[%s3415_s3 + $0xa0] sm:$0xff] }
   0xe   :  { %111 = vmatprep.subr.mxu0 %v2124_v21  ;;  %180 = vmatprep.subr.mxu1 %v2166_v28  ;;  %v2238_v40 = vld [vmem:[%s3415_s3 + $0xf8] sm:$0xff]  ;;  %v2244_v41 = vld [vmem:[%s3415_s3 + $0x88] sm:$0xff]  ;;  %v2250_v42 = vld [vmem:[%s3415_s3 + $0xf0] sm:$0xff] }
   0xf   :  { %112 = vmatpush1.msra.mxu0 %v2136_v23  ;;  %181 = vmatpush1.msra.mxu1 %v2178_v30  ;;  %v2256_v43 = vld [vmem:[%s3415_s3 + $0x80] sm:$0xff]  ;;  %v2262_v44 = vld [vmem:[%s3415_s3 + $0xd8] sm:$0xff]  ;;  %v2268_v45 = vld [vmem:[%s3415_s3 + $0x68] sm:$0xff] }
  0x10   :  { %113 = vmatprep.subr.mxu0 %v2148_v25  ;;  %182 = vmatprep.subr.mxu1 %v2190_v32  ;;  %3511 = vst [vmem:[#allocation12_spill] sm:$0xff] %v2256_v43  ;;  %3512 = vst [vmem:[#allocation13_spill] sm:$0xff] %v2268_v45  ;;  %v2274_v46 = vld [vmem:[%s3415_s3 + $0xd0] sm:$0xff] }
  0x11   :  { %114 = vmatpush1.msra.mxu0 %v2160_v27  ;;  %183 = vmatpush1.msra.mxu1 %v2202_v34 }
  0x12   :  { %115 = vmatprep.subr.mxu0 %v2172_v29  ;;  %184 = vmatprep.subr.mxu1 %v2214_v36 }
  0x13   :  { %116 = vmatpush1.msra.mxu0 %v2184_v31  ;;  %185 = vmatpush1.msra.mxu1 %v2226_v38 }
  0x14   :  { %117 = vmatprep.subr.mxu0 %v2196_v33  ;;  %186 = vmatprep.subr.mxu1 %v2238_v40 }
  0x15   :  { %118 = vmatpush1.msra.mxu0 %v2208_v35 }
  0x16   :  { %119 = vmatprep.subr.mxu0 %v2220_v37 }
  0x17   :  { %120 = vmatpush1.msra.mxu0 %v2232_v39 }
  0x18   :  { %13 = vsyncpa [#allocation7], 0  ;;  %121 = vmatprep.subr.mxu0 %v2244_v41  ;;  %v2280_v47 = vld [vmem:[%s3415_s3 + $0x60] sm:$0xff]  ;;  %187 = vmatpush1.msra.mxu1 %v2250_v42  ;;  %v2286_v48 = vld [vmem:[%s3415_s3 + $0xb8] sm:$0xff]  ;;  %s1971_s23 = smov [#allocation6]  }
  0x19   :  { %3513 = vst [vmem:[#allocation14_spill] sm:$0xff] %v2280_v47  ;;  %122 = vmatpush1.msra.mxu0 %v2256_v43  ;;  %v2292_v49 = vld [vmem:[%s3415_s3 + $0x48] sm:$0xff]  ;;  %188 = vmatprep.subr.mxu1 %v2262_v44  ;;  %v2298_v50 = vld [vmem:[%s3415_s3 + $0xb0] sm:$0xff]  ;;  %v2304_v51 = vld [vmem:[%s3415_s3 + $0x40] sm:$0xff] }
  0x1a   :  { %3514 = vst [vmem:[#allocation15_spill] sm:$0xff] %v2292_v49  ;;  %123 = vmatprep.subr.mxu0 %v2268_v45  ;;  %3515 = vst [vmem:[#allocation16_spill] sm:$0xff] %v2304_v51  ;;  %189 = vmatpush1.msra.mxu1 %v2274_v46  ;;  %v2310_v52 = vld [vmem:[%s3415_s3 + $0x98] sm:$0xff]  ;;  %v2315_v53 = vld [vmem:[%s3412_s0] sm:$0xff] }
  0x1b   :  { %3516 = vst [vmem:[#allocation17_spill] sm:$0xff] %v2315_v53  ;;  %124 = vmatpush1.msra.mxu0 %v2280_v47  ;;  %v2321_v54 = vld [vmem:[%s3415_s3 + $0x28] sm:$0xff]  ;;  %190 = vmatprep.subr.mxu1 %v2286_v48  ;;  %v2327_v55 = vld [vmem:[%s3415_s3 + $0x90] sm:$0xff]  ;;  %v2333_v56 = vld [vmem:[%s3415_s3 + $0x20] sm:$0xff]  ;;  %vm271_vm0 = vcmp.gt.s32.totalorder %v2315_v53, 0  ;;  %vm460_vm1 = vcmp.gt.s32.totalorder %v2315_v53, 1 }
  0x1c   :  { %3517 = vst [vmem:[#allocation18_spill] sm:$0xff] %v2321_v54  ;;  %3518 = vst [vmem:[#allocation19_spill] sm:$0xff] %v2327_v55  ;;  %125 = vmatprep.subr.mxu0 %v2292_v49  ;;  %191 = vmatpush1.msra.mxu1 %v2298_v50  ;;  %v2339_v57 = vld [vmem:[%s3415_s3 + $0x78] sm:$0xff]  ;;  %v2345_v58 = vld [vmem:[%s3415_s3 + $0x8] sm:$0xff]  ;;  %v272_v4 = vsel %vm271_vm0, 1, %v3427_v7  ;;  %vm1033_vm2 = vcmp.gt.s32.totalorder %v2315_v53, 4 }
  0x1d   :  { %3519 = vst [vmem:[#allocation20_spill] sm:$0xff] %v2333_v56  ;;  %3520 = vst [vmem:[#allocation21_spill] sm:$0xff] %v2339_v57  ;;  %126 = vmatpush1.msra.mxu0 %v2304_v51  ;;  %192 = vmatprep.subr.mxu1 %v2310_v52  ;;  %v2351_v59 = vld [vmem:[%s3415_s3 + $0x70] sm:$0xff]  ;;  %v2358_v60 = vld [vmem:[%s3415_s3] sm:$0xff]  ;;  %vm1415_vm3 = vcmp.gt.s32.totalorder %v2315_v53, 6 }
  0x1e   :  { %3521 = vst [vmem:[#allocation22_spill] sm:$0xff] %v2345_v58  ;;  %3522 = vst [vmem:[#allocation23_spill] sm:$0xff] %v2351_v59  ;;  %127 = vmatprep.subr.mxu0 %v2321_v54  ;;  %193 = vmatpush1.msra.mxu1 %v2327_v55  ;;  %v2364_v61 = vld [vmem:[%s3415_s3 + $0x58] sm:$0xff]  ;;  %v2371_v62 = vld [vmem:[%s3415_s3 + $0x50] sm:$0xff] }
  0x1f   :  { %3523 = vst [vmem:[#allocation24_spill] sm:$0xff] %v2358_v60  ;;  %3524 = vst [vmem:[#allocation25_spill] sm:$0xff] %v2364_v61  ;;  %128 = vmatpush1.msra.mxu0 %v2333_v56  ;;  %194 = vmatprep.subr.mxu1 %v2339_v57  ;;  %v2378_v63 = vld [vmem:[%s3415_s3 + $0x38] sm:$0xff]  ;;  %v2386_v56 = vld [vmem:[%s3415_s3 + $0x30] sm:$0xff] }
  0x20   :  { %3525 = vst [vmem:[#allocation26_spill] sm:$0xff] %v2371_v62  ;;  %129 = vmatprep.subr.mxu0 %v2345_v58  ;;  %195 = vmatpush1.msra.mxu1 %v2351_v59  ;;  %3526 = vst [vmem:[#allocation27_spill] sm:$0xff] %v2378_v63  ;;  %v3528_v58 = vmov 0.0   ;;  %v2394_v54 = vld [vmem:[%s3415_s3 + $0x18] sm:$0xff]  ;;  %v2400_v7 = vld [vmem:[%s3415_s3 + $0x10] sm:$0xff] }
  0x21   :  { %130 = vmatpush1.msra.mxu0 %v2358_v60  ;;  %196 = vmatprep.subr.mxu1 %v2364_v61  ;;  %3527 = vst [vmem:[#allocation28_spill] sm:$0xff] %v2386_v56  ;;  %3529 = vst [vmem:[#allocation29_spill] sm:$0xff] %v2394_v54  ;;  %v3531_v60 = vmov 0  }
  0x22   :  { %164 = vmatmul.mubr.f32.vlgmr.msra.gmra.mxu0 %v3528_v58  ;;  %197 = vmatpush1.msra.mxu1 %v2371_v62  ;;  %3530 = vst [vmem:[#allocation30_spill] sm:$0xff] %v2400_v7  ;;  %v461_v51 = vsel %vm460_vm1, 1, %v3531_v60 }
  0x23   :  { %198 = vmatprep.subr.mxu1 %v2378_v63  ;;  %274 = vperm.xlu0 %1731, %v272_v4   ;;  %v1034_v4 = vsel %vm1033_vm2, 1, %v3531_v60 }
  0x24   :  { %199 = vmatpush1.msra.mxu1 %v2386_v56  ;;  %288 = vmatprep.subr.mxu0 %v2011_v0 }
  0x25   :  { %200 = vmatprep.subr.mxu1 %v2394_v54  ;;  %289 = vmatpush1.msra.mxu0 %v2016_v1  ;;  %v3535_v53 = vld [vmem:[#allocation22_spill] sm:$0xff] }
  0x26   :  { %201 = vmatpush1.msra.mxu1 %v2400_v7  ;;  %290 = vmatprep.subr.mxu0 %v2021_v2 }
  0x27   :  { %235 = vmatmul.mubr.f32.vlgmr.msra.gmra.mxu1 %v3528_v58  ;;  %463 = vperm.xlu0 %1731, %v461_v51   ;;  %v1416_v51 = vsel %vm1415_vm3, 1, %v3531_v60  ;;  %v3534_v60 = vld [vmem:[#allocation20_spill] sm:$0xff] }
  0x28   :  { %359 = vmatprep.subr.mxu1 %v2060_v10  ;;  %291 = vmatpush1.msra.mxu0 %v2027_v3 }
  0x29   :  { %360 = vmatpush1.msra.mxu1 %v2072_v12  ;;  %292 = vmatprep.subr.mxu0 %v2034_v5 }
  0x2a   :  { %361 = vmatprep.subr.mxu1 %v2084_v14  ;;  %293 = vmatpush1.msra.mxu0 %v2041_v6 }
  0x2b   :  { %1036 = vperm.xlu0 %1731, %v1034_v4   ;;  %362 = vmatpush1.msra.mxu1 %v2089_v15  ;;  %v3532_v4 = vld [vmem:[#allocation16_spill] sm:$0xff] }
  0x2c   :  { %363 = vmatprep.subr.mxu1 %v2101_v17  ;;  %294 = vmatprep.subr.mxu0 %v2048_v8 }
  0x2d   :  { %364 = vmatpush1.msra.mxu1 %v2113_v19  ;;  %295 = vmatpush1.msra.mxu0 %v2055_v9 }
  0x2e   :  { %365 = vmatprep.subr.mxu1 %v2118_v20  ;;  %296 = vmatprep.subr.mxu0 %v2066_v11 }
  0x2f   :  { %1418 = vperm.xlu0 %1731, %v1416_v51   ;;  %366 = vmatpush1.msra.mxu1 %v2130_v22  ;;  %v3533_v51 = vld [vmem:[#allocation18_spill] sm:$0xff] }
  0x30   :  { %367 = vmatprep.subr.mxu1 %v2142_v24  ;;  %297 = vmatpush1.msra.mxu0 %v2078_v13 }
  0x31   :  { %368 = vmatpush1.msra.mxu1 %v2154_v26  ;;  %298 = vmatprep.subr.mxu0 %v2095_v16 }
  0x32   :  { %369 = vmatprep.subr.mxu1 %v2166_v28  ;;  %299 = vmatpush1.msra.mxu0 %v2107_v18 }
  0x33   :  { %370 = vmatpush1.msra.mxu1 %v2178_v30  ;;  %300 = vmatprep.subr.mxu0 %v2124_v21 }
  0x34   :  { %371 = vmatprep.subr.mxu1 %v2190_v32  ;;  %301 = vmatpush1.msra.mxu0 %v2136_v23 }
  0x35   :  { %372 = vmatpush1.msra.mxu1 %v2202_v34  ;;  %302 = vmatprep.subr.mxu0 %v2148_v25 }
  0x36   :  { %373 = vmatprep.subr.mxu1 %v2214_v36  ;;  %303 = vmatpush1.msra.mxu0 %v2160_v27 }
  0x37   :  { %374 = vmatpush1.msra.mxu1 %v2226_v38  ;;  %304 = vmatprep.subr.mxu0 %v2172_v29 }
  0x38   :  { %375 = vmatprep.subr.mxu1 %v2238_v40  ;;  %305 = vmatpush1.msra.mxu0 %v2184_v31 }
  0x39   :  { %376 = vmatpush1.msra.mxu1 %v2250_v42  ;;  %306 = vmatprep.subr.mxu0 %v2196_v33 }
  0x3a   :  { %377 = vmatprep.subr.mxu1 %v2262_v44  ;;  %307 = vmatpush1.msra.mxu0 %v2208_v35 }
  0x3b   :  { %378 = vmatpush1.msra.mxu1 %v2274_v46  ;;  %308 = vmatprep.subr.mxu0 %v2220_v37 }
  0x3c   :  { %379 = vmatprep.subr.mxu1 %v2286_v48  ;;  %309 = vmatpush1.msra.mxu0 %v2232_v39 }
  0x3d   :  { %380 = vmatpush1.msra.mxu1 %v2298_v50  ;;  %310 = vmatprep.subr.mxu0 %v2244_v41 }
  0x3e   :  { %381 = vmatprep.subr.mxu1 %v2310_v52  ;;  %311 = vmatpush1.msra.mxu0 %v2256_v43 }
  0x3f   :  { %382 = vmatpush1.msra.mxu1 %v2327_v55  ;;  %312 = vmatprep.subr.mxu0 %v2268_v45 }
  0x40   :  { %383 = vmatprep.subr.mxu1 %v2339_v57  ;;  %313 = vmatpush1.msra.mxu0 %v2280_v47 }
  0x41   :  { %384 = vmatpush1.msra.mxu1 %v2351_v59  ;;  %314 = vmatprep.subr.mxu0 %v2292_v49  ;;  %v3536_v59 = vld [vmem:[#allocation24_spill] sm:$0xff] }
  0x42   :  { %385 = vmatprep.subr.mxu1 %v2364_v61  ;;  %315 = vmatpush1.msra.mxu0 %v3532_v4 }
  0x43   :  { %386 = vmatpush1.msra.mxu1 %v2371_v62  ;;  %316 = vmatprep.subr.mxu0 %v3533_v51  ;;  %v97_v62 = vld [vmem:[%s3413_s1 + $0x10] sm:$0xff] }
  0x44   :  { %387 = vmatprep.subr.mxu1 %v2378_v63  ;;  %317 = vmatpush1.msra.mxu0 %v3534_v60 }
  0x45   :  { %388 = vmatpush1.msra.mxu1 %v2386_v56  ;;  %318 = vmatprep.subr.mxu0 %v3535_v53  ;;  %v95_v56 = vld [vmem:[%s3413_s1] sm:$0xff] }
  0x46   :  { %389 = vmatprep.subr.mxu1 %v2394_v54  ;;  %319 = vmatpush1.msra.mxu0 %v3536_v59  ;;  %v96_v54 = vld [vmem:[%s3413_s1 + $0x8] sm:$0xff] }
  0x47   :  { %352 = vmatprep.mubr.f32.mxu0 %v3528_v58  ;;  %390 = vmatpush1.msra.mxu1 %v2400_v7 }
  0x48   :  { %423 = vmatprep.mubr.f32.mxu1 %v3528_v58  ;;  %479 = vmatprep.subr.mxu0 %v2011_v0 }
  0x49   :  { %550 = vmatprep.subr.mxu1 %v2060_v10  ;;  %v98_v10 = vld [vmem:[%s3413_s1 + $0x18] sm:$0xff] }
  0xe2   :  { %v165_v60 = vpop.f32.mrf.mxu0 }
  0xe3   :  { %v241_v59 = vadd.f32 %v165_v60, %v95_v56 }
  0xe4   :  { %v167_v53 = vpop.f32.mrf.mxu0 }
  0xe5   :  { %v1659_v63 = vmul.f32 -1.442695, %v241_v59  ;;  %v242_v51 = vadd.f32 %v167_v53, %v96_v54 }
  0xe7   :  { %1733 = vpow2.f32 %v1659_v63  ;;  %v1660_v7 = vmul.f32 -1.442695, %v242_v51  ;;  %v236_v58 = vpop.f32.mrf.mxu1  ;;  %v275_v51 = vpop.permute.xlu0 %274 }
  0xe8   :  { %v243_v61 = vadd.f32 %v236_v58, %v97_v62  ;;  %vm276_vm4 = vcmp.eq.s32.totalorder %v275_v51, 1  ;;  %v279_v62 = vld [vmem:[%s3414_s2] sm:$0xff]  ;;  %v3547_v51 = vld [vmem:[#allocation27_spill] sm:$0xff] }
  0xe9   :  { %1735 = vpow2.f32 %v1660_v7  ;;  %v238_v0 = vpop.f32.mrf.mxu1 }
  0xea   :  { %v244_v4 = vadd.f32 %v238_v0, %v98_v10  ;;  %1737 = vtanh.f32 %v243_v61 }
  0xec   :  { %v1661_v49 = vmul.f32 -1.442695, %v244_v4 }
  0xee   :  { %1739 = vpow2.f32 %v1661_v49 }
  0xf4   :  { %v1734_v56 = vpop.eup %1733 }
  0xf5   :  { %v248_v60 = vadd.f32 1.0, %v1734_v56  ;;  %v3540_v56 = vld [vmem:[#allocation14_spill] sm:$0xff] }
  0xf6   :  { %v1736_v53 = vpop.eup %1735 }
  0xf7   :  { %1741 = vrcp.f32 %v248_v60  ;;  %v254_v54 = vadd.f32 1.0, %v1736_v53  ;;  %v1738_v7 = vpop.eup %1737  ;;  %v3541_v60 = vld [vmem:[#allocation23_spill] sm:$0xff] }
  0xf8   :  { %v3542_v53 = vld [vmem:[#allocation15_spill] sm:$0xff] }
  0xf9   :  { %1743 = vrcp.f32 %v254_v54  ;;  %v3543_v54 = vld [vmem:[#allocation25_spill] sm:$0xff] }
  0xfb   :  { %v1740_v59 = vpop.eup %1739 }
  0xfc   :  { %v261_v57 = vadd.f32 1.0, %v1740_v59  ;;  %v3545_v59 = vld [vmem:[#allocation26_spill] sm:$0xff] }
  0xfe   :  { %1745 = vrcp.f32 %v261_v57  ;;  %v3539_v57 = vld [vmem:[#allocation21_spill] sm:$0xff] }
 0x104   :  { %v1742_v63 = vpop.eup %1741 }
 0x105   :  { %v265_v55 = vmul.f32 %v1742_v63, %v1738_v7  ;;  %v3544_v7 = vld [vmem:[#allocation16_spill] sm:$0xff]  ;;  %v3546_v63 = vld [vmem:[#allocation18_spill] sm:$0xff] }
 0x106   :  { %v1744_v47 = vpop.eup %1743 }
 0x107   :  { %v264_v45 = vmul.f32 0.0, %v1744_v47 }
 0x109   :  { %v266_v0 = vadd.f32 %v265_v55, %v264_v45  ;;  %v3537_v45 = vld [vmem:[#allocation19_spill] sm:$0xff]  ;;  %v3538_v55 = vld [vmem:[#allocation13_spill] sm:$0xff] }
 0x10b   :  { %1747 = vtanh.f32 %v266_v0  ;;  %v2491_v10 = vsel %vm276_vm4, %v266_v0, 0.0  ;;  %v1746_v58 = vpop.eup %1745  ;;  %v3548_v0 = vld [vmem:[#allocation20_spill] sm:$0xff] }
 0x118   :  { %v1748_v61 = vpop.eup %1747 }
 0x119   :  { %v268_v49 = vmul.f32 %v1748_v61, %v1746_v58  ;;  %v3549_v58 = vld [vmem:[#allocation28_spill] sm:$0xff]  ;;  %v3550_v61 = vld [vmem:[#allocation22_spill] sm:$0xff] }
 0x11b   :  { %v2496_v4 = vsel %vm276_vm4, %v268_v49, 0.0  ;;  %1725 = vmatmul.mubr.msk.f32.vlgmr.msra.gmra.mxu0 %vm276_vm4, %v268_v49  ;;  %1726 = vmatmul.mubr.msk.f32.vlgmr.msra.gmra.mxu1 %vm276_vm4, %v268_v49  ;;  %v3551_v49 = vld [vmem:[#allocation29_spill] sm:$0xff] }
 0x11c   :  { %v281_v47 = vadd.f32 %v279_v62, %v2496_v4  ;;  %480 = vmatpush1.msra.mxu0 %v2016_v1  ;;  %551 = vmatpush1.msra.mxu1 %v2072_v12  ;;  %v3552_v62 = vld [vmem:[#allocation24_spill] sm:$0xff] }
 0x11d   :  { %481 = vmatprep.subr.mxu0 %v2021_v2  ;;  %552 = vmatprep.subr.mxu1 %v2084_v14 }
 0x11e   :  { %282 = vst [vmem:[%s3416_s4] sm:$0xff] %v281_v47  ;;  %482 = vmatpush1.msra.mxu0 %v2027_v3  ;;  %553 = vmatpush1.msra.mxu1 %v2089_v15  ;;  %v3553_v47 = vmov 0.0  }
 0x11f   :  { %483 = vmatprep.subr.mxu0 %v2034_v5  ;;  %554 = vmatprep.subr.mxu1 %v2101_v17 }
 0x120   :  { %484 = vmatpush1.msra.mxu0 %v2041_v6  ;;  %555 = vmatpush1.msra.mxu1 %v2113_v19 }
 0x121   :  { %485 = vmatprep.subr.mxu0 %v2048_v8  ;;  %556 = vmatprep.subr.mxu1 %v2118_v20 }
 0x122   :  { %486 = vmatpush1.msra.mxu0 %v2055_v9  ;;  %557 = vmatpush1.msra.mxu1 %v2130_v22 }
 0x123   :  { %487 = vmatprep.subr.mxu0 %v2066_v11  ;;  %558 = vmatprep.subr.mxu1 %v2142_v24 }
 0x124   :  { %488 = vmatpush1.msra.mxu0 %v2078_v13  ;;  %559 = vmatpush1.msra.mxu1 %v2154_v26 }
 0x125   :  { %489 = vmatprep.subr.mxu0 %v2095_v16  ;;  %560 = vmatprep.subr.mxu1 %v2166_v28 }
 0x126   :  { %490 = vmatpush1.msra.mxu0 %v2107_v18  ;;  %561 = vmatpush1.msra.mxu1 %v2178_v30 }
 0x127   :  { %491 = vmatprep.subr.mxu0 %v2124_v21  ;;  %562 = vmatprep.subr.mxu1 %v2190_v32 }
 0x128   :  { %492 = vmatpush1.msra.mxu0 %v2136_v23  ;;  %563 = vmatpush1.msra.mxu1 %v2202_v34 }
 0x129   :  { %493 = vmatprep.subr.mxu0 %v2148_v25  ;;  %564 = vmatprep.subr.mxu1 %v2214_v36 }
 0x12a   :  { %494 = vmatpush1.msra.mxu0 %v2160_v27  ;;  %565 = vmatpush1.msra.mxu1 %v2226_v38 }
 0x12b   :  { %495 = vmatprep.subr.mxu0 %v2172_v29  ;;  %566 = vmatprep.subr.mxu1 %v2238_v40 }
 0x12c   :  { %496 = vmatpush1.msra.mxu0 %v2184_v31  ;;  %567 = vmatpush1.msra.mxu1 %v2250_v42 }
 0x12d   :  { %497 = vmatprep.subr.mxu0 %v2196_v33  ;;  %568 = vmatprep.subr.mxu1 %v2262_v44 }
 0x12e   :  { %498 = vmatpush1.msra.mxu0 %v2208_v35  ;;  %569 = vmatpush1.msra.mxu1 %v2274_v46 }
 0x12f   :  { %499 = vmatprep.subr.mxu0 %v2220_v37  ;;  %570 = vmatprep.subr.mxu1 %v2286_v48 }
 0x130   :  { %500 = vmatpush1.msra.mxu0 %v2232_v39  ;;  %571 = vmatpush1.msra.mxu1 %v2298_v50 }
 0x131   :  { %501 = vmatprep.subr.mxu0 %v2244_v41  ;;  %572 = vmatprep.subr.mxu1 %v2310_v52 }
 0x132   :  { %502 = vmatpush1.msra.mxu0 %v2256_v43  ;;  %573 = vmatpush1.msra.mxu1 %v3537_v45  ;;  %v464_v45 = vpop.permute.xlu0 %463 }
 0x133   :  { %503 = vmatprep.subr.mxu0 %v3538_v55  ;;  %574 = vmatprep.subr.mxu1 %v3539_v57  ;;  %vm465_vm9 = vcmp.eq.s32.totalorder %v464_v45, 1  ;;  %v3562_v45 = vld [vmem:[#allocation21_spill] sm:$0xff] }
 0x134   :  { %504 = vmatpush1.msra.mxu0 %v3540_v56  ;;  %575 = vmatpush1.msra.mxu1 %v3541_v60  ;;  %v1664_v60 = vld [vmem:[%s3413_s1 + $0x30] sm:$0xff] }
 0x135   :  { %505 = vmatprep.subr.mxu0 %v3542_v53  ;;  %576 = vmatprep.subr.mxu1 %v3543_v54  ;;  %v3554_v54 = vld [vmem:[#allocation30_spill] sm:$0xff] }
 0x136   :  { %506 = vmatpush1.msra.mxu0 %v3544_v7  ;;  %577 = vmatpush1.msra.mxu1 %v3545_v59  ;;  %v3555_v59 = vld [vmem:[#allocation10_spill] sm:$0xff] }
 0x137   :  { %507 = vmatprep.subr.mxu0 %v3546_v63  ;;  %578 = vmatprep.subr.mxu1 %v3547_v51  ;;  %v3556_v63 = vld [vmem:[#allocation11_spill] sm:$0xff]  ;;  %v3557_v51 = vld [vmem:[#allocation17_spill] sm:$0xff] }
 0x138   :  { %508 = vmatpush1.msra.mxu0 %v3548_v0  ;;  %579 = vmatpush1.msra.mxu1 %v3549_v58  ;;  %vm651_vm5 = vcmp.gt.s32.totalorder %v3557_v51, 2  ;;  %vm842_vm6 = vcmp.gt.s32.totalorder %v3557_v51, 3  ;;  %v3558_v58 = vmov 0   ;;  %vm1224_vm7 = vcmp.gt.s32.totalorder %v3557_v51, 5 }
 0x139   :  { %509 = vmatprep.subr.mxu0 %v3550_v61  ;;  %580 = vmatprep.subr.mxu1 %v3551_v49  ;;  %v652_v61 = vsel %vm651_vm5, 1, %v3558_v58  ;;  %v843_v49 = vsel %vm842_vm6, 1, %v3558_v58  ;;  %vm1606_vm8 = vcmp.gt.s32.totalorder %v3557_v51, 7 }
 0x13a   :  { %510 = vmatpush1.msra.mxu0 %v3552_v62  ;;  %543 = vmatprep.mubr.f32.mxu0 %v3553_v47 }
 0x13b   :  { %581 = vmatpush1.msra.mxu1 %v3554_v54  ;;  %614 = vmatprep.mubr.f32.mxu1 %v3553_v47  ;;  %v1225_v54 = vsel %vm1224_vm7, 1, %v3558_v58 }
 0x13c   :  { %670 = vmatprep.subr.mxu0 %v3555_v59  ;;  %741 = vmatprep.subr.mxu1 %v3556_v63  ;;  %v1607_v59 = vsel %vm1606_vm8, 1, %v3558_v58  ;;  %v1662_v63 = vld [vmem:[%s3413_s1 + $0x20] sm:$0xff] }
 0x13d   :  { %654 = vperm.xlu1 %1732, %v652_v61   ;;  %v1663_v61 = vld [vmem:[%s3413_s1 + $0x28] sm:$0xff] }
 0x141   :  { %845 = vperm.xlu1 %1732, %v843_v49  }
 0x145   :  { %1227 = vperm.xlu1 %1732, %v1225_v54   ;;  %v1665_v54 = vld [vmem:[%s3413_s1 + $0x38] sm:$0xff] }
 0x149   :  { %1609 = vperm.xlu1 %1732, %v1607_v59  }
 0x1db   :  { %v354_v47 = vpop.f32.mrf.mxu0  ;;  %v425_v53 = vpop.f32.mrf.mxu1 }
 0x1dc   :  { %v430_v62 = vadd.f32 %v1662_v63, %v354_v47  ;;  %v432_v63 = vadd.f32 %v1664_v60, %v425_v53 }
 0x1dd   :  { %v356_v0 = vpop.f32.mrf.mxu0  ;;  %v427_v59 = vpop.f32.mrf.mxu1 }
 0x1de   :  { %v1666_v49 = vmul.f32 -1.442695, %v430_v62  ;;  %v431_v7 = vadd.f32 %v1663_v61, %v356_v0  ;;  %v433_v58 = vadd.f32 %v1665_v54, %v427_v59 }
 0x1e0   :  { %1749 = vpow2.f32 %v1666_v49  ;;  %v1667_v51 = vmul.f32 -1.442695, %v431_v7  ;;  %v1668_v56 = vmul.f32 -1.442695, %v433_v58  ;;  %v1669_v58 = vld [vmem:[%s3414_s2 + $0x8] sm:$0xff] }
 0x1e2   :  { %1751 = vpow2.f32 %v1667_v51 }
 0x1e3   :  { %1753 = vpow2.f32 %v1668_v56 }
 0x1ed   :  { %v1750_v57 = vpop.eup %1749 }
 0x1ee   :  { %v437_v47 = vadd.f32 1.0, %v1750_v57 }
 0x1ef   :  { %v1752_v62 = vpop.eup %1751 }
 0x1f0   :  { %1755 = vrcp.f32 %v437_v47  ;;  %v443_v0 = vadd.f32 1.0, %v1752_v62  ;;  %v1754_v7 = vpop.eup %1753 }
 0x1f1   :  { %1757 = vtanh.f32 %v432_v63  ;;  %v450_v55 = vadd.f32 1.0, %v1754_v7  ;;  %v3565_v7 = vld [vmem:[#allocation15_spill] sm:$0xff] }
 0x1f2   :  { %1759 = vrcp.f32 %v443_v0  ;;  %v3564_v0 = vld [vmem:[#allocation23_spill] sm:$0xff] }
 0x1f3   :  { %1761 = vrcp.f32 %v450_v55  ;;  %v3563_v55 = vld [vmem:[#allocation14_spill] sm:$0xff] }
 0x1fd   :  { %v1756_v61 = vpop.eup %1755 }
 0x1fe   :  { %v1758_v49 = vpop.eup %1757 }
 0x1ff   :  { %v1760_v51 = vpop.eup %1759  ;;  %v454_v54 = vmul.f32 %v1758_v49, %v1756_v61  ;;  %v3566_v61 = vld [vmem:[#allocation25_spill] sm:$0xff]  ;;  %v3567_v49 = vld [vmem:[#allocation16_spill] sm:$0xff] }
 0x200   :  { %v453_v59 = vmul.f32 %v1760_v51, %v2491_v10  ;;  %v1762_v56 = vpop.eup %1761  ;;  %v3568_v51 = vld [vmem:[#allocation26_spill] sm:$0xff] }
 0x202   :  { %v455_v43 = vadd.f32 %v454_v54, %v453_v59  ;;  %v3569_v54 = vld [vmem:[#allocation18_spill] sm:$0xff]  ;;  %v3570_v59 = vld [vmem:[#allocation27_spill] sm:$0xff] }
 0x204   :  { %1763 = vtanh.f32 %v455_v43  ;;  %v2590_v57 = vsel %vm465_vm9, %v455_v43, %v2491_v10  ;;  %v3559_v43 = vld [vmem:[#allocation12_spill] sm:$0xff]  ;;  %v3560_v10 = vld [vmem:[#allocation19_spill] sm:$0xff] }
 0x211   :  { %v1764_v60 = vpop.eup %1763 }
 0x212   :  { %v457_v53 = vmul.f32 %v1764_v60, %v1762_v56  ;;  %v3571_v56 = vld [vmem:[#allocation20_spill] sm:$0xff] }
 0x213   :  { %v3572_v60 = vld [vmem:[#allocation28_spill] sm:$0xff] }
 0x214   :  { %v2596_v63 = vsel %vm465_vm9, %v457_v53, %v2496_v4  ;;  %v470_v47 = vsel %vm465_vm9, %v457_v53, 0.0  ;;  %v3561_v4 = vld [vmem:[#allocation13_spill] sm:$0xff]  ;;  %v3573_v53 = vld [vmem:[#allocation22_spill] sm:$0xff] }
 0x215   :  { %v471_v62 = vadd.f32 %v1669_v58, %v470_v47  ;;  %544 = vmatmul.mubr.f32.vlgmr.msra.gmra.mxu0 %v2596_v63  ;;  %615 = vmatmul.mubr.f32.vlgmr.msra.gmra.mxu1 %v2596_v63  ;;  %v3574_v58 = vld [vmem:[#allocation29_spill] sm:$0xff]  ;;  %v3575_v47 = vld [vmem:[#allocation24_spill] sm:$0xff] }
 0x216   :  { %671 = vmatpush1.msra.mxu0 %v2016_v1  ;;  %742 = vmatpush1.msra.mxu1 %v2072_v12 }
 0x217   :  { %1670 = vst [vmem:[%s3416_s4 + $0x8] sm:$0xff] %v471_v62  ;;  %672 = vmatprep.subr.mxu0 %v2021_v2  ;;  %743 = vmatprep.subr.mxu1 %v2084_v14  ;;  %v3576_v62 = vmov 0.0  }
 0x218   :  { %673 = vmatpush1.msra.mxu0 %v2027_v3  ;;  %744 = vmatpush1.msra.mxu1 %v2089_v15 }
 0x219   :  { %674 = vmatprep.subr.mxu0 %v2034_v5  ;;  %745 = vmatprep.subr.mxu1 %v2101_v17 }
 0x21a   :  { %675 = vmatpush1.msra.mxu0 %v2041_v6  ;;  %746 = vmatpush1.msra.mxu1 %v2113_v19 }
 0x21b   :  { %676 = vmatprep.subr.mxu0 %v2048_v8  ;;  %747 = vmatprep.subr.mxu1 %v2118_v20 }
 0x21c   :  { %677 = vmatpush1.msra.mxu0 %v2055_v9  ;;  %748 = vmatpush1.msra.mxu1 %v2130_v22 }
 0x21d   :  { %678 = vmatprep.subr.mxu0 %v2066_v11  ;;  %749 = vmatprep.subr.mxu1 %v2142_v24 }
 0x21e   :  { %679 = vmatpush1.msra.mxu0 %v2078_v13  ;;  %750 = vmatpush1.msra.mxu1 %v2154_v26 }
 0x21f   :  { %680 = vmatprep.subr.mxu0 %v2095_v16  ;;  %751 = vmatprep.subr.mxu1 %v2166_v28 }
 0x220   :  { %681 = vmatpush1.msra.mxu0 %v2107_v18  ;;  %752 = vmatpush1.msra.mxu1 %v2178_v30 }
 0x221   :  { %682 = vmatprep.subr.mxu0 %v2124_v21  ;;  %753 = vmatprep.subr.mxu1 %v2190_v32 }
 0x222   :  { %683 = vmatpush1.msra.mxu0 %v2136_v23  ;;  %754 = vmatpush1.msra.mxu1 %v2202_v34 }
 0x223   :  { %684 = vmatprep.subr.mxu0 %v2148_v25  ;;  %755 = vmatprep.subr.mxu1 %v2214_v36 }
 0x224   :  { %685 = vmatpush1.msra.mxu0 %v2160_v27  ;;  %756 = vmatpush1.msra.mxu1 %v2226_v38 }
 0x225   :  { %686 = vmatprep.subr.mxu0 %v2172_v29  ;;  %757 = vmatprep.subr.mxu1 %v2238_v40 }
 0x226   :  { %687 = vmatpush1.msra.mxu0 %v2184_v31  ;;  %758 = vmatpush1.msra.mxu1 %v2250_v42 }
 0x227   :  { %688 = vmatprep.subr.mxu0 %v2196_v33  ;;  %759 = vmatprep.subr.mxu1 %v2262_v44 }
 0x228   :  { %689 = vmatpush1.msra.mxu0 %v2208_v35  ;;  %760 = vmatpush1.msra.mxu1 %v2274_v46 }
 0x229   :  { %690 = vmatprep.subr.mxu0 %v2220_v37  ;;  %761 = vmatprep.subr.mxu1 %v2286_v48 }
 0x22a   :  { %691 = vmatpush1.msra.mxu0 %v2232_v39  ;;  %762 = vmatpush1.msra.mxu1 %v2298_v50 }
 0x22b   :  { %692 = vmatprep.subr.mxu0 %v2244_v41  ;;  %763 = vmatprep.subr.mxu1 %v2310_v52 }
 0x22c   :  { %693 = vmatpush1.msra.mxu0 %v3559_v43  ;;  %764 = vmatpush1.msra.mxu1 %v3560_v10 }
 0x22d   :  { %694 = vmatprep.subr.mxu0 %v3561_v4  ;;  %765 = vmatprep.subr.mxu1 %v3562_v45 }
 0x22e   :  { %695 = vmatpush1.msra.mxu0 %v3563_v55  ;;  %766 = vmatpush1.msra.mxu1 %v3564_v0  ;;  %v1673_v0 = vld [vmem:[%s3413_s1 + $0x50] sm:$0xff] }
 0x22f   :  { %696 = vmatprep.subr.mxu0 %v3565_v7  ;;  %767 = vmatprep.subr.mxu1 %v3566_v61  ;;  %v3577_v61 = vld [vmem:[#allocation30_spill] sm:$0xff] }
 0x230   :  { %697 = vmatpush1.msra.mxu0 %v3567_v49  ;;  %768 = vmatpush1.msra.mxu1 %v3568_v51  ;;  %v3578_v51 = vld [vmem:[#allocation10_spill] sm:$0xff] }
 0x231   :  { %698 = vmatprep.subr.mxu0 %v3569_v54  ;;  %769 = vmatprep.subr.mxu1 %v3570_v59  ;;  %v3579_v54 = vld [vmem:[#allocation11_spill] sm:$0xff] }
 0x232   :  { %699 = vmatpush1.msra.mxu0 %v3571_v56  ;;  %770 = vmatpush1.msra.mxu1 %v3572_v60  ;;  %v1671_v60 = vld [vmem:[%s3413_s1 + $0x40] sm:$0xff] }
 0x233   :  { %700 = vmatprep.subr.mxu0 %v3573_v53  ;;  %771 = vmatprep.subr.mxu1 %v3574_v58  ;;  %v1672_v58 = vld [vmem:[%s3413_s1 + $0x48] sm:$0xff] }
 0x234   :  { %701 = vmatpush1.msra.mxu0 %v3575_v47  ;;  %734 = vmatprep.mubr.f32.mxu0 %v3576_v62 }
 0x235   :  { %772 = vmatpush1.msra.mxu1 %v3577_v61  ;;  %805 = vmatprep.mubr.f32.mxu1 %v3576_v62 }
 0x236   :  { %861 = vmatprep.subr.mxu0 %v3578_v51  ;;  %932 = vmatprep.subr.mxu1 %v3579_v54  ;;  %v1674_v51 = vld [vmem:[%s3413_s1 + $0x58] sm:$0xff] }
 0x2d5   :  { %v545_v56 = vpop.f32.mrf.mxu0  ;;  %v616_v61 = vpop.f32.mrf.mxu1 }
 0x2d6   :  { %v621_v47 = vadd.f32 %v1671_v60, %v545_v56  ;;  %v623_v56 = vadd.f32 %v1673_v0, %v616_v61  ;;  %v1678_v61 = vld [vmem:[%s3414_s2 + $0x10] sm:$0xff] }
 0x2d7   :  { %v547_v53 = vpop.f32.mrf.mxu0  ;;  %v618_v54 = vpop.f32.mrf.mxu1 }
 0x2d8   :  { %v1675_v59 = vmul.f32 -1.442695, %v621_v47  ;;  %v622_v49 = vadd.f32 %v1672_v58, %v547_v53  ;;  %v624_v7 = vadd.f32 %v1674_v51, %v618_v54 }
 0x2da   :  { %1765 = vpow2.f32 %v1675_v59  ;;  %v1676_v62 = vmul.f32 -1.442695, %v622_v49  ;;  %v1677_v55 = vmul.f32 -1.442695, %v624_v7 }
 0x2dc   :  { %1767 = vpow2.f32 %v1676_v62  ;;  %v655_v62 = vpop.permute.xlu1 %654 }
 0x2dd   :  { %1769 = vpow2.f32 %v1677_v55  ;;  %vm656_vm10 = vcmp.eq.s32.totalorder %v655_v62, 1  ;;  %v1687_v62 = vld [vmem:[%s3414_s2 + $0x18] sm:$0xff] }
 0x2e7   :  { %v1766_v45 = vpop.eup %1765 }
 0x2e8   :  { %v628_v60 = vadd.f32 1.0, %v1766_v45 }
 0x2e9   :  { %v1768_v47 = vpop.eup %1767 }
 0x2ea   :  { %1771 = vrcp.f32 %v628_v60  ;;  %v634_v59 = vadd.f32 1.0, %v1768_v47  ;;  %v1770_v49 = vpop.eup %1769 }
 0x2eb   :  { %1773 = vtanh.f32 %v623_v56  ;;  %v641_v51 = vadd.f32 1.0, %v1770_v49 }
 0x2ec   :  { %1775 = vrcp.f32 %v634_v59 }
 0x2ed   :  { %1777 = vrcp.f32 %v641_v51 }
 0x2f7   :  { %v1772_v53 = vpop.eup %1771 }
 0x2f8   :  { %v1774_v58 = vpop.eup %1773 }
 0x2f9   :  { %v1776_v4 = vpop.eup %1775  ;;  %v645_v10 = vmul.f32 %v1774_v58, %v1772_v53 }
 0x2fa   :  { %v644_v54 = vmul.f32 %v1776_v4, %v2590_v57  ;;  %v1778_v55 = vpop.eup %1777 }
 0x2fc   :  { %v646_v7 = vadd.f32 %v645_v10, %v644_v54 }
 0x2fe   :  { %1779 = vtanh.f32 %v646_v7  ;;  %v2683_v45 = vsel %vm656_vm10, %v646_v7, %v2590_v57 }
 0x30b   :  { %v1780_v0 = vpop.eup %1779 }
 0x30c   :  { %v648_v56 = vmul.f32 %v1780_v0, %v1778_v55  ;;  %v2805_v55 = vld [vmem:[%s3415_s3 + $0x1f0] sm:$0xff]  ;;  %v2814_v0 = vld [vmem:[%s3415_s3 + $0x1c8] sm:$0xff] }
 0x30e   :  { %v2689_v60 = vsel %vm656_vm10, %v648_v56, %v2596_v63  ;;  %v661_v47 = vsel %vm656_vm10, %v648_v56, 0.0  ;;  %v2826_v56 = vld [vmem:[%s3415_s3 + $0x1c0] sm:$0xff] }
 0x30f   :  { %v662_v4 = vadd.f32 %v1678_v61, %v661_v47  ;;  %735 = vmatmul.mubr.f32.vlgmr.msra.gmra.mxu0 %v2689_v60  ;;  %806 = vmatmul.mubr.f32.vlgmr.msra.gmra.mxu1 %v2689_v60  ;;  %v2820_v61 = vld [vmem:[%s3415_s3 + $0x1d8] sm:$0xff]  ;;  %v2838_v47 = vld [vmem:[%s3415_s3 + $0x1a8] sm:$0xff] }
 0x310   :  { %862 = vmatpush1.msra.mxu0 %v2016_v1  ;;  %933 = vmatpush1.msra.mxu1 %v2072_v12  ;;  %v3580_v1 = vld [vmem:[#allocation19_spill] sm:$0xff]  ;;  %v3588_v12 = vld [vmem:[#allocation26_spill] sm:$0xff] }
 0x311   :  { %1679 = vst [vmem:[%s3416_s4 + $0x10] sm:$0xff] %v662_v4  ;;  %863 = vmatprep.subr.mxu0 %v2021_v2  ;;  %934 = vmatprep.subr.mxu1 %v2084_v14  ;;  %v3581_v2 = vld [vmem:[#allocation13_spill] sm:$0xff]  ;;  %v3590_v14 = vld [vmem:[#allocation27_spill] sm:$0xff] }
 0x312   :  { %864 = vmatpush1.msra.mxu0 %v2027_v3  ;;  %935 = vmatpush1.msra.mxu1 %v2089_v15  ;;  %v3582_v3 = vld [vmem:[#allocation21_spill] sm:$0xff]  ;;  %v3591_v15 = vld [vmem:[#allocation20_spill] sm:$0xff]  ;;  %v2844_v4 = vld [vmem:[%s3415_s3 + $0x1b8] sm:$0xff] }
 0x313   :  { %865 = vmatprep.subr.mxu0 %v2034_v5  ;;  %936 = vmatprep.subr.mxu1 %v2101_v17  ;;  %v3583_v5 = vld [vmem:[#allocation14_spill] sm:$0xff] }
 0x314   :  { %866 = vmatpush1.msra.mxu0 %v2041_v6  ;;  %937 = vmatpush1.msra.mxu1 %v2113_v19  ;;  %v3584_v6 = vld [vmem:[#allocation23_spill] sm:$0xff]  ;;  %v3593_v17 = vld [vmem:[#allocation22_spill] sm:$0xff]  ;;  %v3595_v19 = vld [vmem:[#allocation24_spill] sm:$0xff] }
 0x315   :  { %867 = vmatprep.subr.mxu0 %v2048_v8  ;;  %938 = vmatprep.subr.mxu1 %v2118_v20  ;;  %v3585_v8 = vld [vmem:[#allocation15_spill] sm:$0xff]  ;;  %v3596_v20 = vmov 0.0  }
 0x316   :  { %868 = vmatpush1.msra.mxu0 %v2055_v9  ;;  %939 = vmatpush1.msra.mxu1 %v2130_v22  ;;  %v3586_v9 = vld [vmem:[#allocation25_spill] sm:$0xff] }
 0x317   :  { %869 = vmatprep.subr.mxu0 %v2066_v11  ;;  %940 = vmatprep.subr.mxu1 %v2142_v24  ;;  %v3587_v11 = vld [vmem:[#allocation16_spill] sm:$0xff]  ;;  %v2763_v22 = vld [vmem:[%s3415_s3 + $0x1e8] sm:$0xff] }
 0x318   :  { %870 = vmatpush1.msra.mxu0 %v2078_v13  ;;  %941 = vmatpush1.msra.mxu1 %v2154_v26  ;;  %v3589_v13 = vld [vmem:[#allocation18_spill] sm:$0xff]  ;;  %3598 = vst [vmem:[#allocation17_spill] sm:$0xff] %v2763_v22  ;;  %v1680_v24 = vld [vmem:[%s3413_s1 + $0x60] sm:$0xff]  ;;  %v1681_v26 = vld [vmem:[%s3413_s1 + $0x68] sm:$0xff] }
 0x319   :  { %871 = vmatprep.subr.mxu0 %v2095_v16  ;;  %942 = vmatprep.subr.mxu1 %v2166_v28  ;;  %v3592_v16 = vld [vmem:[#allocation28_spill] sm:$0xff] }
 0x31a   :  { %872 = vmatpush1.msra.mxu0 %v2107_v18  ;;  %943 = vmatpush1.msra.mxu1 %v2178_v30  ;;  %v3594_v18 = vld [vmem:[#allocation29_spill] sm:$0xff] }
 0x31b   :  { %873 = vmatprep.subr.mxu0 %v2124_v21  ;;  %944 = vmatprep.subr.mxu1 %v2190_v32  ;;  %v3597_v21 = vld [vmem:[#allocation30_spill] sm:$0xff] }
 0x31c   :  { %874 = vmatpush1.msra.mxu0 %v2136_v23  ;;  %945 = vmatpush1.msra.mxu1 %v2202_v34  ;;  %v2769_v23 = vld [vmem:[%s3415_s3 + $0x1f8] sm:$0xff] }
 0x31d   :  { %875 = vmatprep.subr.mxu0 %v2148_v25  ;;  %946 = vmatprep.subr.mxu1 %v2214_v36  ;;  %3599 = vst [vmem:[#allocation12_spill] sm:$0xff] %v2769_v23  ;;  %v1682_v36 = vld [vmem:[%s3413_s1 + $0x70] sm:$0xff] }
 0x31e   :  { %876 = vmatpush1.msra.mxu0 %v2160_v27  ;;  %947 = vmatpush1.msra.mxu1 %v2226_v38 }
 0x31f   :  { %877 = vmatprep.subr.mxu0 %v2172_v29  ;;  %948 = vmatprep.subr.mxu1 %v2238_v40 }
 0x320   :  { %878 = vmatpush1.msra.mxu0 %v2184_v31  ;;  %949 = vmatpush1.msra.mxu1 %v2250_v42 }
 0x321   :  { %879 = vmatprep.subr.mxu0 %v2196_v33  ;;  %950 = vmatprep.subr.mxu1 %v2262_v44  ;;  %v1683_v33 = vld [vmem:[%s3413_s1 + $0x78] sm:$0xff] }
 0x322   :  { %880 = vmatpush1.msra.mxu0 %v2208_v35  ;;  %951 = vmatpush1.msra.mxu1 %v2274_v46 }
 0x323   :  { %881 = vmatprep.subr.mxu0 %v2220_v37  ;;  %952 = vmatprep.subr.mxu1 %v2286_v48 }
 0x324   :  { %882 = vmatpush1.msra.mxu0 %v2232_v39  ;;  %953 = vmatpush1.msra.mxu1 %v2298_v50 }
 0x325   :  { %883 = vmatprep.subr.mxu0 %v2244_v41  ;;  %954 = vmatprep.subr.mxu1 %v2310_v52 }
 0x326   :  { %884 = vmatpush1.msra.mxu0 %v3559_v43  ;;  %955 = vmatpush1.msra.mxu1 %v3580_v1  ;;  %v846_v43 = vpop.permute.xlu1 %845  ;;  %v2850_v1 = vld [vmem:[%s3415_s3 + $0x1a0] sm:$0xff] }
 0x327   :  { %885 = vmatprep.subr.mxu0 %v3581_v2  ;;  %956 = vmatprep.subr.mxu1 %v3582_v3  ;;  %vm847_vm11 = vcmp.eq.s32.totalorder %v846_v43, 1  ;;  %v2856_v2 = vld [vmem:[%s3415_s3 + $0x1b0] sm:$0xff]  ;;  %v2862_v3 = vld [vmem:[%s3415_s3 + $0x188] sm:$0xff]  ;;  %v3108_v43 = vld [vmem:[%s3415_s3 + $0x58] sm:$0xff] }
 0x328   :  { %886 = vmatpush1.msra.mxu0 %v3583_v5  ;;  %957 = vmatpush1.msra.mxu1 %v3584_v6  ;;  %v2868_v5 = vld [vmem:[%s3415_s3 + $0x198] sm:$0xff]  ;;  %v2874_v6 = vld [vmem:[%s3415_s3 + $0x180] sm:$0xff]  ;;  %3607 = vst [vmem:[#allocation15_spill] sm:$0xff] %v3108_v43 }
 0x329   :  { %887 = vmatprep.subr.mxu0 %v3585_v8  ;;  %958 = vmatprep.subr.mxu1 %v3586_v9  ;;  %v2880_v8 = vld [vmem:[%s3415_s3 + $0x190] sm:$0xff]  ;;  %v2886_v9 = vld [vmem:[%s3415_s3 + $0x168] sm:$0xff] }
 0x32a   :  { %888 = vmatpush1.msra.mxu0 %v3587_v11  ;;  %959 = vmatpush1.msra.mxu1 %v3588_v12  ;;  %v2892_v11 = vld [vmem:[%s3415_s3 + $0x178] sm:$0xff]  ;;  %v2898_v12 = vld [vmem:[%s3415_s3 + $0x160] sm:$0xff] }
 0x32b   :  { %889 = vmatprep.subr.mxu0 %v3589_v13  ;;  %960 = vmatprep.subr.mxu1 %v3590_v14  ;;  %v2904_v13 = vld [vmem:[%s3415_s3 + $0x170] sm:$0xff]  ;;  %v2910_v14 = vld [vmem:[%s3415_s3 + $0x148] sm:$0xff] }
 0x32c   :  { %890 = vmatpush1.msra.mxu0 %v3591_v15  ;;  %961 = vmatpush1.msra.mxu1 %v3592_v16  ;;  %v2916_v15 = vld [vmem:[%s3415_s3 + $0x158] sm:$0xff]  ;;  %v2922_v16 = vld [vmem:[%s3415_s3 + $0x140] sm:$0xff] }
 0x32d   :  { %891 = vmatprep.subr.mxu0 %v3593_v17  ;;  %962 = vmatprep.subr.mxu1 %v3594_v18  ;;  %v2928_v17 = vld [vmem:[%s3415_s3 + $0x150] sm:$0xff]  ;;  %v2934_v18 = vld [vmem:[%s3415_s3 + $0x128] sm:$0xff] }
 0x32e   :  { %892 = vmatpush1.msra.mxu0 %v3595_v19  ;;  %925 = vmatprep.mubr.f32.mxu0 %v3596_v20  ;;  %v2940_v19 = vld [vmem:[%s3415_s3 + $0x138] sm:$0xff] }
 0x32f   :  { %963 = vmatpush1.msra.mxu1 %v3597_v21  ;;  %996 = vmatprep.mubr.f32.mxu1 %v3596_v20  ;;  %v2946_v21 = vld [vmem:[%s3415_s3 + $0x120] sm:$0xff] }
 0x330   :  { %1052 = vmatprep.subr.mxu0 %v2763_v22  ;;  %1123 = vmatprep.subr.mxu1 %v2769_v23 }
 0x3cf   :  { %v736_v25 = vpop.f32.mrf.mxu0  ;;  %v807_v31 = vpop.f32.mrf.mxu1 }
 0x3d0   :  { %v812_v27 = vadd.f32 %v1680_v24, %v736_v25  ;;  %v814_v39 = vadd.f32 %v1682_v36, %v807_v31  ;;  %v2952_v24 = vld [vmem:[%s3415_s3 + $0x130] sm:$0xff]  ;;  %v2958_v25 = vld [vmem:[%s3415_s3 + $0x108] sm:$0xff]  ;;  %v2994_v31 = vld [vmem:[%s3415_s3 + $0xe0] sm:$0xff] }
 0x3d1   :  { %v738_v28 = vpop.f32.mrf.mxu0  ;;  %v809_v34 = vpop.f32.mrf.mxu1  ;;  %v3024_v36 = vld [vmem:[%s3415_s3 + $0xd0] sm:$0xff] }
 0x3d2   :  { %v1684_v29 = vmul.f32 -1.442695, %v812_v27  ;;  %v813_v30 = vadd.f32 %v1681_v26, %v738_v28  ;;  %v815_v35 = vadd.f32 %v1683_v33, %v809_v34  ;;  %v2964_v26 = vld [vmem:[%s3415_s3 + $0x118] sm:$0xff]  ;;  %v2970_v27 = vld [vmem:[%s3415_s3 + $0x100] sm:$0xff]  ;;  %v2976_v28 = vld [vmem:[%s3415_s3 + $0x110] sm:$0xff] }
 0x3d3   :  { %v3006_v33 = vld [vmem:[%s3415_s3 + $0xc8] sm:$0xff]  ;;  %v3012_v34 = vld [vmem:[%s3415_s3 + $0xd8] sm:$0xff] }
 0x3d4   :  { %1781 = vpow2.f32 %v1684_v29  ;;  %v1685_v32 = vmul.f32 -1.442695, %v813_v30  ;;  %v1686_v37 = vmul.f32 -1.442695, %v815_v35  ;;  %v2982_v29 = vld [vmem:[%s3415_s3 + $0xe8] sm:$0xff]  ;;  %v2988_v30 = vld [vmem:[%s3415_s3 + $0xf8] sm:$0xff] }
 0x3d5   :  { %v3018_v35 = vld [vmem:[%s3415_s3 + $0xc0] sm:$0xff] }
 0x3d6   :  { %1783 = vpow2.f32 %v1685_v32  ;;  %v3000_v32 = vld [vmem:[%s3415_s3 + $0xf0] sm:$0xff] }
 0x3d7   :  { %1785 = vpow2.f32 %v1686_v37  ;;  %v3030_v37 = vld [vmem:[%s3415_s3 + $0xa8] sm:$0xff] }
 0x3e1   :  { %v1782_v38 = vpop.eup %1781 }
 0x3e2   :  { %v819_v40 = vadd.f32 1.0, %v1782_v38  ;;  %v3036_v38 = vld [vmem:[%s3415_s3 + $0xb8] sm:$0xff] }
 0x3e3   :  { %v1784_v41 = vpop.eup %1783 }
 0x3e4   :  { %1787 = vrcp.f32 %v819_v40  ;;  %v825_v42 = vadd.f32 1.0, %v1784_v41  ;;  %v1786_v44 = vpop.eup %1785  ;;  %v3048_v40 = vld [vmem:[%s3415_s3 + $0xb0] sm:$0xff]  ;;  %v3054_v41 = vld [vmem:[%s3415_s3 + $0x88] sm:$0xff] }
 0x3e5   :  { %1789 = vtanh.f32 %v814_v39  ;;  %v832_v52 = vadd.f32 1.0, %v1786_v44  ;;  %v3042_v39 = vld [vmem:[%s3415_s3 + $0xa0] sm:$0xff] }
 0x3e6   :  { %1791 = vrcp.f32 %v825_v42  ;;  %v3060_v42 = vld [vmem:[%s3415_s3 + $0x98] sm:$0xff]  ;;  %v3066_v44 = vld [vmem:[%s3415_s3 + $0x80] sm:$0xff] }
 0x3e7   :  { %1793 = vrcp.f32 %v832_v52  ;;  %3600 = vst [vmem:[#allocation10_spill] sm:$0xff] %v3066_v44  ;;  %v3090_v52 = vld [vmem:[%s3415_s3 + $0x60] sm:$0xff] }
 0x3e8   :  { %3604 = vst [vmem:[#allocation21_spill] sm:$0xff] %v3090_v52 }
 0x3f1   :  { %v1788_v46 = vpop.eup %1787 }
 0x3f2   :  { %v1790_v48 = vpop.eup %1789 }
 0x3f3   :  { %v1792_v50 = vpop.eup %1791  ;;  %v836_v57 = vmul.f32 %v1790_v48, %v1788_v46  ;;  %v3072_v46 = vld [vmem:[%s3415_s3 + $0x90] sm:$0xff]  ;;  %v3078_v48 = vld [vmem:[%s3415_s3 + $0x68] sm:$0xff] }
 0x3f4   :  { %v835_v63 = vmul.f32 %v1792_v50, %v2683_v45  ;;  %v1794_v49 = vpop.eup %1793  ;;  %3601 = vst [vmem:[#allocation11_spill] sm:$0xff] %v3072_v46  ;;  %3602 = vst [vmem:[#allocation19_spill] sm:$0xff] %v3078_v48  ;;  %v3084_v50 = vld [vmem:[%s3415_s3 + $0x78] sm:$0xff] }
 0x3f5   :  { %3603 = vst [vmem:[#allocation13_spill] sm:$0xff] %v3084_v50 }
 0x3f6   :  { %v837_v10 = vadd.f32 %v836_v57, %v835_v63  ;;  %v3096_v57 = vld [vmem:[%s3415_s3 + $0x70] sm:$0xff]  ;;  %v3102_v63 = vld [vmem:[%s3415_s3 + $0x48] sm:$0xff] }
 0x3f7   :  { %3605 = vst [vmem:[#allocation14_spill] sm:$0xff] %v3096_v57  ;;  %3606 = vst [vmem:[#allocation23_spill] sm:$0xff] %v3102_v63 }
 0x3f8   :  { %1795 = vtanh.f32 %v837_v10  ;;  %v2786_v59 = vsel %vm847_vm11, %v837_v10, %v2683_v45  ;;  %v2799_v45 = vld [vmem:[%s3415_s3 + $0x1e0] sm:$0xff] }
 0x3f9   :  { %v3114_v10 = vld [vmem:[%s3415_s3 + $0x40] sm:$0xff] }
 0x3fa   :  { %3608 = vst [vmem:[#allocation25_spill] sm:$0xff] %v3114_v10 }
 0x405   :  { %v1796_v53 = vpop.eup %1795 }
 0x406   :  { %v839_v58 = vmul.f32 %v1796_v53, %v1794_v49  ;;  %v3120_v49 = vld [vmem:[%s3415_s3 + $0x50] sm:$0xff]  ;;  %v3126_v53 = vld [vmem:[%s3415_s3 + $0x28] sm:$0xff] }
 0x407   :  { %3609 = vst [vmem:[#allocation16_spill] sm:$0xff] %v3120_v49  ;;  %3610 = vst [vmem:[#allocation26_spill] sm:$0xff] %v3126_v53 }
 0x408   :  { %v2792_v51 = vsel %vm847_vm11, %v839_v58, %v2689_v60  ;;  %v852_v54 = vsel %vm847_vm11, %v839_v58, 0.0  ;;  %v2832_v60 = vld [vmem:[%s3415_s3 + $0x1d0] sm:$0xff]  ;;  %v3132_v58 = vld [vmem:[%s3415_s3 + $0x38] sm:$0xff] }
 0x409   :  { %v853_v7 = vadd.f32 %v1687_v62, %v852_v54  ;;  %926 = vmatmul.mubr.f32.vlgmr.msra.gmra.mxu0 %v2792_v51  ;;  %997 = vmatmul.mubr.f32.vlgmr.msra.gmra.mxu1 %v2792_v51  ;;  %3611 = vst [vmem:[#allocation18_spill] sm:$0xff] %v3132_v58  ;;  %v3138_v62 = vld [vmem:[%s3415_s3 + $0x20] sm:$0xff]  ;;  %v3144_v54 = vld [vmem:[%s3415_s3 + $0x30] sm:$0xff] }
 0x40a   :  { %1053 = vmatpush1.msra.mxu0 %v2799_v45  ;;  %1124 = vmatpush1.msra.mxu1 %v2805_v55  ;;  %3612 = vst [vmem:[#allocation27_spill] sm:$0xff] %v3138_v62  ;;  %3613 = vst [vmem:[#allocation20_spill] sm:$0xff] %v3144_v54 }
 0x40b   :  { %1688 = vst [vmem:[%s3416_s4 + $0x18] sm:$0xff] %v853_v7  ;;  %1054 = vmatprep.subr.mxu0 %v2814_v0  ;;  %1125 = vmatprep.subr.mxu1 %v2820_v61  ;;  %v3150_v7 = vld [vmem:[%s3415_s3 + $0x8] sm:$0xff] }
 0x40c   :  { %1055 = vmatpush1.msra.mxu0 %v2826_v56  ;;  %1126 = vmatpush1.msra.mxu1 %v2832_v60  ;;  %3614 = vst [vmem:[#allocation28_spill] sm:$0xff] %v3150_v7 }
 0x40d   :  { %1056 = vmatprep.subr.mxu0 %v2838_v47  ;;  %1127 = vmatprep.subr.mxu1 %v2844_v4 }
 0x40e   :  { %1057 = vmatpush1.msra.mxu0 %v2850_v1  ;;  %1128 = vmatpush1.msra.mxu1 %v2856_v2 }
 0x40f   :  { %1058 = vmatprep.subr.mxu0 %v2862_v3  ;;  %1129 = vmatprep.subr.mxu1 %v2868_v5 }
 0x410   :  { %1059 = vmatpush1.msra.mxu0 %v2874_v6  ;;  %1130 = vmatpush1.msra.mxu1 %v2880_v8 }
 0x411   :  { %1060 = vmatprep.subr.mxu0 %v2886_v9  ;;  %1131 = vmatprep.subr.mxu1 %v2892_v11 }
 0x412   :  { %1061 = vmatpush1.msra.mxu0 %v2898_v12  ;;  %1132 = vmatpush1.msra.mxu1 %v2904_v13 }
 0x413   :  { %1062 = vmatprep.subr.mxu0 %v2910_v14  ;;  %1133 = vmatprep.subr.mxu1 %v2916_v15 }
 0x414   :  { %1063 = vmatpush1.msra.mxu0 %v2922_v16  ;;  %1134 = vmatpush1.msra.mxu1 %v2928_v17 }
 0x415   :  { %1064 = vmatprep.subr.mxu0 %v2934_v18  ;;  %1135 = vmatprep.subr.mxu1 %v2940_v19 }
 0x416   :  { %1065 = vmatpush1.msra.mxu0 %v2946_v21  ;;  %1136 = vmatpush1.msra.mxu1 %v2952_v24 }
 0x417   :  { %1066 = vmatprep.subr.mxu0 %v2958_v25  ;;  %1137 = vmatprep.subr.mxu1 %v2964_v26 }
 0x418   :  { %1067 = vmatpush1.msra.mxu0 %v2970_v27  ;;  %1138 = vmatpush1.msra.mxu1 %v2976_v28 }
 0x419   :  { %1068 = vmatprep.subr.mxu0 %v2982_v29  ;;  %1139 = vmatprep.subr.mxu1 %v2988_v30 }
 0x41a   :  { %1069 = vmatpush1.msra.mxu0 %v2994_v31  ;;  %1140 = vmatpush1.msra.mxu1 %v3000_v32 }
 0x41b   :  { %1070 = vmatprep.subr.mxu0 %v3006_v33  ;;  %1141 = vmatprep.subr.mxu1 %v3012_v34 }
 0x41c   :  { %1071 = vmatpush1.msra.mxu0 %v3018_v35  ;;  %1142 = vmatpush1.msra.mxu1 %v3024_v36 }
 0x41d   :  { %1072 = vmatprep.subr.mxu0 %v3030_v37  ;;  %1143 = vmatprep.subr.mxu1 %v3036_v38 }
 0x41e   :  { %1073 = vmatpush1.msra.mxu0 %v3042_v39  ;;  %1144 = vmatpush1.msra.mxu1 %v3048_v40 }
 0x41f   :  { %1074 = vmatprep.subr.mxu0 %v3054_v41  ;;  %1145 = vmatprep.subr.mxu1 %v3060_v42 }
 0x420   :  { %1075 = vmatpush1.msra.mxu0 %v3066_v44  ;;  %1146 = vmatpush1.msra.mxu1 %v3072_v46  ;;  %v1037_v46 = vpop.permute.xlu0 %1036 }
 0x421   :  { %1076 = vmatprep.subr.mxu0 %v3078_v48  ;;  %1147 = vmatprep.subr.mxu1 %v3084_v50  ;;  %vm1038_vm12 = vcmp.eq.s32.totalorder %v1037_v46, 1  ;;  %v3621_v46 = vld [vmem:[#allocation13_spill] sm:$0xff] }
 0x422   :  { %1077 = vmatpush1.msra.mxu0 %v3090_v52  ;;  %1148 = vmatpush1.msra.mxu1 %v3096_v57  ;;  %v1691_v57 = vld [vmem:[%s3413_s1 + $0x90] sm:$0xff] }
 0x423   :  { %1078 = vmatprep.subr.mxu0 %v3102_v63  ;;  %1149 = vmatprep.subr.mxu1 %v3108_v43 }
 0x424   :  { %1079 = vmatpush1.msra.mxu0 %v3114_v10  ;;  %1150 = vmatpush1.msra.mxu1 %v3120_v49 }
 0x425   :  { %1080 = vmatprep.subr.mxu0 %v3126_v53  ;;  %1151 = vmatprep.subr.mxu1 %v3132_v58  ;;  %v3156_v58 = vld [vmem:[%s3415_s3 + $0x18] sm:$0xff] }
 0x426   :  { %1081 = vmatpush1.msra.mxu0 %v3138_v62  ;;  %1152 = vmatpush1.msra.mxu1 %v3144_v54  ;;  %3615 = vst [vmem:[#allocation22_spill] sm:$0xff] %v3156_v58  ;;  %v3162_v62 = vld [vmem:[%s3415_s3] sm:$0xff]  ;;  %v1690_v54 = vld [vmem:[%s3413_s1 + $0x88] sm:$0xff] }
 0x427   :  { %1082 = vmatprep.subr.mxu0 %v3150_v7  ;;  %1153 = vmatprep.subr.mxu1 %v3156_v58  ;;  %3616 = vst [vmem:[#allocation29_spill] sm:$0xff] %v3162_v62  ;;  %v3169_v7 = vld [vmem:[%s3415_s3 + $0x10] sm:$0xff]  ;;  %v1689_v58 = vld [vmem:[%s3413_s1 + $0x80] sm:$0xff] }
 0x428   :  { %1083 = vmatpush1.msra.mxu0 %v3162_v62  ;;  %1116 = vmatprep.mubr.f32.mxu0 %v3596_v20  ;;  %3617 = vst [vmem:[#allocation24_spill] sm:$0xff] %v3169_v7 }
 0x429   :  { %1154 = vmatpush1.msra.mxu1 %v3169_v7  ;;  %1187 = vmatprep.mubr.f32.mxu1 %v3596_v20 }
 0x42a   :  { %1243 = vmatprep.subr.mxu0 %v2763_v22  ;;  %1314 = vmatprep.subr.mxu1 %v2769_v23  ;;  %v1692_v23 = vld [vmem:[%s3413_s1 + $0x98] sm:$0xff] }
 0x4c9   :  { %v927_v62 = vpop.f32.mrf.mxu0  ;;  %v998_v7 = vpop.f32.mrf.mxu1 }
 0x4ca   :  { %v1003_v53 = vadd.f32 %v1689_v58, %v927_v62  ;;  %v1005_v58 = vadd.f32 %v1691_v57, %v998_v7  ;;  %v1696_v7 = vld [vmem:[%s3414_s2 + $0x20] sm:$0xff] }
 0x4cb   :  { %v929_v49 = vpop.f32.mrf.mxu0  ;;  %v1000_v22 = vpop.f32.mrf.mxu1 }
 0x4cc   :  { %v1693_v10 = vmul.f32 -1.442695, %v1003_v53  ;;  %v1004_v43 = vadd.f32 %v1690_v54, %v929_v49  ;;  %v1006_v63 = vadd.f32 %v1692_v23, %v1000_v22 }
 0x4ce   :  { %1797 = vpow2.f32 %v1693_v10  ;;  %v1694_v20 = vmul.f32 -1.442695, %v1004_v43  ;;  %v1695_v52 = vmul.f32 -1.442695, %v1006_v63 }
 0x4d0   :  { %1799 = vpow2.f32 %v1694_v20 }
 0x4d1   :  { %1801 = vpow2.f32 %v1695_v52 }
 0x4db   :  { %v1798_v50 = vpop.eup %1797 }
 0x4dc   :  { %v1010_v62 = vadd.f32 1.0, %v1798_v50 }
 0x4dd   :  { %v1800_v53 = vpop.eup %1799 }
 0x4de   :  { %1803 = vrcp.f32 %v1010_v62  ;;  %v1016_v10 = vadd.f32 1.0, %v1800_v53  ;;  %v1802_v20 = vpop.eup %1801 }
 0x4df   :  { %1805 = vtanh.f32 %v1005_v58  ;;  %v1023_v48 = vadd.f32 1.0, %v1802_v20  ;;  %v3624_v20 = vld [vmem:[#allocation23_spill] sm:$0xff] }
 0x4e0   :  { %1807 = vrcp.f32 %v1016_v10  ;;  %v3623_v10 = vld [vmem:[#allocation14_spill] sm:$0xff] }
 0x4e1   :  { %1809 = vrcp.f32 %v1023_v48  ;;  %v3622_v48 = vld [vmem:[#allocation21_spill] sm:$0xff] }
 0x4eb   :  { %v1804_v43 = vpop.eup %1803 }
 0x4ec   :  { %v1806_v49 = vpop.eup %1805 }
 0x4ed   :  { %v1808_v54 = vpop.eup %1807  ;;  %v1027_v22 = vmul.f32 %v1806_v49, %v1804_v43  ;;  %v3625_v43 = vld [vmem:[#allocation15_spill] sm:$0xff]  ;;  %v3626_v49 = vld [vmem:[#allocation25_spill] sm:$0xff] }
 0x4ee   :  { %v1026_v23 = vmul.f32 %v1808_v54, %v2786_v59  ;;  %v1810_v52 = vpop.eup %1809  ;;  %v3627_v54 = vld [vmem:[#allocation16_spill] sm:$0xff] }
 0x4f0   :  { %v1028_v44 = vadd.f32 %v1027_v22, %v1026_v23  ;;  %v3628_v22 = vld [vmem:[#allocation26_spill] sm:$0xff] }
 0x4f1   :  { %v3629_v23 = vld [vmem:[#allocation18_spill] sm:$0xff] }
 0x4f2   :  { %1811 = vtanh.f32 %v1028_v44  ;;  %v3189_v50 = vsel %vm1038_vm12, %v1028_v44, %v2786_v59  ;;  %v3618_v59 = vld [vmem:[#allocation10_spill] sm:$0xff]  ;;  %v3620_v44 = vld [vmem:[#allocation19_spill] sm:$0xff] }
 0x4ff   :  { %v1812_v57 = vpop.eup %1811 }
 0x500   :  { %v1030_v63 = vmul.f32 %v1812_v57, %v1810_v52  ;;  %v3630_v52 = vld [vmem:[#allocation27_spill] sm:$0xff]  ;;  %v3631_v57 = vld [vmem:[#allocation20_spill] sm:$0xff] }
 0x502   :  { %v3195_v58 = vsel %vm1038_vm12, %v1030_v63, %v2792_v51  ;;  %v1043_v62 = vsel %vm1038_vm12, %v1030_v63, 0.0  ;;  %v3619_v51 = vld [vmem:[#allocation11_spill] sm:$0xff]  ;;  %v3632_v63 = vld [vmem:[#allocation28_spill] sm:$0xff] }
 0x503   :  { %v1044_v53 = vadd.f32 %v1696_v7, %v1043_v62  ;;  %1117 = vmatmul.mubr.f32.vlgmr.msra.gmra.mxu0 %v3195_v58  ;;  %1188 = vmatmul.mubr.f32.vlgmr.msra.gmra.mxu1 %v3195_v58  ;;  %v3633_v7 = vld [vmem:[#allocation22_spill] sm:$0xff]  ;;  %v3634_v62 = vld [vmem:[#allocation29_spill] sm:$0xff] }
 0x504   :  { %1244 = vmatpush1.msra.mxu0 %v2799_v45  ;;  %1315 = vmatpush1.msra.mxu1 %v2805_v55 }
 0x505   :  { %1697 = vst [vmem:[%s3416_s4 + $0x20] sm:$0xff] %v1044_v53  ;;  %1245 = vmatprep.subr.mxu0 %v2814_v0  ;;  %1316 = vmatprep.subr.mxu1 %v2820_v61  ;;  %v3635_v53 = vmov 0.0  }
 0x506   :  { %1246 = vmatpush1.msra.mxu0 %v2826_v56  ;;  %1317 = vmatpush1.msra.mxu1 %v2832_v60 }
 0x507   :  { %1247 = vmatprep.subr.mxu0 %v2838_v47  ;;  %1318 = vmatprep.subr.mxu1 %v2844_v4 }
 0x508   :  { %1248 = vmatpush1.msra.mxu0 %v2850_v1  ;;  %1319 = vmatpush1.msra.mxu1 %v2856_v2 }
 0x509   :  { %1249 = vmatprep.subr.mxu0 %v2862_v3  ;;  %1320 = vmatprep.subr.mxu1 %v2868_v5 }
 0x50a   :  { %1250 = vmatpush1.msra.mxu0 %v2874_v6  ;;  %1321 = vmatpush1.msra.mxu1 %v2880_v8 }
 0x50b   :  { %1251 = vmatprep.subr.mxu0 %v2886_v9  ;;  %1322 = vmatprep.subr.mxu1 %v2892_v11 }
 0x50c   :  { %1252 = vmatpush1.msra.mxu0 %v2898_v12  ;;  %1323 = vmatpush1.msra.mxu1 %v2904_v13 }
 0x50d   :  { %1253 = vmatprep.subr.mxu0 %v2910_v14  ;;  %1324 = vmatprep.subr.mxu1 %v2916_v15 }
 0x50e   :  { %1254 = vmatpush1.msra.mxu0 %v2922_v16  ;;  %1325 = vmatpush1.msra.mxu1 %v2928_v17 }
 0x50f   :  { %1255 = vmatprep.subr.mxu0 %v2934_v18  ;;  %1326 = vmatprep.subr.mxu1 %v2940_v19 }
 0x510   :  { %1256 = vmatpush1.msra.mxu0 %v2946_v21  ;;  %1327 = vmatpush1.msra.mxu1 %v2952_v24 }
 0x511   :  { %1257 = vmatprep.subr.mxu0 %v2958_v25  ;;  %1328 = vmatprep.subr.mxu1 %v2964_v26 }
 0x512   :  { %1258 = vmatpush1.msra.mxu0 %v2970_v27  ;;  %1329 = vmatpush1.msra.mxu1 %v2976_v28 }
 0x513   :  { %1259 = vmatprep.subr.mxu0 %v2982_v29  ;;  %1330 = vmatprep.subr.mxu1 %v2988_v30 }
 0x514   :  { %1260 = vmatpush1.msra.mxu0 %v2994_v31  ;;  %1331 = vmatpush1.msra.mxu1 %v3000_v32 }
 0x515   :  { %1261 = vmatprep.subr.mxu0 %v3006_v33  ;;  %1332 = vmatprep.subr.mxu1 %v3012_v34 }
 0x516   :  { %1262 = vmatpush1.msra.mxu0 %v3018_v35  ;;  %1333 = vmatpush1.msra.mxu1 %v3024_v36 }
 0x517   :  { %1263 = vmatprep.subr.mxu0 %v3030_v37  ;;  %1334 = vmatprep.subr.mxu1 %v3036_v38 }
 0x518   :  { %1264 = vmatpush1.msra.mxu0 %v3042_v39  ;;  %1335 = vmatpush1.msra.mxu1 %v3048_v40 }
 0x519   :  { %1265 = vmatprep.subr.mxu0 %v3054_v41  ;;  %1336 = vmatprep.subr.mxu1 %v3060_v42 }
 0x51a   :  { %1266 = vmatpush1.msra.mxu0 %v3618_v59  ;;  %1337 = vmatpush1.msra.mxu1 %v3619_v51  ;;  %v1228_v51 = vpop.permute.xlu1 %1227 }
 0x51b   :  { %1267 = vmatprep.subr.mxu0 %v3620_v44  ;;  %1338 = vmatprep.subr.mxu1 %v3621_v46  ;;  %vm1229_vm13 = vcmp.eq.s32.totalorder %v1228_v51, 1 }
 0x51c   :  { %1268 = vmatpush1.msra.mxu0 %v3622_v48  ;;  %1339 = vmatpush1.msra.mxu1 %v3623_v10  ;;  %v1700_v10 = vld [vmem:[%s3413_s1 + $0xb0] sm:$0xff] }
 0x51d   :  { %1269 = vmatprep.subr.mxu0 %v3624_v20  ;;  %1340 = vmatprep.subr.mxu1 %v3625_v43  ;;  %v3636_v43 = vld [vmem:[#allocation24_spill] sm:$0xff] }
 0x51e   :  { %1270 = vmatpush1.msra.mxu0 %v3626_v49  ;;  %1341 = vmatpush1.msra.mxu1 %v3627_v54  ;;  %v3637_v54 = vld [vmem:[#allocation17_spill] sm:$0xff] }
 0x51f   :  { %1271 = vmatprep.subr.mxu0 %v3628_v22  ;;  %1342 = vmatprep.subr.mxu1 %v3629_v23  ;;  %v3638_v22 = vld [vmem:[#allocation12_spill] sm:$0xff] }
 0x520   :  { %1272 = vmatpush1.msra.mxu0 %v3630_v52  ;;  %1343 = vmatpush1.msra.mxu1 %v3631_v57  ;;  %v1698_v57 = vld [vmem:[%s3413_s1 + $0xa0] sm:$0xff] }
 0x521   :  { %1273 = vmatprep.subr.mxu0 %v3632_v63  ;;  %1344 = vmatprep.subr.mxu1 %v3633_v7  ;;  %v1699_v7 = vld [vmem:[%s3413_s1 + $0xa8] sm:$0xff] }
 0x522   :  { %1274 = vmatpush1.msra.mxu0 %v3634_v62  ;;  %1307 = vmatprep.mubr.f32.mxu0 %v3635_v53 }
 0x523   :  { %1345 = vmatpush1.msra.mxu1 %v3636_v43  ;;  %1378 = vmatprep.mubr.f32.mxu1 %v3635_v53 }
 0x524   :  { %1434 = vmatprep.subr.mxu0 %v3637_v54  ;;  %1505 = vmatprep.subr.mxu1 %v3638_v22  ;;  %v1701_v54 = vld [vmem:[%s3413_s1 + $0xb8] sm:$0xff] }
 0x5c3   :  { %v1118_v52 = vpop.f32.mrf.mxu0  ;;  %v1189_v43 = vpop.f32.mrf.mxu1 }
 0x5c4   :  { %v1194_v62 = vadd.f32 %v1698_v57, %v1118_v52  ;;  %v1196_v52 = vadd.f32 %v1700_v10, %v1189_v43  ;;  %v1705_v43 = vld [vmem:[%s3414_s2 + $0x28] sm:$0xff] }
 0x5c5   :  { %v1120_v63 = vpop.f32.mrf.mxu0  ;;  %v1191_v22 = vpop.f32.mrf.mxu1 }
 0x5c6   :  { %v1702_v23 = vmul.f32 -1.442695, %v1194_v62  ;;  %v1195_v49 = vadd.f32 %v1699_v7, %v1120_v63  ;;  %v1197_v20 = vadd.f32 %v1701_v54, %v1191_v22 }
 0x5c8   :  { %1813 = vpow2.f32 %v1702_v23  ;;  %v1703_v53 = vmul.f32 -1.442695, %v1195_v49  ;;  %v1704_v48 = vmul.f32 -1.442695, %v1197_v20 }
 0x5ca   :  { %1815 = vpow2.f32 %v1703_v53 }
 0x5cb   :  { %1817 = vpow2.f32 %v1704_v48 }
 0x5d5   :  { %v1814_v46 = vpop.eup %1813 }
 0x5d6   :  { %v1201_v57 = vadd.f32 1.0, %v1814_v46 }
 0x5d7   :  { %v1816_v62 = vpop.eup %1815 }
 0x5d8   :  { %1819 = vrcp.f32 %v1201_v57  ;;  %v1207_v23 = vadd.f32 1.0, %v1816_v62  ;;  %v1818_v49 = vpop.eup %1817 }
 0x5d9   :  { %1821 = vtanh.f32 %v1196_v52  ;;  %v1214_v44 = vadd.f32 1.0, %v1818_v49 }
 0x5da   :  { %1823 = vrcp.f32 %v1207_v23 }
 0x5db   :  { %1825 = vrcp.f32 %v1214_v44 }
 0x5e5   :  { %v1820_v63 = vpop.eup %1819 }
 0x5e6   :  { %v1822_v7 = vpop.eup %1821 }
 0x5e7   :  { %v1824_v53 = vpop.eup %1823  ;;  %v1218_v54 = vmul.f32 %v1822_v7, %v1820_v63  ;;  %v1714_v63 = vld [vmem:[%s3414_s2 + $0x30] sm:$0xff] }
 0x5e8   :  { %v1217_v22 = vmul.f32 %v1824_v53, %v3189_v50  ;;  %v1826_v48 = vpop.eup %1825 }
 0x5ea   :  { %v1219_v59 = vadd.f32 %v1218_v54, %v1217_v22  ;;  %v1716_v22 = vld [vmem:[%s3413_s1 + $0xe0] sm:$0xff] }
 0x5ec   :  { %1827 = vtanh.f32 %v1219_v59  ;;  %v3282_v46 = vsel %vm1229_vm13, %v1219_v59, %v3189_v50 }
 0x5f9   :  { %v1828_v10 = vpop.eup %1827 }
 0x5fa   :  { %v1221_v20 = vmul.f32 %v1828_v10, %v1826_v48  ;;  %v1717_v48 = vld [vmem:[%s3413_s1 + $0xe8] sm:$0xff] }
 0x5fc   :  { %v3288_v52 = vsel %vm1229_vm13, %v1221_v20, %v3195_v58  ;;  %v1234_v57 = vsel %vm1229_vm13, %v1221_v20, 0.0 }
 0x5fd   :  { %v1235_v62 = vadd.f32 %v1705_v43, %v1234_v57  ;;  %1308 = vmatmul.mubr.f32.vlgmr.msra.gmra.mxu0 %v3288_v52  ;;  %1379 = vmatmul.mubr.f32.vlgmr.msra.gmra.mxu1 %v3288_v52 }
 0x5fe   :  { %1435 = vmatpush1.msra.mxu0 %v2799_v45  ;;  %1506 = vmatpush1.msra.mxu1 %v2805_v55  ;;  %v3639_v45 = vld [vmem:[#allocation10_spill] sm:$0xff]  ;;  %v3640_v55 = vld [vmem:[#allocation11_spill] sm:$0xff] }
 0x5ff   :  { %1706 = vst [vmem:[%s3416_s4 + $0x28] sm:$0xff] %v1235_v62  ;;  %1436 = vmatprep.subr.mxu0 %v2814_v0  ;;  %1507 = vmatprep.subr.mxu1 %v2820_v61  ;;  %v3641_v0 = vld [vmem:[#allocation19_spill] sm:$0xff]  ;;  %v3642_v61 = vld [vmem:[#allocation13_spill] sm:$0xff] }
 0x600   :  { %1437 = vmatpush1.msra.mxu0 %v2826_v56  ;;  %1508 = vmatpush1.msra.mxu1 %v2832_v60  ;;  %v3643_v56 = vld [vmem:[#allocation21_spill] sm:$0xff]  ;;  %v3644_v60 = vld [vmem:[#allocation14_spill] sm:$0xff] }
 0x601   :  { %1438 = vmatprep.subr.mxu0 %v2838_v47  ;;  %1509 = vmatprep.subr.mxu1 %v2844_v4  ;;  %v3645_v47 = vld [vmem:[#allocation23_spill] sm:$0xff] }
 0x602   :  { %1439 = vmatpush1.msra.mxu0 %v2850_v1  ;;  %1510 = vmatpush1.msra.mxu1 %v2856_v2  ;;  %v3646_v4 = vld [vmem:[#allocation15_spill] sm:$0xff]  ;;  %v3647_v1 = vld [vmem:[#allocation25_spill] sm:$0xff]  ;;  %v3648_v2 = vld [vmem:[#allocation16_spill] sm:$0xff] }
 0x603   :  { %1440 = vmatprep.subr.mxu0 %v2862_v3  ;;  %1511 = vmatprep.subr.mxu1 %v2868_v5  ;;  %v3649_v3 = vld [vmem:[#allocation26_spill] sm:$0xff] }
 0x604   :  { %1441 = vmatpush1.msra.mxu0 %v2874_v6  ;;  %1512 = vmatpush1.msra.mxu1 %v2880_v8  ;;  %v3650_v5 = vld [vmem:[#allocation18_spill] sm:$0xff]  ;;  %v3651_v6 = vld [vmem:[#allocation27_spill] sm:$0xff]  ;;  %v3652_v8 = vld [vmem:[#allocation20_spill] sm:$0xff] }
 0x605   :  { %1442 = vmatprep.subr.mxu0 %v2886_v9  ;;  %1513 = vmatprep.subr.mxu1 %v2892_v11  ;;  %v3653_v9 = vld [vmem:[#allocation28_spill] sm:$0xff]  ;;  %v3654_v11 = vld [vmem:[#allocation22_spill] sm:$0xff] }
 0x606   :  { %1443 = vmatpush1.msra.mxu0 %v2898_v12  ;;  %1514 = vmatpush1.msra.mxu1 %v2904_v13  ;;  %v3655_v12 = vld [vmem:[#allocation29_spill] sm:$0xff]  ;;  %v3656_v13 = vmov 0.0  }
 0x607   :  { %1444 = vmatprep.subr.mxu0 %v2910_v14  ;;  %1515 = vmatprep.subr.mxu1 %v2916_v15  ;;  %v3657_v14 = vld [vmem:[#allocation24_spill] sm:$0xff] }
 0x608   :  { %1445 = vmatpush1.msra.mxu0 %v2922_v16  ;;  %1516 = vmatpush1.msra.mxu1 %v2928_v17  ;;  %v1707_v15 = vld [vmem:[%s3413_s1 + $0xc0] sm:$0xff]  ;;  %v1708_v17 = vld [vmem:[%s3413_s1 + $0xc8] sm:$0xff] }
 0x609   :  { %1446 = vmatprep.subr.mxu0 %v2934_v18  ;;  %1517 = vmatprep.subr.mxu1 %v2940_v19 }
 0x60a   :  { %1447 = vmatpush1.msra.mxu0 %v2946_v21  ;;  %1518 = vmatpush1.msra.mxu1 %v2952_v24 }
 0x60b   :  { %1448 = vmatprep.subr.mxu0 %v2958_v25  ;;  %1519 = vmatprep.subr.mxu1 %v2964_v26 }
 0x60c   :  { %1449 = vmatpush1.msra.mxu0 %v2970_v27  ;;  %1520 = vmatpush1.msra.mxu1 %v2976_v28  ;;  %v1710_v27 = vld [vmem:[%s3413_s1 + $0xd8] sm:$0xff] }
 0x60d   :  { %1450 = vmatprep.subr.mxu0 %v2982_v29  ;;  %1521 = vmatprep.subr.mxu1 %v2988_v30  ;;  %v1709_v30 = vld [vmem:[%s3413_s1 + $0xd0] sm:$0xff] }
 0x60e   :  { %1451 = vmatpush1.msra.mxu0 %v2994_v31  ;;  %1522 = vmatpush1.msra.mxu1 %v3000_v32 }
 0x60f   :  { %1452 = vmatprep.subr.mxu0 %v3006_v33  ;;  %1523 = vmatprep.subr.mxu1 %v3012_v34 }
 0x610   :  { %1453 = vmatpush1.msra.mxu0 %v3018_v35  ;;  %1524 = vmatpush1.msra.mxu1 %v3024_v36 }
 0x611   :  { %1454 = vmatprep.subr.mxu0 %v3030_v37  ;;  %1525 = vmatprep.subr.mxu1 %v3036_v38 }
 0x612   :  { %1455 = vmatpush1.msra.mxu0 %v3042_v39  ;;  %1526 = vmatpush1.msra.mxu1 %v3048_v40 }
 0x613   :  { %1456 = vmatprep.subr.mxu0 %v3054_v41  ;;  %1527 = vmatprep.subr.mxu1 %v3060_v42  ;;  %v1419_v42 = vpop.permute.xlu0 %1418 }
 0x614   :  { %1457 = vmatpush1.msra.mxu0 %v3639_v45  ;;  %1528 = vmatpush1.msra.mxu1 %v3640_v55  ;;  %vm1420_vm14 = vcmp.eq.s32.totalorder %v1419_v42, 1  ;;  %v1719_v45 = vld [vmem:[%s3413_s1 + $0xf8] sm:$0xff] }
 0x615   :  { %1458 = vmatprep.subr.mxu0 %v3641_v0  ;;  %1529 = vmatprep.subr.mxu1 %v3642_v61  ;;  %v1718_v61 = vld [vmem:[%s3413_s1 + $0xf0] sm:$0xff]  ;;  %s1645_s1 = sshll.u32 %s1971_s23, 4  ;;  %s1646_s1 = int_to_ptr.vmem [resolvable:$true] %s1645_s1 }
 0x616   :  { %1459 = vmatpush1.msra.mxu0 %v3643_v56  ;;  %1530 = vmatpush1.msra.mxu1 %v3644_v60  ;;  %s1925_s24 = scalar_lea.vmem %s1646_s1, 128  ;;  %p1930_p1 = scmp.lt.s32.totalorder %s1646_s1, %s1646_s1 }
 0x617   :  { %1460 = vmatprep.subr.mxu0 %v3645_v47  ;;  %1531 = vmatprep.subr.mxu1 %v3646_v4  ;;  %p1926_p0 = scmp.ne.s32.totalorder %s1646_s1, %s1925_s24  ;;  %p1931_p2 = scmp.lt.s32.totalorder %s1925_s24, %s1925_s24 }
 0x618   :  { %1461 = vmatpush1.msra.mxu0 %v3647_v1  ;;  %1532 = vmatpush1.msra.mxu1 %v3648_v2 }
 0x619   :  { %1462 = vmatprep.subr.mxu0 %v3649_v3  ;;  %1533 = vmatprep.subr.mxu1 %v3650_v5  ;;  %p1932_p3 = por %p1931_p2, %p1930_p1 }
 0x61a   :  { %1463 = vmatpush1.msra.mxu0 %v3651_v6  ;;  %1534 = vmatpush1.msra.mxu1 %v3652_v8 }
 0x61b   :  { %1464 = vmatprep.subr.mxu0 %v3653_v9  ;;  %1535 = vmatprep.subr.mxu1 %v3654_v11  ;;  %v1610_v11 = vpop.permute.xlu1 %1609  ;;  %p1933_p4 = pnand %p1932_p3, %p1926_p0 }
 0x61c   :  { %1465 = vmatpush1.msra.mxu0 %v3655_v12  ;;  %1498 = vmatprep.mubr.f32.mxu0 %v3656_v13  ;;  %vm1611_vm15 = vcmp.eq.s32.totalorder %v1610_v11, 1 }
 0x61d   :  { %1536 = vmatpush1.msra.mxu1 %v3657_v14  ;;  %1569 = vmatprep.mubr.f32.mxu1 %v3656_v13 }
 0x6bd   :  { %v1309_v16 = vpop.f32.mrf.mxu0  ;;  %v1380_v25 = vpop.f32.mrf.mxu1 }
 0x6be   :  { %v1385_v18 = vadd.f32 %v1707_v15, %v1309_v16  ;;  %v1387_v33 = vadd.f32 %v1709_v30, %v1380_v25 }
 0x6bf   :  { %v1311_v19 = vpop.f32.mrf.mxu0  ;;  %v1382_v28 = vpop.f32.mrf.mxu1 }
 0x6c0   :  { %v1711_v21 = vmul.f32 -1.442695, %v1385_v18  ;;  %v1386_v24 = vadd.f32 %v1708_v17, %v1311_v19  ;;  %v1388_v29 = vadd.f32 %v1710_v27, %v1382_v28 }
 0x6c2   :  { %1829 = vpow2.f32 %v1711_v21  ;;  %v1712_v26 = vmul.f32 -1.442695, %v1386_v24  ;;  %v1713_v31 = vmul.f32 -1.442695, %v1388_v29 }
 0x6c4   :  { %1831 = vpow2.f32 %v1712_v26 }
 0x6c5   :  { %1833 = vpow2.f32 %v1713_v31 }
 0x6cf   :  { %v1830_v32 = vpop.eup %1829 }
 0x6d0   :  { %v1392_v34 = vadd.f32 1.0, %v1830_v32 }
 0x6d1   :  { %v1832_v35 = vpop.eup %1831 }
 0x6d2   :  { %1835 = vrcp.f32 %v1392_v34  ;;  %v1398_v36 = vadd.f32 1.0, %v1832_v35  ;;  %v1834_v37 = vpop.eup %1833 }
 0x6d3   :  { %1837 = vtanh.f32 %v1387_v33  ;;  %v1405_v41 = vadd.f32 1.0, %v1834_v37 }
 0x6d4   :  { %1839 = vrcp.f32 %v1398_v36 }
 0x6d5   :  { %1841 = vrcp.f32 %v1405_v41 }
 0x6df   :  { %v1836_v38 = vpop.eup %1835 }
 0x6e0   :  { %v1838_v39 = vpop.eup %1837 }
 0x6e1   :  { %v1840_v40 = vpop.eup %1839  ;;  %v1409_v50 = vmul.f32 %v1838_v39, %v1836_v38 }
 0x6e2   :  { %v1408_v58 = vmul.f32 %v1840_v40, %v3282_v46  ;;  %v1842_v44 = vpop.eup %1841 }
 0x6e4   :  { %v1410_v59 = vadd.f32 %v1409_v50, %v1408_v58 }
 0x6e6   :  { %1843 = vtanh.f32 %v1410_v59  ;;  %v1422_v51 = vsel %vm1420_vm14, %v1410_v59, %v3282_v46 }
 0x6f3   :  { %v1844_v23 = vpop.eup %1843 }
 0x6f4   :  { %v1412_v49 = vmul.f32 %v1844_v23, %v1842_v44 }
 0x6f6   :  { %v3377_v7 = vsel %vm1420_vm14, %v1412_v49, %v3288_v52  ;;  %v1425_v53 = vsel %vm1420_vm14, %v1412_v49, 0.0 }
 0x6f7   :  { %v1426_v54 = vadd.f32 %v1714_v63, %v1425_v53  ;;  %1499 = vmatmul.mubr.f32.vlgmr.msra.gmra.mxu0 %v3377_v7  ;;  %1570 = vmatmul.mubr.f32.vlgmr.msra.gmra.mxu1 %v3377_v7 }
 0x6f9   :  { %1715 = vst [vmem:[%s3416_s4 + $0x30] sm:$0xff] %v1426_v54 }
 0x7b7   :  { %v1500_v46 = vpop.f32.mrf.mxu0  ;;  %v1571_v57 = vpop.f32.mrf.mxu1 }
 0x7b8   :  { %v1576_v10 = vadd.f32 %v1716_v22, %v1500_v46  ;;  %v1578_v47 = vadd.f32 %v1718_v61, %v1571_v57 }
 0x7b9   :  { %v1502_v20 = vpop.f32.mrf.mxu0  ;;  %v1573_v55 = vpop.f32.mrf.mxu1 }
 0x7ba   :  { %v1720_v43 = vmul.f32 -1.442695, %v1576_v10  ;;  %v1577_v52 = vadd.f32 %v1717_v48, %v1502_v20  ;;  %v1579_v0 = vadd.f32 %v1719_v45, %v1573_v55 }
 0x7bc   :  { %1845 = vpow2.f32 %v1720_v43  ;;  %v1721_v62 = vmul.f32 -1.442695, %v1577_v52  ;;  %v1722_v56 = vmul.f32 -1.442695, %v1579_v0 }
 0x7be   :  { %1847 = vpow2.f32 %v1721_v62 }
 0x7bf   :  { %1849 = vpow2.f32 %v1722_v56 }
 0x7c9   :  { %v1846_v60 = vpop.eup %1845 }
 0x7ca   :  { %v1583_v4 = vadd.f32 1.0, %v1846_v60 }
 0x7cb   :  { %v1848_v1 = vpop.eup %1847 }
 0x7cc   :  { %1851 = vrcp.f32 %v1583_v4  ;;  %v1589_v2 = vadd.f32 1.0, %v1848_v1  ;;  %v1850_v3 = vpop.eup %1849 }
 0x7cd   :  { %1853 = vtanh.f32 %v1578_v47  ;;  %v1596_v9 = vadd.f32 1.0, %v1850_v3 }
 0x7ce   :  { %1855 = vrcp.f32 %v1589_v2 }
 0x7cf   :  { %1857 = vrcp.f32 %v1596_v9 }
 0x7d9   :  { %v1852_v5 = vpop.eup %1851 }
 0x7da   :  { %v1854_v6 = vpop.eup %1853 }
 0x7db   :  { %v1856_v8 = vpop.eup %1855  ;;  %v1600_v12 = vmul.f32 %v1854_v6, %v1852_v5 }
 0x7dc   :  { %v1599_v13 = vmul.f32 %v1856_v8, %v1422_v51 }
 0x7de   :  { %v1601_v14 = vadd.f32 %v1600_v12, %v1599_v13 }
 0x7e0   :  { %1859 = vtanh.f32 %v1601_v14  ;;  %v1613_v15 = vsel %vm1611_vm15, %v1601_v14, %v1422_v51 }
 0x7e1   :  { %1626 = vst [vmem:[#allocation6] sm:$0xff] %v1613_v15 }
 0x7e2   :  { %1936 = shalt.err (!%p1933_p4)
}
 0x7e3   :  { %1648 = dma.vmem_to_hbm [thread:$0]  %s1646_s1, 128, %s3418_s6, [#allocation7]   ;;  %v1858_v16 = vpop.eup %1857  ;;  %v1723_v19 = vld [vmem:[%s3414_s2 + $0x38] sm:$0xff] }
 0x7e4   :  { %s1972_s27 = smov [#allocation4]  }
 0x7e5   :  { %s1635_s28 = sshll.u32 %s1972_s27, 4  ;;  %s1636_s28 = int_to_ptr.vmem [resolvable:$true] %s1635_s28 }
 0x7e6   :  { %s1945_s7 = scalar_lea.vmem %s1636_s28, 128  ;;  %p1950_p6 = scmp.lt.s32.totalorder %s1636_s28, %s1636_s28 }
 0x7e7   :  { %p1946_p5 = scmp.ne.s32.totalorder %s1636_s28, %s1945_s7  ;;  %p1951_p7 = scmp.lt.s32.totalorder %s1945_s7, %s1945_s7 }
 0x7e9   :  { %p1952_p8 = por %p1951_p7, %p1950_p6 }
 0x7eb   :  { %p1953_p9 = pnand %p1952_p8, %p1946_p5 }
 0x7ed   :  { %v1860_v17 = vpop.eup %1859 }
 0x7ee   :  { %v1603_v18 = vmul.f32 %v1860_v17, %v1858_v16 }
 0x7f0   :  { %v1612_v21 = vsel %vm1611_vm15, %v1603_v18, %v3377_v7  ;;  %v1616_v24 = vsel %vm1611_vm15, %v1603_v18, 0.0 }
 0x7f1   :  { %v1617_v25 = vadd.f32 %v1723_v19, %v1616_v24  ;;  %1625 = vst [vmem:[#allocation4] sm:$0xff] %v1612_v21 }
 0x7f2   :  { %1956 = shalt.err (!%p1953_p9)
}
 0x7f3   :  { %1638 = dma.vmem_to_hbm [thread:$0]  %s1636_s28, 128, %s3417_s5, [#allocation5]   ;;  %1724 = vst [vmem:[%s3416_s4 + $0x38] sm:$0xff] %v1617_v25 }
 0x7f4   :  { %1965 = dma.done.wait [#allocation5], 128  }
 0x7f5   :  { %1966 = vsyncadd [#allocation5], 4294967168 }
 0x7f6   :  { %1967 = dma.done.wait [#allocation7], 128  }
 0x7f7   :  { %1968 = vsyncadd [#allocation7], 4294967168 }
 0x7f8   :  { %1657 = vsyncpa [#allocation5], 1 }
 0x7f9   :  { %1658 = vsyncpa [#allocation7], 1 }

// kernel: rnn_model_forward.16
= control target key start
LH: loop header
LB: loop body
LE: loop exit
PB: predicated region body
PF: predicated region fallthrough
CT: control target
= control target key end

     0   :  { %v3341_v3 = vmov 0.0   ;;  %v3349_v5 = vmov 0   ;;  %s3334_s3 = inlined_call_operand.vmem [shape: f32[128,512], index: 3, kind: input, shape index: {}]   ;;  %s3335_s0 = inlined_call_operand.vmem [shape: s32[8,1], index: 0, kind: input, shape index: {}]   ;;  %s3336_s1 = inlined_call_operand.vmem [shape: f32[8,8,512], index: 1, kind: input, shape index: {}]   ;;  %s3337_s2 = inlined_call_operand.vmem [shape: f32[8,8,128], index: 2, kind: input, shape index: {}]   ;;  %s3338_s4 = inlined_call_operand.vmem [shape: f32[8,8,128], index: 4, kind: output, shape index: {0}]   ;;  %s3339_s6 = inlined_call_operand.vmem [shape: f32[1,8,128], index: 6, kind: output, shape index: {2}]   ;;  %s3340_s5 = inlined_call_operand.vmem [shape: f32[1,8,128], index: 5, kind: output, shape index: {1}]  }
   0x1   :  { %v1941_v0 = vld [vmem:[%s3334_s3 + $0x1e8] sm:$0xff]  ;;  %v1946_v1 = vld [vmem:[%s3334_s3 + $0x1e0] sm:$0xff]  ;;  %161 = vmatprep.mubr.f32.mxu0 %v3341_v3  ;;  %232 = vmatprep.mubr.f32.mxu1 %v3341_v3  ;;  %v1990_v10 = vld [vmem:[%s3334_s3 + $0x1f8] sm:$0xff] }
   0x2   :  { %3431 = vst [vmem:[#allocation4_spill] sm:$0xff] %v1941_v0  ;;  %v1951_v2 = vld [vmem:[%s3334_s3 + $0x1c8] sm:$0xff]  ;;  %97 = vmatprep.subr.mxu0 %v1941_v0  ;;  %v1959_v4 = vld [vmem:[%s3334_s3 + $0x1c0] sm:$0xff]  ;;  %1707 = vset.pattern.permute.xlu0 %v3349_v5  ;;  %3432 = vst [vmem:[#allocation5_spill] sm:$0xff] %v1990_v10 }
   0x3   :  { %98 = vmatpush1.msra.mxu0 %v1946_v1  ;;  %v1966_v6 = vld [vmem:[%s3334_s3 + $0x1a8] sm:$0xff]  ;;  %1708 = vset.pattern.permute.xlu1 %v3349_v5  ;;  %v1973_v7 = vld [vmem:[%s3334_s3 + $0x1a0] sm:$0xff]  ;;  %v2002_v12 = vld [vmem:[%s3334_s3 + $0x1f0] sm:$0xff] }
   0x4   :  { %99 = vmatprep.subr.mxu0 %v1951_v2  ;;  %v1979_v8 = vld [vmem:[%s3334_s3 + $0x188] sm:$0xff]  ;;  %v1985_v9 = vld [vmem:[%s3334_s3 + $0x180] sm:$0xff]  ;;  %168 = vmatprep.subr.mxu1 %v1990_v10  ;;  %v2014_v14 = vld [vmem:[%s3334_s3 + $0x1d8] sm:$0xff] }
   0x5   :  { %100 = vmatpush1.msra.mxu0 %v1959_v4  ;;  %v1996_v11 = vld [vmem:[%s3334_s3 + $0x168] sm:$0xff]  ;;  %v2008_v13 = vld [vmem:[%s3334_s3 + $0x160] sm:$0xff]  ;;  %169 = vmatpush1.msra.mxu1 %v2002_v12  ;;  %v2019_v15 = vld [vmem:[%s3334_s3 + $0x1d0] sm:$0xff] }
   0x6   :  { %101 = vmatprep.subr.mxu0 %v1966_v6  ;;  %v2025_v16 = vld [vmem:[%s3334_s3 + $0x148] sm:$0xff]  ;;  %170 = vmatprep.subr.mxu1 %v2014_v14  ;;  %v2031_v17 = vld [vmem:[%s3334_s3 + $0x1b8] sm:$0xff]  ;;  %v2037_v18 = vld [vmem:[%s3334_s3 + $0x140] sm:$0xff] }
   0x7   :  { %102 = vmatpush1.msra.mxu0 %v1973_v7  ;;  %171 = vmatpush1.msra.mxu1 %v2019_v15  ;;  %v2043_v19 = vld [vmem:[%s3334_s3 + $0x1b0] sm:$0xff]  ;;  %v2048_v20 = vld [vmem:[%s3334_s3 + $0x198] sm:$0xff]  ;;  %v2054_v21 = vld [vmem:[%s3334_s3 + $0x128] sm:$0xff] }
   0x8   :  { %103 = vmatprep.subr.mxu0 %v1979_v8  ;;  %172 = vmatprep.subr.mxu1 %v2031_v17  ;;  %v2060_v22 = vld [vmem:[%s3334_s3 + $0x190] sm:$0xff]  ;;  %v2066_v23 = vld [vmem:[%s3334_s3 + $0x120] sm:$0xff]  ;;  %v2072_v24 = vld [vmem:[%s3334_s3 + $0x178] sm:$0xff] }
   0x9   :  { %104 = vmatpush1.msra.mxu0 %v1985_v9  ;;  %173 = vmatpush1.msra.mxu1 %v2043_v19  ;;  %v2078_v25 = vld [vmem:[%s3334_s3 + $0x108] sm:$0xff]  ;;  %v2084_v26 = vld [vmem:[%s3334_s3 + $0x170] sm:$0xff]  ;;  %v2090_v27 = vld [vmem:[%s3334_s3 + $0x100] sm:$0xff] }
   0xa   :  { %105 = vmatprep.subr.mxu0 %v1996_v11  ;;  %174 = vmatprep.subr.mxu1 %v2048_v20  ;;  %v2096_v28 = vld [vmem:[%s3334_s3 + $0x158] sm:$0xff]  ;;  %v2102_v29 = vld [vmem:[%s3334_s3 + $0xe8] sm:$0xff]  ;;  %v2108_v30 = vld [vmem:[%s3334_s3 + $0x150] sm:$0xff] }
   0xb   :  { %106 = vmatpush1.msra.mxu0 %v2008_v13  ;;  %175 = vmatpush1.msra.mxu1 %v2060_v22  ;;  %v2114_v31 = vld [vmem:[%s3334_s3 + $0xe0] sm:$0xff]  ;;  %v2120_v32 = vld [vmem:[%s3334_s3 + $0x138] sm:$0xff]  ;;  %v2126_v33 = vld [vmem:[%s3334_s3 + $0xc8] sm:$0xff] }
   0xc   :  { %107 = vmatprep.subr.mxu0 %v2025_v16  ;;  %176 = vmatprep.subr.mxu1 %v2072_v24  ;;  %v2132_v34 = vld [vmem:[%s3334_s3 + $0x130] sm:$0xff]  ;;  %v2138_v35 = vld [vmem:[%s3334_s3 + $0xc0] sm:$0xff]  ;;  %v2144_v36 = vld [vmem:[%s3334_s3 + $0x118] sm:$0xff] }
   0xd   :  { %108 = vmatpush1.msra.mxu0 %v2037_v18  ;;  %177 = vmatpush1.msra.mxu1 %v2084_v26  ;;  %v2150_v37 = vld [vmem:[%s3334_s3 + $0xa8] sm:$0xff]  ;;  %v2156_v38 = vld [vmem:[%s3334_s3 + $0x110] sm:$0xff]  ;;  %v2162_v39 = vld [vmem:[%s3334_s3 + $0xa0] sm:$0xff] }
   0xe   :  { %109 = vmatprep.subr.mxu0 %v2054_v21  ;;  %178 = vmatprep.subr.mxu1 %v2096_v28  ;;  %v2168_v40 = vld [vmem:[%s3334_s3 + $0xf8] sm:$0xff]  ;;  %v2174_v41 = vld [vmem:[%s3334_s3 + $0x88] sm:$0xff]  ;;  %v2180_v42 = vld [vmem:[%s3334_s3 + $0xf0] sm:$0xff] }
   0xf   :  { %110 = vmatpush1.msra.mxu0 %v2066_v23  ;;  %179 = vmatpush1.msra.mxu1 %v2108_v30  ;;  %v2186_v43 = vld [vmem:[%s3334_s3 + $0x80] sm:$0xff]  ;;  %v2192_v44 = vld [vmem:[%s3334_s3 + $0xd8] sm:$0xff]  ;;  %v2198_v45 = vld [vmem:[%s3334_s3 + $0x68] sm:$0xff] }
  0x10   :  { %111 = vmatprep.subr.mxu0 %v2078_v25  ;;  %180 = vmatprep.subr.mxu1 %v2120_v32  ;;  %3433 = vst [vmem:[#allocation6_spill] sm:$0xff] %v2186_v43  ;;  %3434 = vst [vmem:[#allocation7_spill] sm:$0xff] %v2198_v45  ;;  %v2204_v46 = vld [vmem:[%s3334_s3 + $0xd0] sm:$0xff]  ;;  %v2210_v47 = vld [vmem:[%s3334_s3 + $0x60] sm:$0xff] }
  0x11   :  { %112 = vmatpush1.msra.mxu0 %v2090_v27  ;;  %181 = vmatpush1.msra.mxu1 %v2132_v34  ;;  %3435 = vst [vmem:[#allocation8_spill] sm:$0xff] %v2210_v47  ;;  %v2216_v48 = vld [vmem:[%s3334_s3 + $0xb8] sm:$0xff]  ;;  %v2222_v49 = vld [vmem:[%s3334_s3 + $0x48] sm:$0xff]  ;;  %v2228_v50 = vld [vmem:[%s3334_s3 + $0xb0] sm:$0xff] }
  0x12   :  { %113 = vmatprep.subr.mxu0 %v2102_v29  ;;  %182 = vmatprep.subr.mxu1 %v2144_v36  ;;  %3436 = vst [vmem:[#allocation9_spill] sm:$0xff] %v2222_v49  ;;  %v2234_v51 = vld [vmem:[%s3334_s3 + $0x40] sm:$0xff]  ;;  %v2240_v52 = vld [vmem:[%s3334_s3 + $0x98] sm:$0xff]  ;;  %v2251_v54 = vld [vmem:[%s3334_s3 + $0x28] sm:$0xff] }
  0x13   :  { %114 = vmatpush1.msra.mxu0 %v2114_v31  ;;  %183 = vmatpush1.msra.mxu1 %v2156_v38  ;;  %3437 = vst [vmem:[#allocation10_spill] sm:$0xff] %v2234_v51  ;;  %v2245_v53 = vld [vmem:[%s3335_s0] sm:$0xff]  ;;  %3439 = vst [vmem:[#allocation12_spill] sm:$0xff] %v2251_v54  ;;  %v2257_v55 = vld [vmem:[%s3334_s3 + $0x90] sm:$0xff] }
  0x14   :  { %115 = vmatprep.subr.mxu0 %v2126_v33  ;;  %184 = vmatprep.subr.mxu1 %v2168_v40  ;;  %3438 = vst [vmem:[#allocation11_spill] sm:$0xff] %v2245_v53  ;;  %3440 = vst [vmem:[#allocation13_spill] sm:$0xff] %v2257_v55  ;;  %v2263_v56 = vld [vmem:[%s3334_s3 + $0x20] sm:$0xff]  ;;  %v2269_v57 = vld [vmem:[%s3334_s3 + $0x78] sm:$0xff]  ;;  %vm269_vm0 = vcmp.gt.s32.totalorder %v2245_v53, 0  ;;  %vm458_vm1 = vcmp.gt.s32.totalorder %v2245_v53, 1 }
  0x15   :  { %116 = vmatpush1.msra.mxu0 %v2138_v35  ;;  %185 = vmatpush1.msra.mxu1 %v2180_v42  ;;  %3441 = vst [vmem:[#allocation14_spill] sm:$0xff] %v2263_v56  ;;  %3442 = vst [vmem:[#allocation15_spill] sm:$0xff] %v2269_v57  ;;  %v2275_v58 = vld [vmem:[%s3334_s3 + $0x8] sm:$0xff]  ;;  %v2281_v59 = vld [vmem:[%s3334_s3 + $0x70] sm:$0xff]  ;;  %v270_v3 = vsel %vm269_vm0, 1, %v3349_v5  ;;  %vm1031_vm2 = vcmp.gt.s32.totalorder %v2245_v53, 4 }
  0x16   :  { %117 = vmatprep.subr.mxu0 %v2150_v37  ;;  %186 = vmatprep.subr.mxu1 %v2192_v44  ;;  %3443 = vst [vmem:[#allocation16_spill] sm:$0xff] %v2275_v58  ;;  %3444 = vst [vmem:[#allocation17_spill] sm:$0xff] %v2281_v59  ;;  %v2288_v60 = vld [vmem:[%s3334_s3] sm:$0xff]  ;;  %v2294_v61 = vld [vmem:[%s3334_s3 + $0x58] sm:$0xff]  ;;  %vm1413_vm3 = vcmp.gt.s32.totalorder %v2245_v53, 6 }
  0x17   :  { %118 = vmatpush1.msra.mxu0 %v2162_v39  ;;  %187 = vmatpush1.msra.mxu1 %v2204_v46  ;;  %3445 = vst [vmem:[#allocation18_spill] sm:$0xff] %v2288_v60  ;;  %3446 = vst [vmem:[#allocation19_spill] sm:$0xff] %v2294_v61  ;;  %v2301_v62 = vld [vmem:[%s3334_s3 + $0x50] sm:$0xff]  ;;  %v2308_v63 = vld [vmem:[%s3334_s3 + $0x38] sm:$0xff] }
  0x18   :  { %119 = vmatprep.subr.mxu0 %v2174_v41  ;;  %188 = vmatprep.subr.mxu1 %v2216_v48  ;;  %3447 = vst [vmem:[#allocation20_spill] sm:$0xff] %v2301_v62  ;;  %3448 = vst [vmem:[#allocation21_spill] sm:$0xff] %v2308_v63  ;;  %v2330_v5 = vld [vmem:[%s3334_s3 + $0x10] sm:$0xff] }
  0x19   :  { %120 = vmatpush1.msra.mxu0 %v2186_v43  ;;  %189 = vmatpush1.msra.mxu1 %v2228_v50  ;;  %3452 = vst [vmem:[#allocation24_spill] sm:$0xff] %v2330_v5 }
  0x1a   :  { %121 = vmatprep.subr.mxu0 %v2198_v45  ;;  %190 = vmatprep.subr.mxu1 %v2240_v52 }
  0x1b   :  { %122 = vmatpush1.msra.mxu0 %v2210_v47  ;;  %191 = vmatpush1.msra.mxu1 %v2257_v55 }
  0x1c   :  { %123 = vmatprep.subr.mxu0 %v2222_v49  ;;  %192 = vmatprep.subr.mxu1 %v2269_v57 }
  0x1d   :  { %124 = vmatpush1.msra.mxu0 %v2234_v51  ;;  %193 = vmatpush1.msra.mxu1 %v2281_v59  ;;  %v3457_v53 = vld [vmem:[#allocation16_spill] sm:$0xff] }
  0x1e   :  { %125 = vmatprep.subr.mxu0 %v2251_v54  ;;  %194 = vmatprep.subr.mxu1 %v2294_v61  ;;  %v2324_v54 = vld [vmem:[%s3334_s3 + $0x18] sm:$0xff] }
  0x1f   :  { %126 = vmatpush1.msra.mxu0 %v2263_v56  ;;  %v2316_v56 = vld [vmem:[%s3334_s3 + $0x30] sm:$0xff]  ;;  %195 = vmatpush1.msra.mxu1 %v2301_v62  ;;  %3451 = vst [vmem:[#allocation23_spill] sm:$0xff] %v2324_v54 }
  0x20   :  { %127 = vmatprep.subr.mxu0 %v2275_v58  ;;  %3449 = vst [vmem:[#allocation22_spill] sm:$0xff] %v2316_v56  ;;  %v3450_v58 = vmov 0.0   ;;  %196 = vmatprep.subr.mxu1 %v2308_v63 }
  0x21   :  { %128 = vmatpush1.msra.mxu0 %v2288_v60  ;;  %272 = vperm.xlu0 %1707, %v270_v3   ;;  %v3453_v60 = vmov 0  }
  0x22   :  { %162 = vmatmul.mubr.f32.vlgmr.msra.gmra.mxu0 %v3450_v58  ;;  %197 = vmatpush1.msra.mxu1 %v2316_v56  ;;  %v459_v51 = vsel %vm458_vm1, 1, %v3453_v60  ;;  %v1032_v3 = vsel %vm1031_vm2, 1, %v3453_v60 }
  0x23   :  { %286 = vmatprep.subr.mxu0 %v1941_v0  ;;  %198 = vmatprep.subr.mxu1 %v2324_v54 }
  0x24   :  { %287 = vmatpush1.msra.mxu0 %v1946_v1  ;;  %199 = vmatpush1.msra.mxu1 %v2330_v5 }
  0x25   :  { %288 = vmatprep.subr.mxu0 %v1951_v2  ;;  %233 = vmatmul.mubr.f32.vlgmr.msra.gmra.mxu1 %v3450_v58 }
  0x26   :  { %461 = vperm.xlu0 %1707, %v459_v51   ;;  %357 = vmatprep.subr.mxu1 %v1990_v10  ;;  %v1414_v51 = vsel %vm1413_vm3, 1, %v3453_v60  ;;  %v3456_v60 = vld [vmem:[#allocation14_spill] sm:$0xff] }
  0x27   :  { %289 = vmatpush1.msra.mxu0 %v1959_v4  ;;  %358 = vmatpush1.msra.mxu1 %v2002_v12 }
  0x28   :  { %290 = vmatprep.subr.mxu0 %v1966_v6  ;;  %359 = vmatprep.subr.mxu1 %v2014_v14 }
  0x29   :  { %291 = vmatpush1.msra.mxu0 %v1973_v7  ;;  %360 = vmatpush1.msra.mxu1 %v2019_v15 }
  0x2a   :  { %1034 = vperm.xlu0 %1707, %v1032_v3   ;;  %361 = vmatprep.subr.mxu1 %v2031_v17  ;;  %v3454_v3 = vld [vmem:[#allocation10_spill] sm:$0xff] }
  0x2b   :  { %292 = vmatprep.subr.mxu0 %v1979_v8  ;;  %362 = vmatpush1.msra.mxu1 %v2043_v19 }
  0x2c   :  { %293 = vmatpush1.msra.mxu0 %v1985_v9  ;;  %363 = vmatprep.subr.mxu1 %v2048_v20 }
  0x2d   :  { %294 = vmatprep.subr.mxu0 %v1996_v11  ;;  %364 = vmatpush1.msra.mxu1 %v2060_v22 }
  0x2e   :  { %1416 = vperm.xlu0 %1707, %v1414_v51   ;;  %365 = vmatprep.subr.mxu1 %v2072_v24  ;;  %v3455_v51 = vld [vmem:[#allocation12_spill] sm:$0xff] }
  0x2f   :  { %295 = vmatpush1.msra.mxu0 %v2008_v13  ;;  %366 = vmatpush1.msra.mxu1 %v2084_v26 }
  0x30   :  { %296 = vmatprep.subr.mxu0 %v2025_v16  ;;  %367 = vmatprep.subr.mxu1 %v2096_v28 }
  0x31   :  { %297 = vmatpush1.msra.mxu0 %v2037_v18  ;;  %368 = vmatpush1.msra.mxu1 %v2108_v30 }
  0x32   :  { %298 = vmatprep.subr.mxu0 %v2054_v21  ;;  %369 = vmatprep.subr.mxu1 %v2120_v32 }
  0x33   :  { %299 = vmatpush1.msra.mxu0 %v2066_v23  ;;  %370 = vmatpush1.msra.mxu1 %v2132_v34 }
  0x34   :  { %300 = vmatprep.subr.mxu0 %v2078_v25  ;;  %371 = vmatprep.subr.mxu1 %v2144_v36 }
  0x35   :  { %301 = vmatpush1.msra.mxu0 %v2090_v27  ;;  %372 = vmatpush1.msra.mxu1 %v2156_v38 }
  0x36   :  { %302 = vmatprep.subr.mxu0 %v2102_v29  ;;  %373 = vmatprep.subr.mxu1 %v2168_v40 }
  0x37   :  { %303 = vmatpush1.msra.mxu0 %v2114_v31  ;;  %374 = vmatpush1.msra.mxu1 %v2180_v42 }
  0x38   :  { %304 = vmatprep.subr.mxu0 %v2126_v33  ;;  %375 = vmatprep.subr.mxu1 %v2192_v44 }
  0x39   :  { %305 = vmatpush1.msra.mxu0 %v2138_v35  ;;  %376 = vmatpush1.msra.mxu1 %v2204_v46 }
  0x3a   :  { %306 = vmatprep.subr.mxu0 %v2150_v37  ;;  %377 = vmatprep.subr.mxu1 %v2216_v48 }
  0x3b   :  { %307 = vmatpush1.msra.mxu0 %v2162_v39  ;;  %378 = vmatpush1.msra.mxu1 %v2228_v50 }
  0x3c   :  { %308 = vmatprep.subr.mxu0 %v2174_v41  ;;  %379 = vmatprep.subr.mxu1 %v2240_v52 }
  0x3d   :  { %309 = vmatpush1.msra.mxu0 %v2186_v43  ;;  %380 = vmatpush1.msra.mxu1 %v2257_v55 }
  0x3e   :  { %310 = vmatprep.subr.mxu0 %v2198_v45  ;;  %381 = vmatprep.subr.mxu1 %v2269_v57 }
  0x3f   :  { %311 = vmatpush1.msra.mxu0 %v2210_v47  ;;  %382 = vmatpush1.msra.mxu1 %v2281_v59  ;;  %v3458_v59 = vld [vmem:[#allocation18_spill] sm:$0xff] }
  0x40   :  { %312 = vmatprep.subr.mxu0 %v2222_v49  ;;  %383 = vmatprep.subr.mxu1 %v2294_v61 }
  0x41   :  { %313 = vmatpush1.msra.mxu0 %v3454_v3  ;;  %384 = vmatpush1.msra.mxu1 %v2301_v62  ;;  %v95_v62 = vld [vmem:[%s3336_s1 + $0x10] sm:$0xff] }
  0x42   :  { %314 = vmatprep.subr.mxu0 %v3455_v51  ;;  %385 = vmatprep.subr.mxu1 %v2308_v63 }
  0x43   :  { %315 = vmatpush1.msra.mxu0 %v3456_v60  ;;  %386 = vmatpush1.msra.mxu1 %v2316_v56  ;;  %v93_v56 = vld [vmem:[%s3336_s1] sm:$0xff] }
  0x44   :  { %316 = vmatprep.subr.mxu0 %v3457_v53  ;;  %387 = vmatprep.subr.mxu1 %v2324_v54  ;;  %v94_v54 = vld [vmem:[%s3336_s1 + $0x8] sm:$0xff] }
  0x45   :  { %317 = vmatpush1.msra.mxu0 %v3458_v59  ;;  %350 = vmatprep.mubr.f32.mxu0 %v3450_v58 }
  0x46   :  { %388 = vmatpush1.msra.mxu1 %v2330_v5  ;;  %421 = vmatprep.mubr.f32.mxu1 %v3450_v58 }
  0x47   :  { %477 = vmatprep.subr.mxu0 %v1941_v0  ;;  %548 = vmatprep.subr.mxu1 %v1990_v10  ;;  %v96_v10 = vld [vmem:[%s3336_s1 + $0x18] sm:$0xff] }
  0xe2   :  { %v163_v60 = vpop.f32.mrf.mxu0 }
  0xe3   :  { %v239_v59 = vadd.f32 %v163_v60, %v93_v56 }
  0xe4   :  { %v165_v53 = vpop.f32.mrf.mxu0 }
  0xe5   :  { %v1637_v63 = vmul.f32 -1.442695, %v239_v59  ;;  %v240_v51 = vadd.f32 %v165_v53, %v94_v54  ;;  %v234_v58 = vpop.f32.mrf.mxu1 }
  0xe6   :  { %v241_v61 = vadd.f32 %v234_v58, %v95_v62  ;;  %v277_v62 = vld [vmem:[%s3337_s2] sm:$0xff] }
  0xe7   :  { %1709 = vpow2.f32 %v1637_v63  ;;  %v1638_v5 = vmul.f32 -1.442695, %v240_v51  ;;  %v236_v0 = vpop.f32.mrf.mxu1  ;;  %v273_v51 = vpop.permute.xlu0 %272 }
  0xe8   :  { %v242_v3 = vadd.f32 %v236_v0, %v96_v10  ;;  %vm274_vm4 = vcmp.eq.s32.totalorder %v273_v51, 1  ;;  %v3469_v51 = vld [vmem:[#allocation21_spill] sm:$0xff] }
  0xe9   :  { %1711 = vpow2.f32 %v1638_v5 }
  0xea   :  { %v1639_v49 = vmul.f32 -1.442695, %v242_v3  ;;  %1713 = vtanh.f32 %v241_v61 }
  0xec   :  { %1715 = vpow2.f32 %v1639_v49 }
  0xf4   :  { %v1710_v56 = vpop.eup %1709 }
  0xf5   :  { %v246_v60 = vadd.f32 1.0, %v1710_v56  ;;  %v3462_v56 = vld [vmem:[#allocation8_spill] sm:$0xff] }
  0xf6   :  { %v1712_v53 = vpop.eup %1711 }
  0xf7   :  { %1717 = vrcp.f32 %v246_v60  ;;  %v252_v54 = vadd.f32 1.0, %v1712_v53  ;;  %v1714_v5 = vpop.eup %1713  ;;  %v3463_v60 = vld [vmem:[#allocation17_spill] sm:$0xff] }
  0xf8   :  { %v3464_v53 = vld [vmem:[#allocation9_spill] sm:$0xff] }
  0xf9   :  { %1719 = vrcp.f32 %v252_v54  ;;  %v1716_v59 = vpop.eup %1715  ;;  %v3465_v54 = vld [vmem:[#allocation19_spill] sm:$0xff] }
  0xfa   :  { %v259_v57 = vadd.f32 1.0, %v1716_v59  ;;  %v3467_v59 = vld [vmem:[#allocation20_spill] sm:$0xff] }
  0xfc   :  { %1721 = vrcp.f32 %v259_v57  ;;  %v3461_v57 = vld [vmem:[#allocation15_spill] sm:$0xff] }
 0x104   :  { %v1718_v63 = vpop.eup %1717 }
 0x105   :  { %v263_v55 = vmul.f32 %v1718_v63, %v1714_v5  ;;  %v3466_v5 = vld [vmem:[#allocation10_spill] sm:$0xff]  ;;  %v3468_v63 = vld [vmem:[#allocation12_spill] sm:$0xff] }
 0x106   :  { %v1720_v47 = vpop.eup %1719 }
 0x107   :  { %v262_v45 = vmul.f32 0.0, %v1720_v47 }
 0x109   :  { %v264_v0 = vadd.f32 %v263_v55, %v262_v45  ;;  %v1722_v58 = vpop.eup %1721  ;;  %v3459_v45 = vld [vmem:[#allocation13_spill] sm:$0xff]  ;;  %v3460_v55 = vld [vmem:[#allocation7_spill] sm:$0xff] }
 0x10b   :  { %1723 = vtanh.f32 %v264_v0  ;;  %v2421_v10 = vsel %vm274_vm4, %v264_v0, 0.0  ;;  %v3470_v0 = vld [vmem:[#allocation14_spill] sm:$0xff] }
 0x118   :  { %v1724_v61 = vpop.eup %1723 }
 0x119   :  { %v266_v49 = vmul.f32 %v1724_v61, %v1722_v58  ;;  %v3471_v58 = vld [vmem:[#allocation22_spill] sm:$0xff]  ;;  %v3472_v61 = vld [vmem:[#allocation16_spill] sm:$0xff] }
 0x11b   :  { %v2426_v3 = vsel %vm274_vm4, %v266_v49, 0.0  ;;  %1703 = vmatmul.mubr.msk.f32.vlgmr.msra.gmra.mxu0 %vm274_vm4, %v266_v49  ;;  %1704 = vmatmul.mubr.msk.f32.vlgmr.msra.gmra.mxu1 %vm274_vm4, %v266_v49  ;;  %v3473_v49 = vld [vmem:[#allocation23_spill] sm:$0xff] }
 0x11c   :  { %v279_v47 = vadd.f32 %v277_v62, %v2426_v3  ;;  %478 = vmatpush1.msra.mxu0 %v1946_v1  ;;  %549 = vmatpush1.msra.mxu1 %v2002_v12  ;;  %v3474_v62 = vld [vmem:[#allocation18_spill] sm:$0xff] }
 0x11d   :  { %479 = vmatprep.subr.mxu0 %v1951_v2  ;;  %550 = vmatprep.subr.mxu1 %v2014_v14 }
 0x11e   :  { %280 = vst [vmem:[%s3338_s4] sm:$0xff] %v279_v47  ;;  %480 = vmatpush1.msra.mxu0 %v1959_v4  ;;  %551 = vmatpush1.msra.mxu1 %v2019_v15  ;;  %v3475_v47 = vmov 0.0  }
 0x11f   :  { %481 = vmatprep.subr.mxu0 %v1966_v6  ;;  %552 = vmatprep.subr.mxu1 %v2031_v17 }
 0x120   :  { %482 = vmatpush1.msra.mxu0 %v1973_v7  ;;  %553 = vmatpush1.msra.mxu1 %v2043_v19 }
 0x121   :  { %483 = vmatprep.subr.mxu0 %v1979_v8  ;;  %554 = vmatprep.subr.mxu1 %v2048_v20 }
 0x122   :  { %484 = vmatpush1.msra.mxu0 %v1985_v9  ;;  %555 = vmatpush1.msra.mxu1 %v2060_v22 }
 0x123   :  { %485 = vmatprep.subr.mxu0 %v1996_v11  ;;  %556 = vmatprep.subr.mxu1 %v2072_v24 }
 0x124   :  { %486 = vmatpush1.msra.mxu0 %v2008_v13  ;;  %557 = vmatpush1.msra.mxu1 %v2084_v26 }
 0x125   :  { %487 = vmatprep.subr.mxu0 %v2025_v16  ;;  %558 = vmatprep.subr.mxu1 %v2096_v28 }
 0x126   :  { %488 = vmatpush1.msra.mxu0 %v2037_v18  ;;  %559 = vmatpush1.msra.mxu1 %v2108_v30 }
 0x127   :  { %489 = vmatprep.subr.mxu0 %v2054_v21  ;;  %560 = vmatprep.subr.mxu1 %v2120_v32 }
 0x128   :  { %490 = vmatpush1.msra.mxu0 %v2066_v23  ;;  %561 = vmatpush1.msra.mxu1 %v2132_v34 }
 0x129   :  { %491 = vmatprep.subr.mxu0 %v2078_v25  ;;  %562 = vmatprep.subr.mxu1 %v2144_v36 }
 0x12a   :  { %492 = vmatpush1.msra.mxu0 %v2090_v27  ;;  %563 = vmatpush1.msra.mxu1 %v2156_v38 }
 0x12b   :  { %493 = vmatprep.subr.mxu0 %v2102_v29  ;;  %564 = vmatprep.subr.mxu1 %v2168_v40 }
 0x12c   :  { %494 = vmatpush1.msra.mxu0 %v2114_v31  ;;  %565 = vmatpush1.msra.mxu1 %v2180_v42 }
 0x12d   :  { %495 = vmatprep.subr.mxu0 %v2126_v33  ;;  %566 = vmatprep.subr.mxu1 %v2192_v44 }
 0x12e   :  { %496 = vmatpush1.msra.mxu0 %v2138_v35  ;;  %567 = vmatpush1.msra.mxu1 %v2204_v46 }
 0x12f   :  { %497 = vmatprep.subr.mxu0 %v2150_v37  ;;  %568 = vmatprep.subr.mxu1 %v2216_v48 }
 0x130   :  { %498 = vmatpush1.msra.mxu0 %v2162_v39  ;;  %569 = vmatpush1.msra.mxu1 %v2228_v50 }
 0x131   :  { %499 = vmatprep.subr.mxu0 %v2174_v41  ;;  %570 = vmatprep.subr.mxu1 %v2240_v52 }
 0x132   :  { %500 = vmatpush1.msra.mxu0 %v2186_v43  ;;  %571 = vmatpush1.msra.mxu1 %v3459_v45  ;;  %v462_v45 = vpop.permute.xlu0 %461 }
 0x133   :  { %501 = vmatprep.subr.mxu0 %v3460_v55  ;;  %572 = vmatprep.subr.mxu1 %v3461_v57  ;;  %vm463_vm9 = vcmp.eq.s32.totalorder %v462_v45, 1  ;;  %v3484_v45 = vld [vmem:[#allocation15_spill] sm:$0xff] }
 0x134   :  { %502 = vmatpush1.msra.mxu0 %v3462_v56  ;;  %573 = vmatpush1.msra.mxu1 %v3463_v60  ;;  %v1642_v60 = vld [vmem:[%s3336_s1 + $0x30] sm:$0xff] }
 0x135   :  { %503 = vmatprep.subr.mxu0 %v3464_v53  ;;  %574 = vmatprep.subr.mxu1 %v3465_v54  ;;  %v3476_v54 = vld [vmem:[#allocation24_spill] sm:$0xff] }
 0x136   :  { %504 = vmatpush1.msra.mxu0 %v3466_v5  ;;  %575 = vmatpush1.msra.mxu1 %v3467_v59  ;;  %v3477_v59 = vld [vmem:[#allocation4_spill] sm:$0xff] }
 0x137   :  { %505 = vmatprep.subr.mxu0 %v3468_v63  ;;  %576 = vmatprep.subr.mxu1 %v3469_v51  ;;  %v3478_v63 = vld [vmem:[#allocation5_spill] sm:$0xff]  ;;  %v3479_v51 = vld [vmem:[#allocation11_spill] sm:$0xff] }
 0x138   :  { %506 = vmatpush1.msra.mxu0 %v3470_v0  ;;  %577 = vmatpush1.msra.mxu1 %v3471_v58  ;;  %vm649_vm5 = vcmp.gt.s32.totalorder %v3479_v51, 2  ;;  %vm840_vm6 = vcmp.gt.s32.totalorder %v3479_v51, 3  ;;  %v3480_v58 = vmov 0   ;;  %vm1222_vm7 = vcmp.gt.s32.totalorder %v3479_v51, 5 }
 0x139   :  { %507 = vmatprep.subr.mxu0 %v3472_v61  ;;  %578 = vmatprep.subr.mxu1 %v3473_v49  ;;  %v650_v61 = vsel %vm649_vm5, 1, %v3480_v58  ;;  %v841_v49 = vsel %vm840_vm6, 1, %v3480_v58  ;;  %vm1604_vm8 = vcmp.gt.s32.totalorder %v3479_v51, 7 }
 0x13a   :  { %508 = vmatpush1.msra.mxu0 %v3474_v62  ;;  %541 = vmatprep.mubr.f32.mxu0 %v3475_v47 }
 0x13b   :  { %579 = vmatpush1.msra.mxu1 %v3476_v54  ;;  %612 = vmatprep.mubr.f32.mxu1 %v3475_v47  ;;  %v1223_v54 = vsel %vm1222_vm7, 1, %v3480_v58 }
 0x13c   :  { %668 = vmatprep.subr.mxu0 %v3477_v59  ;;  %739 = vmatprep.subr.mxu1 %v3478_v63  ;;  %v1605_v59 = vsel %vm1604_vm8, 1, %v3480_v58  ;;  %v1640_v63 = vld [vmem:[%s3336_s1 + $0x20] sm:$0xff] }
 0x13d   :  { %652 = vperm.xlu1 %1708, %v650_v61   ;;  %v1641_v61 = vld [vmem:[%s3336_s1 + $0x28] sm:$0xff] }
 0x141   :  { %843 = vperm.xlu1 %1708, %v841_v49  }
 0x145   :  { %1225 = vperm.xlu1 %1708, %v1223_v54   ;;  %v1643_v54 = vld [vmem:[%s3336_s1 + $0x38] sm:$0xff] }
 0x149   :  { %1607 = vperm.xlu1 %1708, %v1605_v59  }
 0x1db   :  { %v352_v47 = vpop.f32.mrf.mxu0  ;;  %v423_v53 = vpop.f32.mrf.mxu1 }
 0x1dc   :  { %v428_v62 = vadd.f32 %v1640_v63, %v352_v47  ;;  %v430_v63 = vadd.f32 %v1642_v60, %v423_v53 }
 0x1dd   :  { %v354_v0 = vpop.f32.mrf.mxu0  ;;  %v425_v59 = vpop.f32.mrf.mxu1 }
 0x1de   :  { %v1644_v49 = vmul.f32 -1.442695, %v428_v62  ;;  %v429_v5 = vadd.f32 %v1641_v61, %v354_v0  ;;  %v431_v58 = vadd.f32 %v1643_v54, %v425_v59 }
 0x1e0   :  { %1725 = vpow2.f32 %v1644_v49  ;;  %v1645_v51 = vmul.f32 -1.442695, %v429_v5  ;;  %v1646_v56 = vmul.f32 -1.442695, %v431_v58  ;;  %v1647_v58 = vld [vmem:[%s3337_s2 + $0x8] sm:$0xff] }
 0x1e2   :  { %1727 = vpow2.f32 %v1645_v51 }
 0x1e3   :  { %1729 = vpow2.f32 %v1646_v56 }
 0x1ed   :  { %v1726_v57 = vpop.eup %1725 }
 0x1ee   :  { %v435_v47 = vadd.f32 1.0, %v1726_v57 }
 0x1ef   :  { %v1728_v62 = vpop.eup %1727 }
 0x1f0   :  { %1731 = vrcp.f32 %v435_v47  ;;  %v441_v0 = vadd.f32 1.0, %v1728_v62  ;;  %v1730_v5 = vpop.eup %1729 }
 0x1f1   :  { %1733 = vtanh.f32 %v430_v63  ;;  %v448_v55 = vadd.f32 1.0, %v1730_v5  ;;  %v3487_v5 = vld [vmem:[#allocation9_spill] sm:$0xff] }
 0x1f2   :  { %1735 = vrcp.f32 %v441_v0  ;;  %v3486_v0 = vld [vmem:[#allocation17_spill] sm:$0xff] }
 0x1f3   :  { %1737 = vrcp.f32 %v448_v55  ;;  %v3485_v55 = vld [vmem:[#allocation8_spill] sm:$0xff] }
 0x1fd   :  { %v1732_v61 = vpop.eup %1731 }
 0x1fe   :  { %v1734_v49 = vpop.eup %1733 }
 0x1ff   :  { %v1736_v51 = vpop.eup %1735  ;;  %v452_v54 = vmul.f32 %v1734_v49, %v1732_v61  ;;  %v3488_v61 = vld [vmem:[#allocation19_spill] sm:$0xff]  ;;  %v3489_v49 = vld [vmem:[#allocation10_spill] sm:$0xff] }
 0x200   :  { %v451_v59 = vmul.f32 %v1736_v51, %v2421_v10  ;;  %v1738_v56 = vpop.eup %1737  ;;  %v3490_v51 = vld [vmem:[#allocation20_spill] sm:$0xff] }
 0x202   :  { %v453_v43 = vadd.f32 %v452_v54, %v451_v59  ;;  %v3491_v54 = vld [vmem:[#allocation12_spill] sm:$0xff]  ;;  %v3492_v59 = vld [vmem:[#allocation21_spill] sm:$0xff] }
 0x204   :  { %1739 = vtanh.f32 %v453_v43  ;;  %v2520_v57 = vsel %vm463_vm9, %v453_v43, %v2421_v10  ;;  %v3481_v43 = vld [vmem:[#allocation6_spill] sm:$0xff]  ;;  %v3482_v10 = vld [vmem:[#allocation13_spill] sm:$0xff] }
 0x211   :  { %v1740_v60 = vpop.eup %1739 }
 0x212   :  { %v455_v53 = vmul.f32 %v1740_v60, %v1738_v56  ;;  %v3493_v56 = vld [vmem:[#allocation14_spill] sm:$0xff] }
 0x213   :  { %v3494_v60 = vld [vmem:[#allocation22_spill] sm:$0xff] }
 0x214   :  { %v2526_v63 = vsel %vm463_vm9, %v455_v53, %v2426_v3  ;;  %v468_v47 = vsel %vm463_vm9, %v455_v53, 0.0  ;;  %v3483_v3 = vld [vmem:[#allocation7_spill] sm:$0xff]  ;;  %v3495_v53 = vld [vmem:[#allocation16_spill] sm:$0xff] }
 0x215   :  { %v469_v62 = vadd.f32 %v1647_v58, %v468_v47  ;;  %542 = vmatmul.mubr.f32.vlgmr.msra.gmra.mxu0 %v2526_v63  ;;  %613 = vmatmul.mubr.f32.vlgmr.msra.gmra.mxu1 %v2526_v63  ;;  %v3496_v58 = vld [vmem:[#allocation23_spill] sm:$0xff]  ;;  %v3497_v47 = vld [vmem:[#allocation18_spill] sm:$0xff] }
 0x216   :  { %669 = vmatpush1.msra.mxu0 %v1946_v1  ;;  %740 = vmatpush1.msra.mxu1 %v2002_v12 }
 0x217   :  { %1648 = vst [vmem:[%s3338_s4 + $0x8] sm:$0xff] %v469_v62  ;;  %670 = vmatprep.subr.mxu0 %v1951_v2  ;;  %741 = vmatprep.subr.mxu1 %v2014_v14  ;;  %v3498_v62 = vmov 0.0  }
 0x218   :  { %671 = vmatpush1.msra.mxu0 %v1959_v4  ;;  %742 = vmatpush1.msra.mxu1 %v2019_v15 }
 0x219   :  { %672 = vmatprep.subr.mxu0 %v1966_v6  ;;  %743 = vmatprep.subr.mxu1 %v2031_v17 }
 0x21a   :  { %673 = vmatpush1.msra.mxu0 %v1973_v7  ;;  %744 = vmatpush1.msra.mxu1 %v2043_v19 }
 0x21b   :  { %674 = vmatprep.subr.mxu0 %v1979_v8  ;;  %745 = vmatprep.subr.mxu1 %v2048_v20 }
 0x21c   :  { %675 = vmatpush1.msra.mxu0 %v1985_v9  ;;  %746 = vmatpush1.msra.mxu1 %v2060_v22 }
 0x21d   :  { %676 = vmatprep.subr.mxu0 %v1996_v11  ;;  %747 = vmatprep.subr.mxu1 %v2072_v24 }
 0x21e   :  { %677 = vmatpush1.msra.mxu0 %v2008_v13  ;;  %748 = vmatpush1.msra.mxu1 %v2084_v26 }
 0x21f   :  { %678 = vmatprep.subr.mxu0 %v2025_v16  ;;  %749 = vmatprep.subr.mxu1 %v2096_v28 }
 0x220   :  { %679 = vmatpush1.msra.mxu0 %v2037_v18  ;;  %750 = vmatpush1.msra.mxu1 %v2108_v30 }
 0x221   :  { %680 = vmatprep.subr.mxu0 %v2054_v21  ;;  %751 = vmatprep.subr.mxu1 %v2120_v32 }
 0x222   :  { %681 = vmatpush1.msra.mxu0 %v2066_v23  ;;  %752 = vmatpush1.msra.mxu1 %v2132_v34 }
 0x223   :  { %682 = vmatprep.subr.mxu0 %v2078_v25  ;;  %753 = vmatprep.subr.mxu1 %v2144_v36 }
 0x224   :  { %683 = vmatpush1.msra.mxu0 %v2090_v27  ;;  %754 = vmatpush1.msra.mxu1 %v2156_v38 }
 0x225   :  { %684 = vmatprep.subr.mxu0 %v2102_v29  ;;  %755 = vmatprep.subr.mxu1 %v2168_v40 }
 0x226   :  { %685 = vmatpush1.msra.mxu0 %v2114_v31  ;;  %756 = vmatpush1.msra.mxu1 %v2180_v42 }
 0x227   :  { %686 = vmatprep.subr.mxu0 %v2126_v33  ;;  %757 = vmatprep.subr.mxu1 %v2192_v44 }
 0x228   :  { %687 = vmatpush1.msra.mxu0 %v2138_v35  ;;  %758 = vmatpush1.msra.mxu1 %v2204_v46 }
 0x229   :  { %688 = vmatprep.subr.mxu0 %v2150_v37  ;;  %759 = vmatprep.subr.mxu1 %v2216_v48 }
 0x22a   :  { %689 = vmatpush1.msra.mxu0 %v2162_v39  ;;  %760 = vmatpush1.msra.mxu1 %v2228_v50 }
 0x22b   :  { %690 = vmatprep.subr.mxu0 %v2174_v41  ;;  %761 = vmatprep.subr.mxu1 %v2240_v52 }
 0x22c   :  { %691 = vmatpush1.msra.mxu0 %v3481_v43  ;;  %762 = vmatpush1.msra.mxu1 %v3482_v10 }
 0x22d   :  { %692 = vmatprep.subr.mxu0 %v3483_v3  ;;  %763 = vmatprep.subr.mxu1 %v3484_v45 }
 0x22e   :  { %693 = vmatpush1.msra.mxu0 %v3485_v55  ;;  %764 = vmatpush1.msra.mxu1 %v3486_v0  ;;  %v1651_v0 = vld [vmem:[%s3336_s1 + $0x50] sm:$0xff] }
 0x22f   :  { %694 = vmatprep.subr.mxu0 %v3487_v5  ;;  %765 = vmatprep.subr.mxu1 %v3488_v61  ;;  %v3499_v61 = vld [vmem:[#allocation24_spill] sm:$0xff] }
 0x230   :  { %695 = vmatpush1.msra.mxu0 %v3489_v49  ;;  %766 = vmatpush1.msra.mxu1 %v3490_v51  ;;  %v3500_v51 = vld [vmem:[#allocation4_spill] sm:$0xff] }
 0x231   :  { %696 = vmatprep.subr.mxu0 %v3491_v54  ;;  %767 = vmatprep.subr.mxu1 %v3492_v59  ;;  %v3501_v54 = vld [vmem:[#allocation5_spill] sm:$0xff] }
 0x232   :  { %697 = vmatpush1.msra.mxu0 %v3493_v56  ;;  %768 = vmatpush1.msra.mxu1 %v3494_v60  ;;  %v1649_v60 = vld [vmem:[%s3336_s1 + $0x40] sm:$0xff] }
 0x233   :  { %698 = vmatprep.subr.mxu0 %v3495_v53  ;;  %769 = vmatprep.subr.mxu1 %v3496_v58  ;;  %v1650_v58 = vld [vmem:[%s3336_s1 + $0x48] sm:$0xff] }
 0x234   :  { %699 = vmatpush1.msra.mxu0 %v3497_v47  ;;  %732 = vmatprep.mubr.f32.mxu0 %v3498_v62 }
 0x235   :  { %770 = vmatpush1.msra.mxu1 %v3499_v61  ;;  %803 = vmatprep.mubr.f32.mxu1 %v3498_v62 }
 0x236   :  { %859 = vmatprep.subr.mxu0 %v3500_v51  ;;  %930 = vmatprep.subr.mxu1 %v3501_v54  ;;  %v1652_v51 = vld [vmem:[%s3336_s1 + $0x58] sm:$0xff] }
 0x2d5   :  { %v543_v56 = vpop.f32.mrf.mxu0  ;;  %v614_v61 = vpop.f32.mrf.mxu1 }
 0x2d6   :  { %v619_v47 = vadd.f32 %v1649_v60, %v543_v56  ;;  %v621_v56 = vadd.f32 %v1651_v0, %v614_v61  ;;  %v1656_v61 = vld [vmem:[%s3337_s2 + $0x10] sm:$0xff] }
 0x2d7   :  { %v545_v53 = vpop.f32.mrf.mxu0  ;;  %v616_v54 = vpop.f32.mrf.mxu1 }
 0x2d8   :  { %v1653_v59 = vmul.f32 -1.442695, %v619_v47  ;;  %v620_v49 = vadd.f32 %v1650_v58, %v545_v53  ;;  %v622_v5 = vadd.f32 %v1652_v51, %v616_v54 }
 0x2da   :  { %1741 = vpow2.f32 %v1653_v59  ;;  %v1654_v62 = vmul.f32 -1.442695, %v620_v49  ;;  %v1655_v55 = vmul.f32 -1.442695, %v622_v5 }
 0x2dc   :  { %1743 = vpow2.f32 %v1654_v62  ;;  %v653_v62 = vpop.permute.xlu1 %652 }
 0x2dd   :  { %1745 = vpow2.f32 %v1655_v55  ;;  %vm654_vm10 = vcmp.eq.s32.totalorder %v653_v62, 1  ;;  %v1665_v62 = vld [vmem:[%s3337_s2 + $0x18] sm:$0xff] }
 0x2e7   :  { %v1742_v45 = vpop.eup %1741 }
 0x2e8   :  { %v626_v60 = vadd.f32 1.0, %v1742_v45 }
 0x2e9   :  { %v1744_v47 = vpop.eup %1743 }
 0x2ea   :  { %1747 = vrcp.f32 %v626_v60  ;;  %v632_v59 = vadd.f32 1.0, %v1744_v47  ;;  %v1746_v49 = vpop.eup %1745 }
 0x2eb   :  { %1749 = vtanh.f32 %v621_v56  ;;  %v639_v51 = vadd.f32 1.0, %v1746_v49 }
 0x2ec   :  { %1751 = vrcp.f32 %v632_v59 }
 0x2ed   :  { %1753 = vrcp.f32 %v639_v51 }
 0x2f7   :  { %v1748_v53 = vpop.eup %1747 }
 0x2f8   :  { %v1750_v58 = vpop.eup %1749 }
 0x2f9   :  { %v1752_v3 = vpop.eup %1751  ;;  %v643_v10 = vmul.f32 %v1750_v58, %v1748_v53 }
 0x2fa   :  { %v642_v54 = vmul.f32 %v1752_v3, %v2520_v57  ;;  %v1754_v55 = vpop.eup %1753 }
 0x2fc   :  { %v644_v5 = vadd.f32 %v643_v10, %v642_v54 }
 0x2fe   :  { %1755 = vtanh.f32 %v644_v5  ;;  %v2613_v45 = vsel %vm654_vm10, %v644_v5, %v2520_v57 }
 0x30b   :  { %v1756_v0 = vpop.eup %1755 }
 0x30c   :  { %v646_v56 = vmul.f32 %v1756_v0, %v1754_v55  ;;  %v2735_v55 = vld [vmem:[%s3334_s3 + $0x1f0] sm:$0xff]  ;;  %v2744_v0 = vld [vmem:[%s3334_s3 + $0x1c8] sm:$0xff] }
 0x30e   :  { %v2619_v60 = vsel %vm654_vm10, %v646_v56, %v2526_v63  ;;  %v659_v47 = vsel %vm654_vm10, %v646_v56, 0.0  ;;  %v2756_v56 = vld [vmem:[%s3334_s3 + $0x1c0] sm:$0xff] }
 0x30f   :  { %v660_v3 = vadd.f32 %v1656_v61, %v659_v47  ;;  %733 = vmatmul.mubr.f32.vlgmr.msra.gmra.mxu0 %v2619_v60  ;;  %804 = vmatmul.mubr.f32.vlgmr.msra.gmra.mxu1 %v2619_v60  ;;  %v2750_v61 = vld [vmem:[%s3334_s3 + $0x1d8] sm:$0xff]  ;;  %v2768_v47 = vld [vmem:[%s3334_s3 + $0x1a8] sm:$0xff] }
 0x310   :  { %860 = vmatpush1.msra.mxu0 %v1946_v1  ;;  %931 = vmatpush1.msra.mxu1 %v2002_v12  ;;  %v3502_v1 = vld [vmem:[#allocation13_spill] sm:$0xff]  ;;  %v3510_v12 = vld [vmem:[#allocation20_spill] sm:$0xff] }
 0x311   :  { %1657 = vst [vmem:[%s3338_s4 + $0x10] sm:$0xff] %v660_v3  ;;  %861 = vmatprep.subr.mxu0 %v1951_v2  ;;  %932 = vmatprep.subr.mxu1 %v2014_v14  ;;  %v3503_v2 = vld [vmem:[#allocation7_spill] sm:$0xff]  ;;  %v3512_v14 = vld [vmem:[#allocation21_spill] sm:$0xff] }
 0x312   :  { %862 = vmatpush1.msra.mxu0 %v1959_v4  ;;  %933 = vmatpush1.msra.mxu1 %v2019_v15  ;;  %v3504_v4 = vld [vmem:[#allocation15_spill] sm:$0xff]  ;;  %v3513_v15 = vld [vmem:[#allocation14_spill] sm:$0xff] }
 0x313   :  { %863 = vmatprep.subr.mxu0 %v1966_v6  ;;  %934 = vmatprep.subr.mxu1 %v2031_v17  ;;  %v3505_v6 = vld [vmem:[#allocation8_spill] sm:$0xff]  ;;  %v2774_v3 = vld [vmem:[%s3334_s3 + $0x1b8] sm:$0xff] }
 0x314   :  { %864 = vmatpush1.msra.mxu0 %v1973_v7  ;;  %935 = vmatpush1.msra.mxu1 %v2043_v19  ;;  %v3506_v7 = vld [vmem:[#allocation17_spill] sm:$0xff]  ;;  %v3515_v17 = vld [vmem:[#allocation16_spill] sm:$0xff]  ;;  %v3517_v19 = vld [vmem:[#allocation18_spill] sm:$0xff] }
 0x315   :  { %865 = vmatprep.subr.mxu0 %v1979_v8  ;;  %936 = vmatprep.subr.mxu1 %v2048_v20  ;;  %v3507_v8 = vld [vmem:[#allocation9_spill] sm:$0xff]  ;;  %v3518_v20 = vmov 0.0  }
 0x316   :  { %866 = vmatpush1.msra.mxu0 %v1985_v9  ;;  %937 = vmatpush1.msra.mxu1 %v2060_v22  ;;  %v3508_v9 = vld [vmem:[#allocation19_spill] sm:$0xff]  ;;  %v2693_v22 = vld [vmem:[%s3334_s3 + $0x1e8] sm:$0xff] }
 0x317   :  { %867 = vmatprep.subr.mxu0 %v1996_v11  ;;  %938 = vmatprep.subr.mxu1 %v2072_v24  ;;  %v3509_v11 = vld [vmem:[#allocation10_spill] sm:$0xff]  ;;  %3520 = vst [vmem:[#allocation11_spill] sm:$0xff] %v2693_v22  ;;  %v1658_v24 = vld [vmem:[%s3336_s1 + $0x60] sm:$0xff] }
 0x318   :  { %868 = vmatpush1.msra.mxu0 %v2008_v13  ;;  %939 = vmatpush1.msra.mxu1 %v2084_v26  ;;  %v3511_v13 = vld [vmem:[#allocation12_spill] sm:$0xff]  ;;  %v1659_v26 = vld [vmem:[%s3336_s1 + $0x68] sm:$0xff] }
 0x319   :  { %869 = vmatprep.subr.mxu0 %v2025_v16  ;;  %940 = vmatprep.subr.mxu1 %v2096_v28  ;;  %v3514_v16 = vld [vmem:[#allocation22_spill] sm:$0xff] }
 0x31a   :  { %870 = vmatpush1.msra.mxu0 %v2037_v18  ;;  %941 = vmatpush1.msra.mxu1 %v2108_v30  ;;  %v3516_v18 = vld [vmem:[#allocation23_spill] sm:$0xff] }
 0x31b   :  { %871 = vmatprep.subr.mxu0 %v2054_v21  ;;  %942 = vmatprep.subr.mxu1 %v2120_v32  ;;  %v3519_v21 = vld [vmem:[#allocation24_spill] sm:$0xff] }
 0x31c   :  { %872 = vmatpush1.msra.mxu0 %v2066_v23  ;;  %943 = vmatpush1.msra.mxu1 %v2132_v34  ;;  %v2699_v23 = vld [vmem:[%s3334_s3 + $0x1f8] sm:$0xff] }
 0x31d   :  { %873 = vmatprep.subr.mxu0 %v2078_v25  ;;  %944 = vmatprep.subr.mxu1 %v2144_v36  ;;  %3521 = vst [vmem:[#allocation6_spill] sm:$0xff] %v2699_v23  ;;  %v1660_v36 = vld [vmem:[%s3336_s1 + $0x70] sm:$0xff] }
 0x31e   :  { %874 = vmatpush1.msra.mxu0 %v2090_v27  ;;  %945 = vmatpush1.msra.mxu1 %v2156_v38 }
 0x31f   :  { %875 = vmatprep.subr.mxu0 %v2102_v29  ;;  %946 = vmatprep.subr.mxu1 %v2168_v40 }
 0x320   :  { %876 = vmatpush1.msra.mxu0 %v2114_v31  ;;  %947 = vmatpush1.msra.mxu1 %v2180_v42 }
 0x321   :  { %877 = vmatprep.subr.mxu0 %v2126_v33  ;;  %948 = vmatprep.subr.mxu1 %v2192_v44  ;;  %v1661_v33 = vld [vmem:[%s3336_s1 + $0x78] sm:$0xff] }
 0x322   :  { %878 = vmatpush1.msra.mxu0 %v2138_v35  ;;  %949 = vmatpush1.msra.mxu1 %v2204_v46 }
 0x323   :  { %879 = vmatprep.subr.mxu0 %v2150_v37  ;;  %950 = vmatprep.subr.mxu1 %v2216_v48 }
 0x324   :  { %880 = vmatpush1.msra.mxu0 %v2162_v39  ;;  %951 = vmatpush1.msra.mxu1 %v2228_v50 }
 0x325   :  { %881 = vmatprep.subr.mxu0 %v2174_v41  ;;  %952 = vmatprep.subr.mxu1 %v2240_v52 }
 0x326   :  { %882 = vmatpush1.msra.mxu0 %v3481_v43  ;;  %953 = vmatpush1.msra.mxu1 %v3502_v1  ;;  %v844_v43 = vpop.permute.xlu1 %843  ;;  %v2780_v1 = vld [vmem:[%s3334_s3 + $0x1a0] sm:$0xff] }
 0x327   :  { %883 = vmatprep.subr.mxu0 %v3503_v2  ;;  %954 = vmatprep.subr.mxu1 %v3504_v4  ;;  %vm845_vm11 = vcmp.eq.s32.totalorder %v844_v43, 1  ;;  %v2786_v2 = vld [vmem:[%s3334_s3 + $0x1b0] sm:$0xff]  ;;  %v2792_v4 = vld [vmem:[%s3334_s3 + $0x188] sm:$0xff]  ;;  %v3038_v43 = vld [vmem:[%s3334_s3 + $0x58] sm:$0xff] }
 0x328   :  { %884 = vmatpush1.msra.mxu0 %v3505_v6  ;;  %955 = vmatpush1.msra.mxu1 %v3506_v7  ;;  %v2798_v6 = vld [vmem:[%s3334_s3 + $0x198] sm:$0xff]  ;;  %v2804_v7 = vld [vmem:[%s3334_s3 + $0x180] sm:$0xff]  ;;  %3529 = vst [vmem:[#allocation9_spill] sm:$0xff] %v3038_v43 }
 0x329   :  { %885 = vmatprep.subr.mxu0 %v3507_v8  ;;  %956 = vmatprep.subr.mxu1 %v3508_v9  ;;  %v2810_v8 = vld [vmem:[%s3334_s3 + $0x190] sm:$0xff]  ;;  %v2816_v9 = vld [vmem:[%s3334_s3 + $0x168] sm:$0xff] }
 0x32a   :  { %886 = vmatpush1.msra.mxu0 %v3509_v11  ;;  %957 = vmatpush1.msra.mxu1 %v3510_v12  ;;  %v2822_v11 = vld [vmem:[%s3334_s3 + $0x178] sm:$0xff]  ;;  %v2828_v12 = vld [vmem:[%s3334_s3 + $0x160] sm:$0xff] }
 0x32b   :  { %887 = vmatprep.subr.mxu0 %v3511_v13  ;;  %958 = vmatprep.subr.mxu1 %v3512_v14  ;;  %v2834_v13 = vld [vmem:[%s3334_s3 + $0x170] sm:$0xff]  ;;  %v2840_v14 = vld [vmem:[%s3334_s3 + $0x148] sm:$0xff] }
 0x32c   :  { %888 = vmatpush1.msra.mxu0 %v3513_v15  ;;  %959 = vmatpush1.msra.mxu1 %v3514_v16  ;;  %v2846_v15 = vld [vmem:[%s3334_s3 + $0x158] sm:$0xff]  ;;  %v2852_v16 = vld [vmem:[%s3334_s3 + $0x140] sm:$0xff] }
 0x32d   :  { %889 = vmatprep.subr.mxu0 %v3515_v17  ;;  %960 = vmatprep.subr.mxu1 %v3516_v18  ;;  %v2858_v17 = vld [vmem:[%s3334_s3 + $0x150] sm:$0xff]  ;;  %v2864_v18 = vld [vmem:[%s3334_s3 + $0x128] sm:$0xff] }
 0x32e   :  { %890 = vmatpush1.msra.mxu0 %v3517_v19  ;;  %923 = vmatprep.mubr.f32.mxu0 %v3518_v20  ;;  %v2870_v19 = vld [vmem:[%s3334_s3 + $0x138] sm:$0xff] }
 0x32f   :  { %961 = vmatpush1.msra.mxu1 %v3519_v21  ;;  %994 = vmatprep.mubr.f32.mxu1 %v3518_v20  ;;  %v2876_v21 = vld [vmem:[%s3334_s3 + $0x120] sm:$0xff] }
 0x330   :  { %1050 = vmatprep.subr.mxu0 %v2693_v22  ;;  %1121 = vmatprep.subr.mxu1 %v2699_v23 }
 0x3cf   :  { %v734_v25 = vpop.f32.mrf.mxu0  ;;  %v805_v31 = vpop.f32.mrf.mxu1 }
 0x3d0   :  { %v810_v27 = vadd.f32 %v1658_v24, %v734_v25  ;;  %v812_v39 = vadd.f32 %v1660_v36, %v805_v31  ;;  %v2882_v24 = vld [vmem:[%s3334_s3 + $0x130] sm:$0xff]  ;;  %v2888_v25 = vld [vmem:[%s3334_s3 + $0x108] sm:$0xff]  ;;  %v2924_v31 = vld [vmem:[%s3334_s3 + $0xe0] sm:$0xff] }
 0x3d1   :  { %v736_v28 = vpop.f32.mrf.mxu0  ;;  %v807_v34 = vpop.f32.mrf.mxu1  ;;  %v2954_v36 = vld [vmem:[%s3334_s3 + $0xd0] sm:$0xff] }
 0x3d2   :  { %v1662_v29 = vmul.f32 -1.442695, %v810_v27  ;;  %v811_v30 = vadd.f32 %v1659_v26, %v736_v28  ;;  %v813_v35 = vadd.f32 %v1661_v33, %v807_v34  ;;  %v2894_v26 = vld [vmem:[%s3334_s3 + $0x118] sm:$0xff]  ;;  %v2900_v27 = vld [vmem:[%s3334_s3 + $0x100] sm:$0xff]  ;;  %v2906_v28 = vld [vmem:[%s3334_s3 + $0x110] sm:$0xff] }
 0x3d3   :  { %v2936_v33 = vld [vmem:[%s3334_s3 + $0xc8] sm:$0xff]  ;;  %v2942_v34 = vld [vmem:[%s3334_s3 + $0xd8] sm:$0xff] }
 0x3d4   :  { %1757 = vpow2.f32 %v1662_v29  ;;  %v1663_v32 = vmul.f32 -1.442695, %v811_v30  ;;  %v1664_v37 = vmul.f32 -1.442695, %v813_v35  ;;  %v2912_v29 = vld [vmem:[%s3334_s3 + $0xe8] sm:$0xff]  ;;  %v2918_v30 = vld [vmem:[%s3334_s3 + $0xf8] sm:$0xff] }
 0x3d5   :  { %v2948_v35 = vld [vmem:[%s3334_s3 + $0xc0] sm:$0xff] }
 0x3d6   :  { %1759 = vpow2.f32 %v1663_v32  ;;  %v2930_v32 = vld [vmem:[%s3334_s3 + $0xf0] sm:$0xff] }
 0x3d7   :  { %1761 = vpow2.f32 %v1664_v37  ;;  %v2960_v37 = vld [vmem:[%s3334_s3 + $0xa8] sm:$0xff] }
 0x3e1   :  { %v1758_v38 = vpop.eup %1757 }
 0x3e2   :  { %v817_v40 = vadd.f32 1.0, %v1758_v38  ;;  %v2966_v38 = vld [vmem:[%s3334_s3 + $0xb8] sm:$0xff] }
 0x3e3   :  { %v1760_v41 = vpop.eup %1759 }
 0x3e4   :  { %1763 = vrcp.f32 %v817_v40  ;;  %v823_v42 = vadd.f32 1.0, %v1760_v41  ;;  %v1762_v44 = vpop.eup %1761  ;;  %v2978_v40 = vld [vmem:[%s3334_s3 + $0xb0] sm:$0xff]  ;;  %v2984_v41 = vld [vmem:[%s3334_s3 + $0x88] sm:$0xff] }
 0x3e5   :  { %1765 = vtanh.f32 %v812_v39  ;;  %v830_v52 = vadd.f32 1.0, %v1762_v44  ;;  %v2972_v39 = vld [vmem:[%s3334_s3 + $0xa0] sm:$0xff] }
 0x3e6   :  { %1767 = vrcp.f32 %v823_v42  ;;  %v2990_v42 = vld [vmem:[%s3334_s3 + $0x98] sm:$0xff]  ;;  %v2996_v44 = vld [vmem:[%s3334_s3 + $0x80] sm:$0xff] }
 0x3e7   :  { %1769 = vrcp.f32 %v830_v52  ;;  %3522 = vst [vmem:[#allocation4_spill] sm:$0xff] %v2996_v44  ;;  %v3020_v52 = vld [vmem:[%s3334_s3 + $0x60] sm:$0xff] }
 0x3e8   :  { %3526 = vst [vmem:[#allocation15_spill] sm:$0xff] %v3020_v52 }
 0x3f1   :  { %v1764_v46 = vpop.eup %1763 }
 0x3f2   :  { %v1766_v48 = vpop.eup %1765 }
 0x3f3   :  { %v1768_v50 = vpop.eup %1767  ;;  %v834_v57 = vmul.f32 %v1766_v48, %v1764_v46  ;;  %v3002_v46 = vld [vmem:[%s3334_s3 + $0x90] sm:$0xff]  ;;  %v3008_v48 = vld [vmem:[%s3334_s3 + $0x68] sm:$0xff] }
 0x3f4   :  { %v833_v63 = vmul.f32 %v1768_v50, %v2613_v45  ;;  %v1770_v49 = vpop.eup %1769  ;;  %3523 = vst [vmem:[#allocation5_spill] sm:$0xff] %v3002_v46  ;;  %3524 = vst [vmem:[#allocation13_spill] sm:$0xff] %v3008_v48  ;;  %v3014_v50 = vld [vmem:[%s3334_s3 + $0x78] sm:$0xff] }
 0x3f5   :  { %3525 = vst [vmem:[#allocation7_spill] sm:$0xff] %v3014_v50 }
 0x3f6   :  { %v835_v10 = vadd.f32 %v834_v57, %v833_v63  ;;  %v3026_v57 = vld [vmem:[%s3334_s3 + $0x70] sm:$0xff]  ;;  %v3032_v63 = vld [vmem:[%s3334_s3 + $0x48] sm:$0xff] }
 0x3f7   :  { %3527 = vst [vmem:[#allocation8_spill] sm:$0xff] %v3026_v57  ;;  %3528 = vst [vmem:[#allocation17_spill] sm:$0xff] %v3032_v63 }
 0x3f8   :  { %1771 = vtanh.f32 %v835_v10  ;;  %v2716_v59 = vsel %vm845_vm11, %v835_v10, %v2613_v45  ;;  %v2729_v45 = vld [vmem:[%s3334_s3 + $0x1e0] sm:$0xff] }
 0x3f9   :  { %v3044_v10 = vld [vmem:[%s3334_s3 + $0x40] sm:$0xff] }
 0x3fa   :  { %3530 = vst [vmem:[#allocation19_spill] sm:$0xff] %v3044_v10 }
 0x405   :  { %v1772_v53 = vpop.eup %1771 }
 0x406   :  { %v837_v58 = vmul.f32 %v1772_v53, %v1770_v49  ;;  %v3050_v49 = vld [vmem:[%s3334_s3 + $0x50] sm:$0xff]  ;;  %v3056_v53 = vld [vmem:[%s3334_s3 + $0x28] sm:$0xff] }
 0x407   :  { %3531 = vst [vmem:[#allocation10_spill] sm:$0xff] %v3050_v49  ;;  %3532 = vst [vmem:[#allocation20_spill] sm:$0xff] %v3056_v53 }
 0x408   :  { %v2722_v51 = vsel %vm845_vm11, %v837_v58, %v2619_v60  ;;  %v850_v54 = vsel %vm845_vm11, %v837_v58, 0.0  ;;  %v2762_v60 = vld [vmem:[%s3334_s3 + $0x1d0] sm:$0xff]  ;;  %v3062_v58 = vld [vmem:[%s3334_s3 + $0x38] sm:$0xff] }
 0x409   :  { %v851_v5 = vadd.f32 %v1665_v62, %v850_v54  ;;  %924 = vmatmul.mubr.f32.vlgmr.msra.gmra.mxu0 %v2722_v51  ;;  %995 = vmatmul.mubr.f32.vlgmr.msra.gmra.mxu1 %v2722_v51  ;;  %3533 = vst [vmem:[#allocation12_spill] sm:$0xff] %v3062_v58  ;;  %v3068_v62 = vld [vmem:[%s3334_s3 + $0x20] sm:$0xff]  ;;  %v3074_v54 = vld [vmem:[%s3334_s3 + $0x30] sm:$0xff] }
 0x40a   :  { %1051 = vmatpush1.msra.mxu0 %v2729_v45  ;;  %1122 = vmatpush1.msra.mxu1 %v2735_v55  ;;  %3534 = vst [vmem:[#allocation21_spill] sm:$0xff] %v3068_v62  ;;  %3535 = vst [vmem:[#allocation14_spill] sm:$0xff] %v3074_v54 }
 0x40b   :  { %1666 = vst [vmem:[%s3338_s4 + $0x18] sm:$0xff] %v851_v5  ;;  %1052 = vmatprep.subr.mxu0 %v2744_v0  ;;  %1123 = vmatprep.subr.mxu1 %v2750_v61  ;;  %v3080_v5 = vld [vmem:[%s3334_s3 + $0x8] sm:$0xff] }
 0x40c   :  { %1053 = vmatpush1.msra.mxu0 %v2756_v56  ;;  %1124 = vmatpush1.msra.mxu1 %v2762_v60  ;;  %3536 = vst [vmem:[#allocation22_spill] sm:$0xff] %v3080_v5 }
 0x40d   :  { %1054 = vmatprep.subr.mxu0 %v2768_v47  ;;  %1125 = vmatprep.subr.mxu1 %v2774_v3 }
 0x40e   :  { %1055 = vmatpush1.msra.mxu0 %v2780_v1  ;;  %1126 = vmatpush1.msra.mxu1 %v2786_v2 }
 0x40f   :  { %1056 = vmatprep.subr.mxu0 %v2792_v4  ;;  %1127 = vmatprep.subr.mxu1 %v2798_v6 }
 0x410   :  { %1057 = vmatpush1.msra.mxu0 %v2804_v7  ;;  %1128 = vmatpush1.msra.mxu1 %v2810_v8 }
 0x411   :  { %1058 = vmatprep.subr.mxu0 %v2816_v9  ;;  %1129 = vmatprep.subr.mxu1 %v2822_v11 }
 0x412   :  { %1059 = vmatpush1.msra.mxu0 %v2828_v12  ;;  %1130 = vmatpush1.msra.mxu1 %v2834_v13 }
 0x413   :  { %1060 = vmatprep.subr.mxu0 %v2840_v14  ;;  %1131 = vmatprep.subr.mxu1 %v2846_v15 }
 0x414   :  { %1061 = vmatpush1.msra.mxu0 %v2852_v16  ;;  %1132 = vmatpush1.msra.mxu1 %v2858_v17 }
 0x415   :  { %1062 = vmatprep.subr.mxu0 %v2864_v18  ;;  %1133 = vmatprep.subr.mxu1 %v2870_v19 }
 0x416   :  { %1063 = vmatpush1.msra.mxu0 %v2876_v21  ;;  %1134 = vmatpush1.msra.mxu1 %v2882_v24 }
 0x417   :  { %1064 = vmatprep.subr.mxu0 %v2888_v25  ;;  %1135 = vmatprep.subr.mxu1 %v2894_v26 }
 0x418   :  { %1065 = vmatpush1.msra.mxu0 %v2900_v27  ;;  %1136 = vmatpush1.msra.mxu1 %v2906_v28 }
 0x419   :  { %1066 = vmatprep.subr.mxu0 %v2912_v29  ;;  %1137 = vmatprep.subr.mxu1 %v2918_v30 }
 0x41a   :  { %1067 = vmatpush1.msra.mxu0 %v2924_v31  ;;  %1138 = vmatpush1.msra.mxu1 %v2930_v32 }
 0x41b   :  { %1068 = vmatprep.subr.mxu0 %v2936_v33  ;;  %1139 = vmatprep.subr.mxu1 %v2942_v34 }
 0x41c   :  { %1069 = vmatpush1.msra.mxu0 %v2948_v35  ;;  %1140 = vmatpush1.msra.mxu1 %v2954_v36 }
 0x41d   :  { %1070 = vmatprep.subr.mxu0 %v2960_v37  ;;  %1141 = vmatprep.subr.mxu1 %v2966_v38 }
 0x41e   :  { %1071 = vmatpush1.msra.mxu0 %v2972_v39  ;;  %1142 = vmatpush1.msra.mxu1 %v2978_v40 }
 0x41f   :  { %1072 = vmatprep.subr.mxu0 %v2984_v41  ;;  %1143 = vmatprep.subr.mxu1 %v2990_v42 }
 0x420   :  { %1073 = vmatpush1.msra.mxu0 %v2996_v44  ;;  %1144 = vmatpush1.msra.mxu1 %v3002_v46  ;;  %v1035_v46 = vpop.permute.xlu0 %1034 }
 0x421   :  { %1074 = vmatprep.subr.mxu0 %v3008_v48  ;;  %1145 = vmatprep.subr.mxu1 %v3014_v50  ;;  %vm1036_vm12 = vcmp.eq.s32.totalorder %v1035_v46, 1  ;;  %v3543_v46 = vld [vmem:[#allocation7_spill] sm:$0xff] }
 0x422   :  { %1075 = vmatpush1.msra.mxu0 %v3020_v52  ;;  %1146 = vmatpush1.msra.mxu1 %v3026_v57  ;;  %v1669_v57 = vld [vmem:[%s3336_s1 + $0x90] sm:$0xff] }
 0x423   :  { %1076 = vmatprep.subr.mxu0 %v3032_v63  ;;  %1147 = vmatprep.subr.mxu1 %v3038_v43 }
 0x424   :  { %1077 = vmatpush1.msra.mxu0 %v3044_v10  ;;  %1148 = vmatpush1.msra.mxu1 %v3050_v49 }
 0x425   :  { %1078 = vmatprep.subr.mxu0 %v3056_v53  ;;  %1149 = vmatprep.subr.mxu1 %v3062_v58  ;;  %v3086_v58 = vld [vmem:[%s3334_s3 + $0x18] sm:$0xff] }
 0x426   :  { %1079 = vmatpush1.msra.mxu0 %v3068_v62  ;;  %1150 = vmatpush1.msra.mxu1 %v3074_v54  ;;  %3537 = vst [vmem:[#allocation16_spill] sm:$0xff] %v3086_v58  ;;  %v3092_v62 = vld [vmem:[%s3334_s3] sm:$0xff]  ;;  %v1668_v54 = vld [vmem:[%s3336_s1 + $0x88] sm:$0xff] }
 0x427   :  { %1080 = vmatprep.subr.mxu0 %v3080_v5  ;;  %1151 = vmatprep.subr.mxu1 %v3086_v58  ;;  %3538 = vst [vmem:[#allocation23_spill] sm:$0xff] %v3092_v62  ;;  %v3099_v5 = vld [vmem:[%s3334_s3 + $0x10] sm:$0xff]  ;;  %v1667_v58 = vld [vmem:[%s3336_s1 + $0x80] sm:$0xff] }
 0x428   :  { %1081 = vmatpush1.msra.mxu0 %v3092_v62  ;;  %1114 = vmatprep.mubr.f32.mxu0 %v3518_v20  ;;  %3539 = vst [vmem:[#allocation18_spill] sm:$0xff] %v3099_v5 }
 0x429   :  { %1152 = vmatpush1.msra.mxu1 %v3099_v5  ;;  %1185 = vmatprep.mubr.f32.mxu1 %v3518_v20 }
 0x42a   :  { %1241 = vmatprep.subr.mxu0 %v2693_v22  ;;  %1312 = vmatprep.subr.mxu1 %v2699_v23  ;;  %v1670_v23 = vld [vmem:[%s3336_s1 + $0x98] sm:$0xff] }
 0x4c9   :  { %v925_v62 = vpop.f32.mrf.mxu0  ;;  %v996_v5 = vpop.f32.mrf.mxu1 }
 0x4ca   :  { %v1001_v53 = vadd.f32 %v1667_v58, %v925_v62  ;;  %v1003_v58 = vadd.f32 %v1669_v57, %v996_v5  ;;  %v1674_v5 = vld [vmem:[%s3337_s2 + $0x20] sm:$0xff] }
 0x4cb   :  { %v927_v49 = vpop.f32.mrf.mxu0  ;;  %v998_v22 = vpop.f32.mrf.mxu1 }
 0x4cc   :  { %v1671_v10 = vmul.f32 -1.442695, %v1001_v53  ;;  %v1002_v43 = vadd.f32 %v1668_v54, %v927_v49  ;;  %v1004_v63 = vadd.f32 %v1670_v23, %v998_v22 }
 0x4ce   :  { %1773 = vpow2.f32 %v1671_v10  ;;  %v1672_v20 = vmul.f32 -1.442695, %v1002_v43  ;;  %v1673_v52 = vmul.f32 -1.442695, %v1004_v63 }
 0x4d0   :  { %1775 = vpow2.f32 %v1672_v20 }
 0x4d1   :  { %1777 = vpow2.f32 %v1673_v52 }
 0x4db   :  { %v1774_v50 = vpop.eup %1773 }
 0x4dc   :  { %v1008_v62 = vadd.f32 1.0, %v1774_v50 }
 0x4dd   :  { %v1776_v53 = vpop.eup %1775 }
 0x4de   :  { %1779 = vrcp.f32 %v1008_v62  ;;  %v1014_v10 = vadd.f32 1.0, %v1776_v53  ;;  %v1778_v20 = vpop.eup %1777 }
 0x4df   :  { %1781 = vtanh.f32 %v1003_v58  ;;  %v1021_v48 = vadd.f32 1.0, %v1778_v20  ;;  %v3546_v20 = vld [vmem:[#allocation17_spill] sm:$0xff] }
 0x4e0   :  { %1783 = vrcp.f32 %v1014_v10  ;;  %v3545_v10 = vld [vmem:[#allocation8_spill] sm:$0xff] }
 0x4e1   :  { %1785 = vrcp.f32 %v1021_v48  ;;  %v3544_v48 = vld [vmem:[#allocation15_spill] sm:$0xff] }
 0x4eb   :  { %v1780_v43 = vpop.eup %1779 }
 0x4ec   :  { %v1782_v49 = vpop.eup %1781 }
 0x4ed   :  { %v1784_v54 = vpop.eup %1783  ;;  %v1025_v22 = vmul.f32 %v1782_v49, %v1780_v43  ;;  %v3547_v43 = vld [vmem:[#allocation9_spill] sm:$0xff]  ;;  %v3548_v49 = vld [vmem:[#allocation19_spill] sm:$0xff] }
 0x4ee   :  { %v1024_v23 = vmul.f32 %v1784_v54, %v2716_v59  ;;  %v1786_v52 = vpop.eup %1785  ;;  %v3549_v54 = vld [vmem:[#allocation10_spill] sm:$0xff] }
 0x4f0   :  { %v1026_v44 = vadd.f32 %v1025_v22, %v1024_v23  ;;  %v3550_v22 = vld [vmem:[#allocation20_spill] sm:$0xff] }
 0x4f1   :  { %v3551_v23 = vld [vmem:[#allocation12_spill] sm:$0xff] }
 0x4f2   :  { %1787 = vtanh.f32 %v1026_v44  ;;  %v3119_v50 = vsel %vm1036_vm12, %v1026_v44, %v2716_v59  ;;  %v3540_v59 = vld [vmem:[#allocation4_spill] sm:$0xff]  ;;  %v3542_v44 = vld [vmem:[#allocation13_spill] sm:$0xff] }
 0x4ff   :  { %v1788_v57 = vpop.eup %1787 }
 0x500   :  { %v1028_v63 = vmul.f32 %v1788_v57, %v1786_v52  ;;  %v3552_v52 = vld [vmem:[#allocation21_spill] sm:$0xff]  ;;  %v3553_v57 = vld [vmem:[#allocation14_spill] sm:$0xff] }
 0x502   :  { %v3125_v58 = vsel %vm1036_vm12, %v1028_v63, %v2722_v51  ;;  %v1041_v62 = vsel %vm1036_vm12, %v1028_v63, 0.0  ;;  %v3541_v51 = vld [vmem:[#allocation5_spill] sm:$0xff]  ;;  %v3554_v63 = vld [vmem:[#allocation22_spill] sm:$0xff] }
 0x503   :  { %v1042_v53 = vadd.f32 %v1674_v5, %v1041_v62  ;;  %1115 = vmatmul.mubr.f32.vlgmr.msra.gmra.mxu0 %v3125_v58  ;;  %1186 = vmatmul.mubr.f32.vlgmr.msra.gmra.mxu1 %v3125_v58  ;;  %v3555_v5 = vld [vmem:[#allocation16_spill] sm:$0xff]  ;;  %v3556_v62 = vld [vmem:[#allocation23_spill] sm:$0xff] }
 0x504   :  { %1242 = vmatpush1.msra.mxu0 %v2729_v45  ;;  %1313 = vmatpush1.msra.mxu1 %v2735_v55 }
 0x505   :  { %1675 = vst [vmem:[%s3338_s4 + $0x20] sm:$0xff] %v1042_v53  ;;  %1243 = vmatprep.subr.mxu0 %v2744_v0  ;;  %1314 = vmatprep.subr.mxu1 %v2750_v61  ;;  %v3557_v53 = vmov 0.0  }
 0x506   :  { %1244 = vmatpush1.msra.mxu0 %v2756_v56  ;;  %1315 = vmatpush1.msra.mxu1 %v2762_v60 }
 0x507   :  { %1245 = vmatprep.subr.mxu0 %v2768_v47  ;;  %1316 = vmatprep.subr.mxu1 %v2774_v3 }
 0x508   :  { %1246 = vmatpush1.msra.mxu0 %v2780_v1  ;;  %1317 = vmatpush1.msra.mxu1 %v2786_v2 }
 0x509   :  { %1247 = vmatprep.subr.mxu0 %v2792_v4  ;;  %1318 = vmatprep.subr.mxu1 %v2798_v6 }
 0x50a   :  { %1248 = vmatpush1.msra.mxu0 %v2804_v7  ;;  %1319 = vmatpush1.msra.mxu1 %v2810_v8 }
 0x50b   :  { %1249 = vmatprep.subr.mxu0 %v2816_v9  ;;  %1320 = vmatprep.subr.mxu1 %v2822_v11 }
 0x50c   :  { %1250 = vmatpush1.msra.mxu0 %v2828_v12  ;;  %1321 = vmatpush1.msra.mxu1 %v2834_v13 }
 0x50d   :  { %1251 = vmatprep.subr.mxu0 %v2840_v14  ;;  %1322 = vmatprep.subr.mxu1 %v2846_v15 }
 0x50e   :  { %1252 = vmatpush1.msra.mxu0 %v2852_v16  ;;  %1323 = vmatpush1.msra.mxu1 %v2858_v17 }
 0x50f   :  { %1253 = vmatprep.subr.mxu0 %v2864_v18  ;;  %1324 = vmatprep.subr.mxu1 %v2870_v19 }
 0x510   :  { %1254 = vmatpush1.msra.mxu0 %v2876_v21  ;;  %1325 = vmatpush1.msra.mxu1 %v2882_v24 }
 0x511   :  { %1255 = vmatprep.subr.mxu0 %v2888_v25  ;;  %1326 = vmatprep.subr.mxu1 %v2894_v26 }
 0x512   :  { %1256 = vmatpush1.msra.mxu0 %v2900_v27  ;;  %1327 = vmatpush1.msra.mxu1 %v2906_v28 }
 0x513   :  { %1257 = vmatprep.subr.mxu0 %v2912_v29  ;;  %1328 = vmatprep.subr.mxu1 %v2918_v30 }
 0x514   :  { %1258 = vmatpush1.msra.mxu0 %v2924_v31  ;;  %1329 = vmatpush1.msra.mxu1 %v2930_v32 }
 0x515   :  { %1259 = vmatprep.subr.mxu0 %v2936_v33  ;;  %1330 = vmatprep.subr.mxu1 %v2942_v34 }
 0x516   :  { %1260 = vmatpush1.msra.mxu0 %v2948_v35  ;;  %1331 = vmatpush1.msra.mxu1 %v2954_v36 }
 0x517   :  { %1261 = vmatprep.subr.mxu0 %v2960_v37  ;;  %1332 = vmatprep.subr.mxu1 %v2966_v38 }
 0x518   :  { %1262 = vmatpush1.msra.mxu0 %v2972_v39  ;;  %1333 = vmatpush1.msra.mxu1 %v2978_v40 }
 0x519   :  { %1263 = vmatprep.subr.mxu0 %v2984_v41  ;;  %1334 = vmatprep.subr.mxu1 %v2990_v42 }
 0x51a   :  { %1264 = vmatpush1.msra.mxu0 %v3540_v59  ;;  %1335 = vmatpush1.msra.mxu1 %v3541_v51  ;;  %v1226_v51 = vpop.permute.xlu1 %1225 }
 0x51b   :  { %1265 = vmatprep.subr.mxu0 %v3542_v44  ;;  %1336 = vmatprep.subr.mxu1 %v3543_v46  ;;  %vm1227_vm13 = vcmp.eq.s32.totalorder %v1226_v51, 1 }
 0x51c   :  { %1266 = vmatpush1.msra.mxu0 %v3544_v48  ;;  %1337 = vmatpush1.msra.mxu1 %v3545_v10  ;;  %v1678_v10 = vld [vmem:[%s3336_s1 + $0xb0] sm:$0xff] }
 0x51d   :  { %1267 = vmatprep.subr.mxu0 %v3546_v20  ;;  %1338 = vmatprep.subr.mxu1 %v3547_v43  ;;  %v3558_v43 = vld [vmem:[#allocation18_spill] sm:$0xff] }
 0x51e   :  { %1268 = vmatpush1.msra.mxu0 %v3548_v49  ;;  %1339 = vmatpush1.msra.mxu1 %v3549_v54  ;;  %v3559_v54 = vld [vmem:[#allocation11_spill] sm:$0xff] }
 0x51f   :  { %1269 = vmatprep.subr.mxu0 %v3550_v22  ;;  %1340 = vmatprep.subr.mxu1 %v3551_v23  ;;  %v3560_v22 = vld [vmem:[#allocation6_spill] sm:$0xff] }
 0x520   :  { %1270 = vmatpush1.msra.mxu0 %v3552_v52  ;;  %1341 = vmatpush1.msra.mxu1 %v3553_v57  ;;  %v1676_v57 = vld [vmem:[%s3336_s1 + $0xa0] sm:$0xff] }
 0x521   :  { %1271 = vmatprep.subr.mxu0 %v3554_v63  ;;  %1342 = vmatprep.subr.mxu1 %v3555_v5  ;;  %v1677_v5 = vld [vmem:[%s3336_s1 + $0xa8] sm:$0xff] }
 0x522   :  { %1272 = vmatpush1.msra.mxu0 %v3556_v62  ;;  %1305 = vmatprep.mubr.f32.mxu0 %v3557_v53 }
 0x523   :  { %1343 = vmatpush1.msra.mxu1 %v3558_v43  ;;  %1376 = vmatprep.mubr.f32.mxu1 %v3557_v53 }
 0x524   :  { %1432 = vmatprep.subr.mxu0 %v3559_v54  ;;  %1503 = vmatprep.subr.mxu1 %v3560_v22  ;;  %v1679_v54 = vld [vmem:[%s3336_s1 + $0xb8] sm:$0xff] }
 0x5c3   :  { %v1116_v52 = vpop.f32.mrf.mxu0  ;;  %v1187_v43 = vpop.f32.mrf.mxu1 }
 0x5c4   :  { %v1192_v62 = vadd.f32 %v1676_v57, %v1116_v52  ;;  %v1194_v52 = vadd.f32 %v1678_v10, %v1187_v43  ;;  %v1683_v43 = vld [vmem:[%s3337_s2 + $0x28] sm:$0xff] }
 0x5c5   :  { %v1118_v63 = vpop.f32.mrf.mxu0  ;;  %v1189_v22 = vpop.f32.mrf.mxu1 }
 0x5c6   :  { %v1680_v23 = vmul.f32 -1.442695, %v1192_v62  ;;  %v1193_v49 = vadd.f32 %v1677_v5, %v1118_v63  ;;  %v1195_v20 = vadd.f32 %v1679_v54, %v1189_v22 }
 0x5c8   :  { %1789 = vpow2.f32 %v1680_v23  ;;  %v1681_v53 = vmul.f32 -1.442695, %v1193_v49  ;;  %v1682_v48 = vmul.f32 -1.442695, %v1195_v20 }
 0x5ca   :  { %1791 = vpow2.f32 %v1681_v53 }
 0x5cb   :  { %1793 = vpow2.f32 %v1682_v48 }
 0x5d5   :  { %v1790_v46 = vpop.eup %1789 }
 0x5d6   :  { %v1199_v57 = vadd.f32 1.0, %v1790_v46 }
 0x5d7   :  { %v1792_v62 = vpop.eup %1791 }
 0x5d8   :  { %1795 = vrcp.f32 %v1199_v57  ;;  %v1205_v23 = vadd.f32 1.0, %v1792_v62  ;;  %v1794_v49 = vpop.eup %1793 }
 0x5d9   :  { %1797 = vtanh.f32 %v1194_v52  ;;  %v1212_v44 = vadd.f32 1.0, %v1794_v49 }
 0x5da   :  { %1799 = vrcp.f32 %v1205_v23 }
 0x5db   :  { %1801 = vrcp.f32 %v1212_v44 }
 0x5e5   :  { %v1796_v63 = vpop.eup %1795 }
 0x5e6   :  { %v1798_v5 = vpop.eup %1797 }
 0x5e7   :  { %v1800_v53 = vpop.eup %1799  ;;  %v1216_v54 = vmul.f32 %v1798_v5, %v1796_v63  ;;  %v1692_v63 = vld [vmem:[%s3337_s2 + $0x30] sm:$0xff] }
 0x5e8   :  { %v1215_v22 = vmul.f32 %v1800_v53, %v3119_v50  ;;  %v1802_v48 = vpop.eup %1801 }
 0x5ea   :  { %v1217_v59 = vadd.f32 %v1216_v54, %v1215_v22  ;;  %v1694_v22 = vld [vmem:[%s3336_s1 + $0xe0] sm:$0xff] }
 0x5ec   :  { %1803 = vtanh.f32 %v1217_v59  ;;  %v3212_v46 = vsel %vm1227_vm13, %v1217_v59, %v3119_v50 }
 0x5f9   :  { %v1804_v10 = vpop.eup %1803 }
 0x5fa   :  { %v1219_v20 = vmul.f32 %v1804_v10, %v1802_v48  ;;  %v1695_v48 = vld [vmem:[%s3336_s1 + $0xe8] sm:$0xff] }
 0x5fc   :  { %v3218_v52 = vsel %vm1227_vm13, %v1219_v20, %v3125_v58  ;;  %v1232_v57 = vsel %vm1227_vm13, %v1219_v20, 0.0 }
 0x5fd   :  { %v1233_v62 = vadd.f32 %v1683_v43, %v1232_v57  ;;  %1306 = vmatmul.mubr.f32.vlgmr.msra.gmra.mxu0 %v3218_v52  ;;  %1377 = vmatmul.mubr.f32.vlgmr.msra.gmra.mxu1 %v3218_v52 }
 0x5fe   :  { %1433 = vmatpush1.msra.mxu0 %v2729_v45  ;;  %1504 = vmatpush1.msra.mxu1 %v2735_v55  ;;  %v3561_v45 = vld [vmem:[#allocation4_spill] sm:$0xff]  ;;  %v3562_v55 = vld [vmem:[#allocation5_spill] sm:$0xff] }
 0x5ff   :  { %1684 = vst [vmem:[%s3338_s4 + $0x28] sm:$0xff] %v1233_v62  ;;  %1434 = vmatprep.subr.mxu0 %v2744_v0  ;;  %1505 = vmatprep.subr.mxu1 %v2750_v61  ;;  %v3563_v0 = vld [vmem:[#allocation13_spill] sm:$0xff]  ;;  %v3564_v61 = vld [vmem:[#allocation7_spill] sm:$0xff] }
 0x600   :  { %1435 = vmatpush1.msra.mxu0 %v2756_v56  ;;  %1506 = vmatpush1.msra.mxu1 %v2762_v60  ;;  %v3565_v56 = vld [vmem:[#allocation15_spill] sm:$0xff]  ;;  %v3566_v60 = vld [vmem:[#allocation8_spill] sm:$0xff] }
 0x601   :  { %1436 = vmatprep.subr.mxu0 %v2768_v47  ;;  %1507 = vmatprep.subr.mxu1 %v2774_v3  ;;  %v3567_v47 = vld [vmem:[#allocation17_spill] sm:$0xff] }
 0x602   :  { %1437 = vmatpush1.msra.mxu0 %v2780_v1  ;;  %1508 = vmatpush1.msra.mxu1 %v2786_v2  ;;  %v3568_v3 = vld [vmem:[#allocation9_spill] sm:$0xff]  ;;  %v3569_v1 = vld [vmem:[#allocation19_spill] sm:$0xff]  ;;  %v3570_v2 = vld [vmem:[#allocation10_spill] sm:$0xff] }
 0x603   :  { %1438 = vmatprep.subr.mxu0 %v2792_v4  ;;  %1509 = vmatprep.subr.mxu1 %v2798_v6  ;;  %v3571_v4 = vld [vmem:[#allocation20_spill] sm:$0xff] }
 0x604   :  { %1439 = vmatpush1.msra.mxu0 %v2804_v7  ;;  %1510 = vmatpush1.msra.mxu1 %v2810_v8  ;;  %v3572_v6 = vld [vmem:[#allocation12_spill] sm:$0xff]  ;;  %v3573_v7 = vld [vmem:[#allocation21_spill] sm:$0xff]  ;;  %v3574_v8 = vld [vmem:[#allocation14_spill] sm:$0xff] }
 0x605   :  { %1440 = vmatprep.subr.mxu0 %v2816_v9  ;;  %1511 = vmatprep.subr.mxu1 %v2822_v11  ;;  %v3575_v9 = vld [vmem:[#allocation22_spill] sm:$0xff]  ;;  %v3576_v11 = vld [vmem:[#allocation16_spill] sm:$0xff] }
 0x606   :  { %1441 = vmatpush1.msra.mxu0 %v2828_v12  ;;  %1512 = vmatpush1.msra.mxu1 %v2834_v13  ;;  %v3577_v12 = vld [vmem:[#allocation23_spill] sm:$0xff]  ;;  %v3578_v13 = vmov 0.0  }
 0x607   :  { %1442 = vmatprep.subr.mxu0 %v2840_v14  ;;  %1513 = vmatprep.subr.mxu1 %v2846_v15  ;;  %v3579_v14 = vld [vmem:[#allocation18_spill] sm:$0xff]  ;;  %v1685_v15 = vld [vmem:[%s3336_s1 + $0xc0] sm:$0xff] }
 0x608   :  { %1443 = vmatpush1.msra.mxu0 %v2852_v16  ;;  %1514 = vmatpush1.msra.mxu1 %v2858_v17  ;;  %v1686_v17 = vld [vmem:[%s3336_s1 + $0xc8] sm:$0xff] }
 0x609   :  { %1444 = vmatprep.subr.mxu0 %v2864_v18  ;;  %1515 = vmatprep.subr.mxu1 %v2870_v19 }
 0x60a   :  { %1445 = vmatpush1.msra.mxu0 %v2876_v21  ;;  %1516 = vmatpush1.msra.mxu1 %v2882_v24 }
 0x60b   :  { %1446 = vmatprep.subr.mxu0 %v2888_v25  ;;  %1517 = vmatprep.subr.mxu1 %v2894_v26 }
 0x60c   :  { %1447 = vmatpush1.msra.mxu0 %v2900_v27  ;;  %1518 = vmatpush1.msra.mxu1 %v2906_v28  ;;  %v1688_v27 = vld [vmem:[%s3336_s1 + $0xd8] sm:$0xff] }
 0x60d   :  { %1448 = vmatprep.subr.mxu0 %v2912_v29  ;;  %1519 = vmatprep.subr.mxu1 %v2918_v30  ;;  %v1687_v30 = vld [vmem:[%s3336_s1 + $0xd0] sm:$0xff] }
 0x60e   :  { %1449 = vmatpush1.msra.mxu0 %v2924_v31  ;;  %1520 = vmatpush1.msra.mxu1 %v2930_v32 }
 0x60f   :  { %1450 = vmatprep.subr.mxu0 %v2936_v33  ;;  %1521 = vmatprep.subr.mxu1 %v2942_v34 }
 0x610   :  { %1451 = vmatpush1.msra.mxu0 %v2948_v35  ;;  %1522 = vmatpush1.msra.mxu1 %v2954_v36 }
 0x611   :  { %1452 = vmatprep.subr.mxu0 %v2960_v37  ;;  %1523 = vmatprep.subr.mxu1 %v2966_v38 }
 0x612   :  { %1453 = vmatpush1.msra.mxu0 %v2972_v39  ;;  %1524 = vmatpush1.msra.mxu1 %v2978_v40 }
 0x613   :  { %1454 = vmatprep.subr.mxu0 %v2984_v41  ;;  %1525 = vmatprep.subr.mxu1 %v2990_v42  ;;  %v1417_v42 = vpop.permute.xlu0 %1416 }
 0x614   :  { %1455 = vmatpush1.msra.mxu0 %v3561_v45  ;;  %1526 = vmatpush1.msra.mxu1 %v3562_v55  ;;  %vm1418_vm14 = vcmp.eq.s32.totalorder %v1417_v42, 1  ;;  %v1697_v45 = vld [vmem:[%s3336_s1 + $0xf8] sm:$0xff] }
 0x615   :  { %1456 = vmatprep.subr.mxu0 %v3563_v0  ;;  %1527 = vmatprep.subr.mxu1 %v3564_v61  ;;  %v1696_v61 = vld [vmem:[%s3336_s1 + $0xf0] sm:$0xff] }
 0x616   :  { %1457 = vmatpush1.msra.mxu0 %v3565_v56  ;;  %1528 = vmatpush1.msra.mxu1 %v3566_v60 }
 0x617   :  { %1458 = vmatprep.subr.mxu0 %v3567_v47  ;;  %1529 = vmatprep.subr.mxu1 %v3568_v3 }
 0x618   :  { %1459 = vmatpush1.msra.mxu0 %v3569_v1  ;;  %1530 = vmatpush1.msra.mxu1 %v3570_v2 }
 0x619   :  { %1460 = vmatprep.subr.mxu0 %v3571_v4  ;;  %1531 = vmatprep.subr.mxu1 %v3572_v6 }
 0x61a   :  { %1461 = vmatpush1.msra.mxu0 %v3573_v7  ;;  %1532 = vmatpush1.msra.mxu1 %v3574_v8 }
 0x61b   :  { %1462 = vmatprep.subr.mxu0 %v3575_v9  ;;  %1533 = vmatprep.subr.mxu1 %v3576_v11  ;;  %v1608_v11 = vpop.permute.xlu1 %1607 }
 0x61c   :  { %1463 = vmatpush1.msra.mxu0 %v3577_v12  ;;  %1496 = vmatprep.mubr.f32.mxu0 %v3578_v13  ;;  %vm1609_vm15 = vcmp.eq.s32.totalorder %v1608_v11, 1 }
 0x61d   :  { %1534 = vmatpush1.msra.mxu1 %v3579_v14  ;;  %1567 = vmatprep.mubr.f32.mxu1 %v3578_v13 }
 0x6bd   :  { %v1307_v16 = vpop.f32.mrf.mxu0  ;;  %v1378_v25 = vpop.f32.mrf.mxu1 }
 0x6be   :  { %v1383_v18 = vadd.f32 %v1685_v15, %v1307_v16  ;;  %v1385_v33 = vadd.f32 %v1687_v30, %v1378_v25 }
 0x6bf   :  { %v1309_v19 = vpop.f32.mrf.mxu0  ;;  %v1380_v28 = vpop.f32.mrf.mxu1 }
 0x6c0   :  { %v1689_v21 = vmul.f32 -1.442695, %v1383_v18  ;;  %v1384_v24 = vadd.f32 %v1686_v17, %v1309_v19  ;;  %v1386_v29 = vadd.f32 %v1688_v27, %v1380_v28  ;;  %v1701_v19 = vld [vmem:[%s3337_s2 + $0x38] sm:$0xff] }
 0x6c2   :  { %1805 = vpow2.f32 %v1689_v21  ;;  %v1690_v26 = vmul.f32 -1.442695, %v1384_v24  ;;  %v1691_v31 = vmul.f32 -1.442695, %v1386_v29 }
 0x6c4   :  { %1807 = vpow2.f32 %v1690_v26 }
 0x6c5   :  { %1809 = vpow2.f32 %v1691_v31 }
 0x6cf   :  { %v1806_v32 = vpop.eup %1805 }
 0x6d0   :  { %v1390_v34 = vadd.f32 1.0, %v1806_v32 }
 0x6d1   :  { %v1808_v35 = vpop.eup %1807 }
 0x6d2   :  { %1811 = vrcp.f32 %v1390_v34  ;;  %v1396_v36 = vadd.f32 1.0, %v1808_v35  ;;  %v1810_v37 = vpop.eup %1809 }
 0x6d3   :  { %1813 = vtanh.f32 %v1385_v33  ;;  %v1403_v41 = vadd.f32 1.0, %v1810_v37 }
 0x6d4   :  { %1815 = vrcp.f32 %v1396_v36 }
 0x6d5   :  { %1817 = vrcp.f32 %v1403_v41 }
 0x6df   :  { %v1812_v38 = vpop.eup %1811 }
 0x6e0   :  { %v1814_v39 = vpop.eup %1813 }
 0x6e1   :  { %v1816_v40 = vpop.eup %1815  ;;  %v1407_v50 = vmul.f32 %v1814_v39, %v1812_v38 }
 0x6e2   :  { %v1406_v58 = vmul.f32 %v1816_v40, %v3212_v46  ;;  %v1818_v44 = vpop.eup %1817 }
 0x6e4   :  { %v1408_v59 = vadd.f32 %v1407_v50, %v1406_v58 }
 0x6e6   :  { %1819 = vtanh.f32 %v1408_v59  ;;  %v1420_v51 = vsel %vm1418_vm14, %v1408_v59, %v3212_v46 }
 0x6f3   :  { %v1820_v23 = vpop.eup %1819 }
 0x6f4   :  { %v1410_v49 = vmul.f32 %v1820_v23, %v1818_v44 }
 0x6f6   :  { %v1419_v5 = vsel %vm1418_vm14, %v1410_v49, %v3218_v52  ;;  %v1423_v53 = vsel %vm1418_vm14, %v1410_v49, 0.0 }
 0x6f7   :  { %v1424_v54 = vadd.f32 %v1692_v63, %v1423_v53  ;;  %1497 = vmatmul.mubr.f32.vlgmr.msra.gmra.mxu0 %v1419_v5  ;;  %1568 = vmatmul.mubr.f32.vlgmr.msra.gmra.mxu1 %v1419_v5 }
 0x6f9   :  { %1693 = vst [vmem:[%s3338_s4 + $0x30] sm:$0xff] %v1424_v54 }
 0x7b7   :  { %v1498_v46 = vpop.f32.mrf.mxu0  ;;  %v1569_v57 = vpop.f32.mrf.mxu1 }
 0x7b8   :  { %v1574_v10 = vadd.f32 %v1694_v22, %v1498_v46  ;;  %v1576_v47 = vadd.f32 %v1696_v61, %v1569_v57 }
 0x7b9   :  { %v1500_v20 = vpop.f32.mrf.mxu0  ;;  %v1571_v55 = vpop.f32.mrf.mxu1 }
 0x7ba   :  { %v1698_v43 = vmul.f32 -1.442695, %v1574_v10  ;;  %v1575_v52 = vadd.f32 %v1695_v48, %v1500_v20  ;;  %v1577_v0 = vadd.f32 %v1697_v45, %v1571_v55 }
 0x7bc   :  { %1821 = vpow2.f32 %v1698_v43  ;;  %v1699_v62 = vmul.f32 -1.442695, %v1575_v52  ;;  %v1700_v56 = vmul.f32 -1.442695, %v1577_v0 }
 0x7be   :  { %1823 = vpow2.f32 %v1699_v62 }
 0x7bf   :  { %1825 = vpow2.f32 %v1700_v56 }
 0x7c9   :  { %v1822_v60 = vpop.eup %1821 }
 0x7ca   :  { %v1581_v3 = vadd.f32 1.0, %v1822_v60 }
 0x7cb   :  { %v1824_v1 = vpop.eup %1823 }
 0x7cc   :  { %1827 = vrcp.f32 %v1581_v3  ;;  %v1587_v2 = vadd.f32 1.0, %v1824_v1  ;;  %v1826_v4 = vpop.eup %1825 }
 0x7cd   :  { %1829 = vtanh.f32 %v1576_v47  ;;  %v1594_v9 = vadd.f32 1.0, %v1826_v4 }
 0x7ce   :  { %1831 = vrcp.f32 %v1587_v2 }
 0x7cf   :  { %1833 = vrcp.f32 %v1594_v9 }
 0x7d9   :  { %v1828_v6 = vpop.eup %1827 }
 0x7da   :  { %v1830_v7 = vpop.eup %1829 }
 0x7db   :  { %v1832_v8 = vpop.eup %1831  ;;  %v1598_v12 = vmul.f32 %v1830_v7, %v1828_v6 }
 0x7dc   :  { %v1597_v13 = vmul.f32 %v1832_v8, %v1420_v51  ;;  %v1834_v16 = vpop.eup %1833 }
 0x7de   :  { %v1599_v14 = vadd.f32 %v1598_v12, %v1597_v13 }
 0x7e0   :  { %1835 = vtanh.f32 %v1599_v14  ;;  %v1611_v15 = vsel %vm1609_vm15, %v1599_v14, %v1420_v51 }
 0x7e1   :  { %1624 = vst [vmem:[%s3339_s6] sm:$0xff] %v1611_v15 }
 0x7ed   :  { %v1836_v17 = vpop.eup %1835 }
 0x7ee   :  { %v1601_v18 = vmul.f32 %v1836_v17, %v1834_v16 }
 0x7f0   :  { %v1610_v21 = vsel %vm1609_vm15, %v1601_v18, %v1419_v5  ;;  %v1614_v24 = vsel %vm1609_vm15, %v1601_v18, 0.0 }
 0x7f1   :  { %v1615_v25 = vadd.f32 %v1701_v19, %v1614_v24  ;;  %1623 = vst [vmem:[%s3340_s5] sm:$0xff] %v1610_v21 }
 0x7f3   :  { %1702 = vst [vmem:[%s3338_s4 + $0x38] sm:$0xff] %v1615_v25 }

</bundles_post_ra>
